<compile_context>
chip_gen: v7x
topology: tpu7x:2x2x1
jax: 0.10.0
libtpu: 0.0.40
codegen_flags: <defaults>
</compile_context>

<pallas_src>
import math

import jax
import jax.numpy as jnp
import numpy as np
from jax.experimental import pallas as pl
from jax.experimental.pallas import tpu as pltpu

# direction -> (spatial axis: 0 = H, 1 = W ; circular-gather roll sign ; dilation)
_DIR = {"d": (0, -1, 1), "u": (0, +1, 2), "r": (1, -1, 4), "l": (1, +1, 8)}
_DIR_ORDER = ("d", "u", "r", "l")  # matches the torch forward loop order


# ------------------------------------------------------------------
# Host-side parameter packing.  Everything that is per-position and static is folded into
# per-tap (H, W*C) weight planes:
#   * the eval-mode BatchNorm scale (exact),
#   * the MFIA step scale alpha (valid for alpha > 0),
#   * the zero padding of the dilated 3x3 conv in BOTH H and W directions.
# Biases get the BN bias * alpha, tiled W times along the lane axis.
# ------------------------------------------------------------------
def pack_mfia_params(params, H, W, C, iters, alpha):
    assert alpha > 0, "alpha folding into the ReLU argument requires alpha > 0"
    WC = W * C
    hrow = np.arange(H)
    wcol = np.arange(W)
    tap_planes, bias_rows, step_meta = [], [], []
    for direction in _DIR_ORDER:
        axis_hw, sign, dil = _DIR[direction]
        k = 1 if dil == 1 else 3
        size = H if axis_hw == 0 else W
        for i in range(iters):
            s = size // (2 ** (iters - i))
            w, bn_scale, bn_bias = (np.asarray(a, np.float32)
                                    for a in params["mfia"][(direction, i)])
            tap_base = len(tap_planes)
            bias_rows.append(np.tile((alpha * bn_bias).reshape(1, C), (W, 1)).reshape(WC))
            if k == 1:                                     # 1x1 depthwise conv: one tap
                coef = alpha * w[0, 0, :] * bn_scale
                tap_planes.append(np.tile(coef.reshape(1, 1, C), (H, W, 1)).reshape(H, WC))
            else:                                          # dilated 3x3 depthwise conv: 9 taps
                for ki in range(3):
                    dh = (ki - 1) * dil
                    valid_h = ((hrow + dh) >= 0) & ((hrow + dh) < H)   # conv zero-padding in H
                    for kj in range(3):
                        dw = (kj - 1) * dil
                        valid_w = ((wcol + dw) >= 0) & ((wcol + dw) < W)  # conv zero-padding in W
                        coef = alpha * w[ki, kj, :] * bn_scale
                        plane = (valid_h.astype(np.float32)[:, None, None]
                                 * valid_w.astype(np.float32)[None, :, None]
                                 * coef[None, None, :]).reshape(H, WC)
                        tap_planes.append(plane)
            step_meta.append((axis_hw, sign * s, dil, tap_base))
    W_all = jnp.asarray(np.stack(tap_planes), jnp.float32)   # (T, H, WC)  dense tap planes
    B_all = jnp.asarray(np.stack(bias_rows), jnp.float32)    # (S, WC)     dense bias rows
    return W_all, B_all, step_meta


def _choose_block_batch(N):
    """Samples per grid step: amortize per-step overhead but keep >= 2 grid steps (v7x megacore)."""
    if N <= 1:
        return 1
    nb = min(8, max(1, N // 2))
    while N % nb != 0:   # keep NB a divisor of N so every block is full
        nb -= 1
    return nb


# ------------------------------------------------------------------
# Fused kernel: MFIA steps + global-avg attention, NB samples per grid invocation.
# ------------------------------------------------------------------
def build_fused_kernel(N, NB, H, W, C, step_meta, T, S, dtype=jnp.float32):
    WC = W * C
    # lane-dense layout assumptions (hold for MFIALane feature-map sizes)
    assert H % 8 == 0 and WC % 128 == 0, "tile must be (8,128)-aligned for in-kernel rolls"
    assert N % NB == 0
    inv_hw = 1.0 / float(H * W)

    def _roll(v, shift, axis):
        n = v.shape[axis]
        shift = int(shift) % n          # static shifts only (step_meta is Python ints)
        if shift == 0:
            return v
        return pltpu.roll(v, shift, axis)

    def kernel(x_ref, w_ref, b_ref, seg_ref, avg_ref):
        def body(i, carry):
            x = x_ref[i].astype(jnp.float32)                   # (H, W*C), stays resident in vregs

            # ---- MFIA: x += relu(conv_taps(circular_gather(x)) + bias)   (alpha/BN/pad folded) ----
            for s_idx, (axis_hw, g_shift, dil, tap_base) in enumerate(step_meta):
                # circular index gather == roll (H -> sublane roll, W -> lane roll by shift*C)
                xr = _roll(x, g_shift, 0) if axis_hw == 0 else _roll(x, g_shift * C, 1)
                if dil == 1:                                    # 1x1 depthwise conv
                    acc = xr * w_ref[tap_base]
                else:                                           # dilated 3x3 depthwise conv
                    acc = None
                    for ki in range(3):
                        dh = (ki - 1) * dil
                        r = xr if dh == 0 else _roll(xr, -dh, 0)
                        for kj in range(3):
                            dw = (kj - 1) * dil
                            t = r if dw == 0 else _roll(r, -dw * C, 1)
                            term = t * w_ref[tap_base + ki * 3 + kj]   # padding pre-folded in plane
                            acc = term if acc is None else acc + term
                x = x + jnp.maximum(acc + b_ref[s_idx], 0.0)    # BN bias (*alpha) + ReLU

            # ---- global-average-pool attention: seg = fea * mean_{H,W}(fea) ----
            t = jnp.sum(x, axis=0, keepdims=True)               # (1, W*C): sum over H
            if (W & (W - 1)) == 0:
                sh = C                                          # tree-reduce the W groups
                while sh < WC:
                    t = t + _roll(t, sh, 1)
                    sh *= 2
            else:
                colsum = t
                for j in range(1, W):
                    t = t + _roll(colsum, j * C, 1)
            avg_row = t * inv_hw                                # avg[c], tiled W times (lane-dense)
            seg_ref[i] = (x * avg_row).astype(seg_ref.dtype)
            avg_ref[i] = avg_row.astype(avg_ref.dtype)
            return carry

        jax.lax.fori_loop(0, NB, body, 0)                       # bounded live ranges per sample

    return pl.pallas_call(
        kernel,
        out_shape=(
            jax.ShapeDtypeStruct((N, H, WC), dtype),    # attended feature map (lane-dense NHWC view)
            jax.ShapeDtypeStruct((N, 1, WC), dtype),    # tiled channel-average row per sample
        ),
        grid=(N // NB,),
        in_specs=[
            pl.BlockSpec((NB, H, WC), lambda n: (n, 0, 0)),
            pl.BlockSpec((T, H, WC), lambda n: (0, 0, 0)),
            pl.BlockSpec((S, WC), lambda n: (0, 0)),
        ],
        out_specs=(
            pl.BlockSpec((NB, H, WC), lambda n: (n, 0, 0)),
            pl.BlockSpec((NB, 1, WC), lambda n: (n, 0, 0)),
        ),
        compiler_params=pltpu.CompilerParams(dimension_semantics=("parallel",)),
    )


# ------------------------------------------------------------------
# Forward wrapper
# ------------------------------------------------------------------
def mfialane_forward(batch_nchw, params, cfg):
    # TODO(synk): ResNetWrapper backbone not provided; input treated as the backbone feature map `fea`.
    N, C, H, W = batch_nchw.shape
    iters, alpha = cfg["iter"], cfg["alpha"]

    W_all, B_all, step_meta = pack_mfia_params(params, H, W, C, iters, alpha)
    T, S = int(W_all.shape[0]), int(B_all.shape[0])
    x2d = jnp.transpose(batch_nchw, (0, 2, 3, 1)).reshape(N, H, W * C).astype(jnp.float32)

    NB = _choose_block_batch(N)
    fused = build_fused_kernel(N, NB, H, W, C, step_meta, T, S, jnp.float32)
    seg2d, avg3 = fused(x2d, W_all, B_all)

    # TODO(synk): cfg.decoder class not provided; identity decoder -> attended feature map in NCHW.
    seg = jnp.transpose(seg2d.reshape(N, H, W, C), (0, 3, 1, 2))

    # ExistHead: Dropout2d(0.1) is identity in eval; tiny (N,E) FC + sigmoid done in the wrapper
    # so the kernel epilogue only emits lane-dense, unmasked stores.
    avg_c = avg3[:, 0, :C]                                      # (N, C)
    exist = jax.nn.sigmoid(avg_c @ params["fc_w"].T + params["fc_b"])
    return {"seg": seg, "exist": exist}


# ------------------------------------------------------------------
# Pure-JAX (no Pallas) reference of the PyTorch module in eval mode — used for verification.
# ------------------------------------------------------------------
def reference_forward(batch_nchw, params, cfg):
    iters, alpha = cfg["iter"], cfg["alpha"]
    x = jnp.transpose(batch_nchw, (0, 2, 3, 1)).astype(jnp.float32)    # NHWC
    N, H, W, C = x.shape
    for direction in _DIR_ORDER:
        axis_hw, sign, dil = _DIR[direction]
        k = 1 if dil == 1 else 3
        pad = 0 if k == 1 else dil
        size = H if axis_hw == 0 else W
        for i in range(iters):
            s = size // (2 ** (iters - i))
            w, bn_scale, bn_bias = params["mfia"][(direction, i)]
            xs = jnp.roll(x, sign * s, axis=1 + axis_hw)               # circular gather x[..., idx(,:)]
            if k == 1:
                acc = xs * w[0, 0, :]
            else:
                xp = jnp.pad(xs, ((0, 0), (pad, pad), (pad, pad), (0, 0)))
                acc = jnp.zeros_like(x)
                for ki in range(3):
                    for kj in range(3):
                        tap = xp[:, ki * dil:ki * dil + H, kj * dil:kj * dil + W, :]
                        acc = acc + tap * w[ki, kj, :]
            y = jnp.maximum(acc * bn_scale + bn_bias, 0.0)             # eval BatchNorm + ReLU
            x = x + alpha * y
    avg = jnp.mean(x, axis=(1, 2), keepdims=True)                      # AdaptiveAvgPool2d((1,1))
    seg = jnp.transpose(x * avg, (0, 3, 1, 2))
    exist = jax.nn.sigmoid(avg.reshape(N, C) @ params["fc_w"].T + params["fc_b"])
    return seg, exist


# ------------------------------------------------------------------
# Deterministic parameter init (mirrors ASPP_module._init_weight + BN/Linear defaults, eval mode)
# ------------------------------------------------------------------
def init_params(key, C, num_classes, iters):
    params = {"mfia": {}}
    eps = 1e-3
    # BatchNorm2d eval with gamma=1, beta=0, running_mean=0, running_var=1
    bn_scale = jnp.full((C,), 1.0 / math.sqrt(1.0 + eps), jnp.float32)
    bn_bias = jnp.zeros((C,), jnp.float32)
    for direction in _DIR_ORDER:
        dil = _DIR[direction][2]
        k = 1 if dil == 1 else 3
        sigma = math.sqrt(2.0 / (k * k * C))      # normal_(0, sqrt(2/n)), n = k*k*out_channels
        for i in range(iters):
            key, sub = jax.random.split(key)
            w = sigma * jax.random.normal(sub, (k, k, C), jnp.float32)  # depthwise weights
            params["mfia"][(direction, i)] = (w, bn_scale, bn_bias)
    E = num_classes - 1
    key, k1, k2 = jax.random.split(key, 3)
    bound = 1.0 / math.sqrt(C)
    params["fc_w"] = jax.random.uniform(k1, (E, C), jnp.float32, -bound, bound)  # torch (out, in)
    params["fc_b"] = jax.random.uniform(k2, (E,), jnp.float32, -bound, bound)
    return params


if __name__ == "__main__":
    # small shapes consistent with the module:
    #   chan = cfg.mfia.input_channel = 32, H = W = 16 (img // fea_stride), iter = 2, alpha = 2.0
    N, C, H, W = 4, 32, 16, 16
    cfg = {"iter": 2, "alpha": 2.0, "num_classes": 5}

    key = jax.random.PRNGKey(0)
    key, kx = jax.random.split(key)
    x = jax.random.normal(kx, (N, C, H, W), jnp.float32)   # NCHW backbone feature map
    params = init_params(key, C, cfg["num_classes"], cfg["iter"])

    out = mfialane_forward(x, params, cfg)
    jax.block_until_ready(out["seg"])
    jax.block_until_ready(out["exist"])

    assert out["seg"].shape == (N, C, H, W)
    assert out["exist"].shape == (N, cfg["num_classes"] - 1)

    # verify the fused kernel against the pure-JAX reference of the module
    seg_ref, exist_ref = reference_forward(x, params, cfg)
    np.testing.assert_allclose(np.asarray(out["seg"]), np.asarray(seg_ref), rtol=1e-3, atol=1e-3)
    np.testing.assert_allclose(np.asarray(out["exist"]), np.asarray(exist_ref), rtol=1e-3, atol=1e-3)

    print("KERNEL_OK")
</pallas_src>

<mosaic_0001>
module attributes {stable_mosaic.version = 11 : i64} {
  func.func @kernel(%arg0: i32, %arg1: memref<2x16x512xf32, #tpu.memory_space<vmem>>, %arg2: memref<56x16x512xf32, #tpu.memory_space<vmem>>, %arg3: memref<8x512xf32, #tpu.memory_space<vmem>>, %arg4: memref<2x16x512xf32, #tpu.memory_space<vmem>>, %arg5: memref<2x1x512xf32, #tpu.memory_space<vmem>>) attributes {dimension_semantics = [#tpu.dimension_semantics<parallel>], iteration_bounds = array<i64: 2>, scalar_prefetch = 0 : i64, scratch_operands = 0 : i64, tpu.core_type = #tpu.core_type<tc>, window_params = [{transform_indices = @transform_0, window_bounds = array<i64: 2, 16, 512>}, {pipeline_mode = #tpu.pipeline_mode<synchronous>, transform_indices = @transform_1, window_bounds = array<i64: 56, 16, 512>}, {pipeline_mode = #tpu.pipeline_mode<synchronous>, transform_indices = @transform_2, window_bounds = array<i64: 8, 512>}, {transform_indices = @transform_3, window_bounds = array<i64: 2, 16, 512>}, {transform_indices = @transform_4, window_bounds = array<i64: 2, 1, 512>}]} {
    %c0_i32 = arith.constant 0 : i32
    %c2_i32 = arith.constant 2 : i32
    %0 = arith.addi %c0_i32, %c2_i32 : i32
    %c1_i32 = arith.constant 1 : i32
    scf.for %arg6 = %c0_i32 to %0 step %c1_i32  : i32 {
      %1 = arith.index_cast %arg6 : i32 to index
      %c0 = arith.constant 0 : index
      %c0_1 = arith.constant 0 : index
      %2 = vector.load %arg1[%1, %c0, %c0_1] : memref<2x16x512xf32, #tpu.memory_space<vmem>>, vector<1x16x512xf32>
      %3 = vector.shape_cast %2 : vector<1x16x512xf32> to vector<16x512xf32>
      %c12_i32 = arith.constant 12 : i32
      %4 = tpu.dynamic_rotate %3 by %c12_i32 dim 0 : vector<16x512xf32>, i32 -> vector<16x512xf32>
      %c0_2 = arith.constant 0 : index
      %c0_3 = arith.constant 0 : index
      %c0_4 = arith.constant 0 : index
      %5 = vector.load %arg2[%c0_2, %c0_3, %c0_4] : memref<56x16x512xf32, #tpu.memory_space<vmem>>, vector<1x16x512xf32>
      %6 = vector.shape_cast %5 : vector<1x16x512xf32> to vector<16x512xf32>
      %7 = arith.mulf %4, %6 : vector<16x512xf32>
      %c0_5 = arith.constant 0 : index
      %c0_6 = arith.constant 0 : index
      %8 = vector.load %arg3[%c0_5, %c0_6] : memref<8x512xf32, #tpu.memory_space<vmem>>, vector<1x512xf32>
      %9 = vector.shape_cast %8 : vector<1x512xf32> to vector<512xf32>
      %10 = vector.shape_cast %9 : vector<512xf32> to vector<1x512xf32>
      %11 = vector.broadcast %10 : vector<1x512xf32> to vector<16x512xf32>
      %12 = arith.addf %7, %11 : vector<16x512xf32>
      %cst = arith.constant 0.000000e+00 : f32
      %13 = vector.broadcast %cst : f32 to vector<16x512xf32>
      %14 = arith.maximumf %12, %13 : vector<16x512xf32>
      %15 = arith.addf %3, %14 : vector<16x512xf32>
      %c8_i32 = arith.constant 8 : i32
      %16 = tpu.dynamic_rotate %15 by %c8_i32 dim 0 : vector<16x512xf32>, i32 -> vector<16x512xf32>
      %c1 = arith.constant 1 : index
      %c0_7 = arith.constant 0 : index
      %c0_8 = arith.constant 0 : index
      %17 = vector.load %arg2[%c1, %c0_7, %c0_8] : memref<56x16x512xf32, #tpu.memory_space<vmem>>, vector<1x16x512xf32>
      %18 = vector.shape_cast %17 : vector<1x16x512xf32> to vector<16x512xf32>
      %19 = arith.mulf %16, %18 : vector<16x512xf32>
      %c1_9 = arith.constant 1 : index
      %c0_10 = arith.constant 0 : index
      %20 = vector.load %arg3[%c1_9, %c0_10] : memref<8x512xf32, #tpu.memory_space<vmem>>, vector<1x512xf32>
      %21 = vector.shape_cast %20 : vector<1x512xf32> to vector<512xf32>
      %22 = vector.shape_cast %21 : vector<512xf32> to vector<1x512xf32>
      %23 = vector.broadcast %22 : vector<1x512xf32> to vector<16x512xf32>
      %24 = arith.addf %19, %23 : vector<16x512xf32>
      %cst_11 = arith.constant 0.000000e+00 : f32
      %25 = vector.broadcast %cst_11 : f32 to vector<16x512xf32>
      %26 = arith.maximumf %24, %25 : vector<16x512xf32>
      %27 = arith.addf %15, %26 : vector<16x512xf32>
      %c4_i32 = arith.constant 4 : i32
      %28 = tpu.dynamic_rotate %27 by %c4_i32 dim 0 : vector<16x512xf32>, i32 -> vector<16x512xf32>
      %c2_i32_12 = arith.constant 2 : i32
      %29 = tpu.dynamic_rotate %28 by %c2_i32_12 dim 0 : vector<16x512xf32>, i32 -> vector<16x512xf32>
      %c64_i32 = arith.constant 64 : i32
      %30 = tpu.dynamic_rotate %29 by %c64_i32 dim 1 : vector<16x512xf32>, i32 -> vector<16x512xf32>
      %c2 = arith.constant 2 : index
      %c0_13 = arith.constant 0 : index
      %c0_14 = arith.constant 0 : index
      %31 = vector.load %arg2[%c2, %c0_13, %c0_14] : memref<56x16x512xf32, #tpu.memory_space<vmem>>, vector<1x16x512xf32>
      %32 = vector.shape_cast %31 : vector<1x16x512xf32> to vector<16x512xf32>
      %33 = arith.mulf %30, %32 : vector<16x512xf32>
      %c3 = arith.constant 3 : index
      %c0_15 = arith.constant 0 : index
      %c0_16 = arith.constant 0 : index
      %34 = vector.load %arg2[%c3, %c0_15, %c0_16] : memref<56x16x512xf32, #tpu.memory_space<vmem>>, vector<1x16x512xf32>
      %35 = vector.shape_cast %34 : vector<1x16x512xf32> to vector<16x512xf32>
      %36 = arith.mulf %29, %35 : vector<16x512xf32>
      %37 = arith.addf %33, %36 : vector<16x512xf32>
      %c448_i32 = arith.constant 448 : i32
      %38 = tpu.dynamic_rotate %29 by %c448_i32 dim 1 : vector<16x512xf32>, i32 -> vector<16x512xf32>
      %c4 = arith.constant 4 : index
      %c0_17 = arith.constant 0 : index
      %c0_18 = arith.constant 0 : index
      %39 = vector.load %arg2[%c4, %c0_17, %c0_18] : memref<56x16x512xf32, #tpu.memory_space<vmem>>, vector<1x16x512xf32>
      %40 = vector.shape_cast %39 : vector<1x16x512xf32> to vector<16x512xf32>
      %41 = arith.mulf %38, %40 : vector<16x512xf32>
      %42 = arith.addf %37, %41 : vector<16x512xf32>
      %c64_i32_19 = arith.constant 64 : i32
      %43 = tpu.dynamic_rotate %28 by %c64_i32_19 dim 1 : vector<16x512xf32>, i32 -> vector<16x512xf32>
      %c5 = arith.constant 5 : index
      %c0_20 = arith.constant 0 : index
      %c0_21 = arith.constant 0 : index
      %44 = vector.load %arg2[%c5, %c0_20, %c0_21] : memref<56x16x512xf32, #tpu.memory_space<vmem>>, vector<1x16x512xf32>
      %45 = vector.shape_cast %44 : vector<1x16x512xf32> to vector<16x512xf32>
      %46 = arith.mulf %43, %45 : vector<16x512xf32>
      %47 = arith.addf %42, %46 : vector<16x512xf32>
      %c6 = arith.constant 6 : index
      %c0_22 = arith.constant 0 : index
      %c0_23 = arith.constant 0 : index
      %48 = vector.load %arg2[%c6, %c0_22, %c0_23] : memref<56x16x512xf32, #tpu.memory_space<vmem>>, vector<1x16x512xf32>
      %49 = vector.shape_cast %48 : vector<1x16x512xf32> to vector<16x512xf32>
      %50 = arith.mulf %28, %49 : vector<16x512xf32>
      %51 = arith.addf %47, %50 : vector<16x512xf32>
      %c448_i32_24 = arith.constant 448 : i32
      %52 = tpu.dynamic_rotate %28 by %c448_i32_24 dim 1 : vector<16x512xf32>, i32 -> vector<16x512xf32>
      %c7 = arith.constant 7 : index
      %c0_25 = arith.constant 0 : index
      %c0_26 = arith.constant 0 : index
      %53 = vector.load %arg2[%c7, %c0_25, %c0_26] : memref<56x16x512xf32, #tpu.memory_space<vmem>>, vector<1x16x512xf32>
      %54 = vector.shape_cast %53 : vector<1x16x512xf32> to vector<16x512xf32>
      %55 = arith.mulf %52, %54 : vector<16x512xf32>
      %56 = arith.addf %51, %55 : vector<16x512xf32>
      %c14_i32 = arith.constant 14 : i32
      %57 = tpu.dynamic_rotate %28 by %c14_i32 dim 0 : vector<16x512xf32>, i32 -> vector<16x512xf32>
      %c64_i32_27 = arith.constant 64 : i32
      %58 = tpu.dynamic_rotate %57 by %c64_i32_27 dim 1 : vector<16x512xf32>, i32 -> vector<16x512xf32>
      %c8 = arith.constant 8 : index
      %c0_28 = arith.constant 0 : index
      %c0_29 = arith.constant 0 : index
      %59 = vector.load %arg2[%c8, %c0_28, %c0_29] : memref<56x16x512xf32, #tpu.memory_space<vmem>>, vector<1x16x512xf32>
      %60 = vector.shape_cast %59 : vector<1x16x512xf32> to vector<16x512xf32>
      %61 = arith.mulf %58, %60 : vector<16x512xf32>
      %62 = arith.addf %56, %61 : vector<16x512xf32>
      %c9 = arith.constant 9 : index
      %c0_30 = arith.constant 0 : index
      %c0_31 = arith.constant 0 : index
      %63 = vector.load %arg2[%c9, %c0_30, %c0_31] : memref<56x16x512xf32, #tpu.memory_space<vmem>>, vector<1x16x512xf32>
      %64 = vector.shape_cast %63 : vector<1x16x512xf32> to vector<16x512xf32>
      %65 = arith.mulf %57, %64 : vector<16x512xf32>
      %66 = arith.addf %62, %65 : vector<16x512xf32>
      %c448_i32_32 = arith.constant 448 : i32
      %67 = tpu.dynamic_rotate %57 by %c448_i32_32 dim 1 : vector<16x512xf32>, i32 -> vector<16x512xf32>
      %c10 = arith.constant 10 : index
      %c0_33 = arith.constant 0 : index
      %c0_34 = arith.constant 0 : index
      %68 = vector.load %arg2[%c10, %c0_33, %c0_34] : memref<56x16x512xf32, #tpu.memory_space<vmem>>, vector<1x16x512xf32>
      %69 = vector.shape_cast %68 : vector<1x16x512xf32> to vector<16x512xf32>
      %70 = arith.mulf %67, %69 : vector<16x512xf32>
      %71 = arith.addf %66, %70 : vector<16x512xf32>
      %c2_35 = arith.constant 2 : index
      %c0_36 = arith.constant 0 : index
      %72 = vector.load %arg3[%c2_35, %c0_36] : memref<8x512xf32, #tpu.memory_space<vmem>>, vector<1x512xf32>
      %73 = vector.shape_cast %72 : vector<1x512xf32> to vector<512xf32>
      %74 = vector.shape_cast %73 : vector<512xf32> to vector<1x512xf32>
      %75 = vector.broadcast %74 : vector<1x512xf32> to vector<16x512xf32>
      %76 = arith.addf %71, %75 : vector<16x512xf32>
      %cst_37 = arith.constant 0.000000e+00 : f32
      %77 = vector.broadcast %cst_37 : f32 to vector<16x512xf32>
      %78 = arith.maximumf %76, %77 : vector<16x512xf32>
      %79 = arith.addf %27, %78 : vector<16x512xf32>
      %c8_i32_38 = arith.constant 8 : i32
      %80 = tpu.dynamic_rotate %79 by %c8_i32_38 dim 0 : vector<16x512xf32>, i32 -> vector<16x512xf32>
      %c2_i32_39 = arith.constant 2 : i32
      %81 = tpu.dynamic_rotate %80 by %c2_i32_39 dim 0 : vector<16x512xf32>, i32 -> vector<16x512xf32>
      %c64_i32_40 = arith.constant 64 : i32
      %82 = tpu.dynamic_rotate %81 by %c64_i32_40 dim 1 : vector<16x512xf32>, i32 -> vector<16x512xf32>
      %c11 = arith.constant 11 : index
      %c0_41 = arith.constant 0 : index
      %c0_42 = arith.constant 0 : index
      %83 = vector.load %arg2[%c11, %c0_41, %c0_42] : memref<56x16x512xf32, #tpu.memory_space<vmem>>, vector<1x16x512xf32>
      %84 = vector.shape_cast %83 : vector<1x16x512xf32> to vector<16x512xf32>
      %85 = arith.mulf %82, %84 : vector<16x512xf32>
      %c12 = arith.constant 12 : index
      %c0_43 = arith.constant 0 : index
      %c0_44 = arith.constant 0 : index
      %86 = vector.load %arg2[%c12, %c0_43, %c0_44] : memref<56x16x512xf32, #tpu.memory_space<vmem>>, vector<1x16x512xf32>
      %87 = vector.shape_cast %86 : vector<1x16x512xf32> to vector<16x512xf32>
      %88 = arith.mulf %81, %87 : vector<16x512xf32>
      %89 = arith.addf %85, %88 : vector<16x512xf32>
      %c448_i32_45 = arith.constant 448 : i32
      %90 = tpu.dynamic_rotate %81 by %c448_i32_45 dim 1 : vector<16x512xf32>, i32 -> vector<16x512xf32>
      %c13 = arith.constant 13 : index
      %c0_46 = arith.constant 0 : index
      %c0_47 = arith.constant 0 : index
      %91 = vector.load %arg2[%c13, %c0_46, %c0_47] : memref<56x16x512xf32, #tpu.memory_space<vmem>>, vector<1x16x512xf32>
      %92 = vector.shape_cast %91 : vector<1x16x512xf32> to vector<16x512xf32>
      %93 = arith.mulf %90, %92 : vector<16x512xf32>
      %94 = arith.addf %89, %93 : vector<16x512xf32>
      %c64_i32_48 = arith.constant 64 : i32
      %95 = tpu.dynamic_rotate %80 by %c64_i32_48 dim 1 : vector<16x512xf32>, i32 -> vector<16x512xf32>
      %c14 = arith.constant 14 : index
      %c0_49 = arith.constant 0 : index
      %c0_50 = arith.constant 0 : index
      %96 = vector.load %arg2[%c14, %c0_49, %c0_50] : memref<56x16x512xf32, #tpu.memory_space<vmem>>, vector<1x16x512xf32>
      %97 = vector.shape_cast %96 : vector<1x16x512xf32> to vector<16x512xf32>
      %98 = arith.mulf %95, %97 : vector<16x512xf32>
      %99 = arith.addf %94, %98 : vector<16x512xf32>
      %c15 = arith.constant 15 : index
      %c0_51 = arith.constant 0 : index
      %c0_52 = arith.constant 0 : index
      %100 = vector.load %arg2[%c15, %c0_51, %c0_52] : memref<56x16x512xf32, #tpu.memory_space<vmem>>, vector<1x16x512xf32>
      %101 = vector.shape_cast %100 : vector<1x16x512xf32> to vector<16x512xf32>
      %102 = arith.mulf %80, %101 : vector<16x512xf32>
      %103 = arith.addf %99, %102 : vector<16x512xf32>
      %c448_i32_53 = arith.constant 448 : i32
      %104 = tpu.dynamic_rotate %80 by %c448_i32_53 dim 1 : vector<16x512xf32>, i32 -> vector<16x512xf32>
      %c16 = arith.constant 16 : index
      %c0_54 = arith.constant 0 : index
      %c0_55 = arith.constant 0 : index
      %105 = vector.load %arg2[%c16, %c0_54, %c0_55] : memref<56x16x512xf32, #tpu.memory_space<vmem>>, vector<1x16x512xf32>
      %106 = vector.shape_cast %105 : vector<1x16x512xf32> to vector<16x512xf32>
      %107 = arith.mulf %104, %106 : vector<16x512xf32>
      %108 = arith.addf %103, %107 : vector<16x512xf32>
      %c14_i32_56 = arith.constant 14 : i32
      %109 = tpu.dynamic_rotate %80 by %c14_i32_56 dim 0 : vector<16x512xf32>, i32 -> vector<16x512xf32>
      %c64_i32_57 = arith.constant 64 : i32
      %110 = tpu.dynamic_rotate %109 by %c64_i32_57 dim 1 : vector<16x512xf32>, i32 -> vector<16x512xf32>
      %c17 = arith.constant 17 : index
      %c0_58 = arith.constant 0 : index
      %c0_59 = arith.constant 0 : index
      %111 = vector.load %arg2[%c17, %c0_58, %c0_59] : memref<56x16x512xf32, #tpu.memory_space<vmem>>, vector<1x16x512xf32>
      %112 = vector.shape_cast %111 : vector<1x16x512xf32> to vector<16x512xf32>
      %113 = arith.mulf %110, %112 : vector<16x512xf32>
      %114 = arith.addf %108, %113 : vector<16x512xf32>
      %c18 = arith.constant 18 : index
      %c0_60 = arith.constant 0 : index
      %c0_61 = arith.constant 0 : index
      %115 = vector.load %arg2[%c18, %c0_60, %c0_61] : memref<56x16x512xf32, #tpu.memory_space<vmem>>, vector<1x16x512xf32>
      %116 = vector.shape_cast %115 : vector<1x16x512xf32> to vector<16x512xf32>
      %117 = arith.mulf %109, %116 : vector<16x512xf32>
      %118 = arith.addf %114, %117 : vector<16x512xf32>
      %c448_i32_62 = arith.constant 448 : i32
      %119 = tpu.dynamic_rotate %109 by %c448_i32_62 dim 1 : vector<16x512xf32>, i32 -> vector<16x512xf32>
      %c19 = arith.constant 19 : index
      %c0_63 = arith.constant 0 : index
      %c0_64 = arith.constant 0 : index
      %120 = vector.load %arg2[%c19, %c0_63, %c0_64] : memref<56x16x512xf32, #tpu.memory_space<vmem>>, vector<1x16x512xf32>
      %121 = vector.shape_cast %120 : vector<1x16x512xf32> to vector<16x512xf32>
      %122 = arith.mulf %119, %121 : vector<16x512xf32>
      %123 = arith.addf %118, %122 : vector<16x512xf32>
      %c3_65 = arith.constant 3 : index
      %c0_66 = arith.constant 0 : index
      %124 = vector.load %arg3[%c3_65, %c0_66] : memref<8x512xf32, #tpu.memory_space<vmem>>, vector<1x512xf32>
      %125 = vector.shape_cast %124 : vector<1x512xf32> to vector<512xf32>
      %126 = vector.shape_cast %125 : vector<512xf32> to vector<1x512xf32>
      %127 = vector.broadcast %126 : vector<1x512xf32> to vector<16x512xf32>
      %128 = arith.addf %123, %127 : vector<16x512xf32>
      %cst_67 = arith.constant 0.000000e+00 : f32
      %129 = vector.broadcast %cst_67 : f32 to vector<16x512xf32>
      %130 = arith.maximumf %128, %129 : vector<16x512xf32>
      %131 = arith.addf %79, %130 : vector<16x512xf32>
      %c384_i32 = arith.constant 384 : i32
      %132 = tpu.dynamic_rotate %131 by %c384_i32 dim 1 : vector<16x512xf32>, i32 -> vector<16x512xf32>
      %c4_i32_68 = arith.constant 4 : i32
      %133 = tpu.dynamic_rotate %132 by %c4_i32_68 dim 0 : vector<16x512xf32>, i32 -> vector<16x512xf32>
      %c128_i32 = arith.constant 128 : i32
      %134 = tpu.dynamic_rotate %133 by %c128_i32 dim 1 : vector<16x512xf32>, i32 -> vector<16x512xf32>
      %c20 = arith.constant 20 : index
      %c0_69 = arith.constant 0 : index
      %c0_70 = arith.constant 0 : index
      %135 = vector.load %arg2[%c20, %c0_69, %c0_70] : memref<56x16x512xf32, #tpu.memory_space<vmem>>, vector<1x16x512xf32>
      %136 = vector.shape_cast %135 : vector<1x16x512xf32> to vector<16x512xf32>
      %137 = arith.mulf %134, %136 : vector<16x512xf32>
      %c21 = arith.constant 21 : index
      %c0_71 = arith.constant 0 : index
      %c0_72 = arith.constant 0 : index
      %138 = vector.load %arg2[%c21, %c0_71, %c0_72] : memref<56x16x512xf32, #tpu.memory_space<vmem>>, vector<1x16x512xf32>
      %139 = vector.shape_cast %138 : vector<1x16x512xf32> to vector<16x512xf32>
      %140 = arith.mulf %133, %139 : vector<16x512xf32>
      %141 = arith.addf %137, %140 : vector<16x512xf32>
      %c384_i32_73 = arith.constant 384 : i32
      %142 = tpu.dynamic_rotate %133 by %c384_i32_73 dim 1 : vector<16x512xf32>, i32 -> vector<16x512xf32>
      %c22 = arith.constant 22 : index
      %c0_74 = arith.constant 0 : index
      %c0_75 = arith.constant 0 : index
      %143 = vector.load %arg2[%c22, %c0_74, %c0_75] : memref<56x16x512xf32, #tpu.memory_space<vmem>>, vector<1x16x512xf32>
      %144 = vector.shape_cast %143 : vector<1x16x512xf32> to vector<16x512xf32>
      %145 = arith.mulf %142, %144 : vector<16x512xf32>
      %146 = arith.addf %141, %145 : vector<16x512xf32>
      %c128_i32_76 = arith.constant 128 : i32
      %147 = tpu.dynamic_rotate %132 by %c128_i32_76 dim 1 : vector<16x512xf32>, i32 -> vector<16x512xf32>
      %c23 = arith.constant 23 : index
      %c0_77 = arith.constant 0 : index
      %c0_78 = arith.constant 0 : index
      %148 = vector.load %arg2[%c23, %c0_77, %c0_78] : memref<56x16x512xf32, #tpu.memory_space<vmem>>, vector<1x16x512xf32>
      %149 = vector.shape_cast %148 : vector<1x16x512xf32> to vector<16x512xf32>
      %150 = arith.mulf %147, %149 : vector<16x512xf32>
      %151 = arith.addf %146, %150 : vector<16x512xf32>
      %c24 = arith.constant 24 : index
      %c0_79 = arith.constant 0 : index
      %c0_80 = arith.constant 0 : index
      %152 = vector.load %arg2[%c24, %c0_79, %c0_80] : memref<56x16x512xf32, #tpu.memory_space<vmem>>, vector<1x16x512xf32>
      %153 = vector.shape_cast %152 : vector<1x16x512xf32> to vector<16x512xf32>
      %154 = arith.mulf %132, %153 : vector<16x512xf32>
      %155 = arith.addf %151, %154 : vector<16x512xf32>
      %c384_i32_81 = arith.constant 384 : i32
      %156 = tpu.dynamic_rotate %132 by %c384_i32_81 dim 1 : vector<16x512xf32>, i32 -> vector<16x512xf32>
      %c25 = arith.constant 25 : index
      %c0_82 = arith.constant 0 : index
      %c0_83 = arith.constant 0 : index
      %157 = vector.load %arg2[%c25, %c0_82, %c0_83] : memref<56x16x512xf32, #tpu.memory_space<vmem>>, vector<1x16x512xf32>
      %158 = vector.shape_cast %157 : vector<1x16x512xf32> to vector<16x512xf32>
      %159 = arith.mulf %156, %158 : vector<16x512xf32>
      %160 = arith.addf %155, %159 : vector<16x512xf32>
      %c12_i32_84 = arith.constant 12 : i32
      %161 = tpu.dynamic_rotate %132 by %c12_i32_84 dim 0 : vector<16x512xf32>, i32 -> vector<16x512xf32>
      %c128_i32_85 = arith.constant 128 : i32
      %162 = tpu.dynamic_rotate %161 by %c128_i32_85 dim 1 : vector<16x512xf32>, i32 -> vector<16x512xf32>
      %c26 = arith.constant 26 : index
      %c0_86 = arith.constant 0 : index
      %c0_87 = arith.constant 0 : index
      %163 = vector.load %arg2[%c26, %c0_86, %c0_87] : memref<56x16x512xf32, #tpu.memory_space<vmem>>, vector<1x16x512xf32>
      %164 = vector.shape_cast %163 : vector<1x16x512xf32> to vector<16x512xf32>
      %165 = arith.mulf %162, %164 : vector<16x512xf32>
      %166 = arith.addf %160, %165 : vector<16x512xf32>
      %c27 = arith.constant 27 : index
      %c0_88 = arith.constant 0 : index
      %c0_89 = arith.constant 0 : index
      %167 = vector.load %arg2[%c27, %c0_88, %c0_89] : memref<56x16x512xf32, #tpu.memory_space<vmem>>, vector<1x16x512xf32>
      %168 = vector.shape_cast %167 : vector<1x16x512xf32> to vector<16x512xf32>
      %169 = arith.mulf %161, %168 : vector<16x512xf32>
      %170 = arith.addf %166, %169 : vector<16x512xf32>
      %c384_i32_90 = arith.constant 384 : i32
      %171 = tpu.dynamic_rotate %161 by %c384_i32_90 dim 1 : vector<16x512xf32>, i32 -> vector<16x512xf32>
      %c28 = arith.constant 28 : index
      %c0_91 = arith.constant 0 : index
      %c0_92 = arith.constant 0 : index
      %172 = vector.load %arg2[%c28, %c0_91, %c0_92] : memref<56x16x512xf32, #tpu.memory_space<vmem>>, vector<1x16x512xf32>
      %173 = vector.shape_cast %172 : vector<1x16x512xf32> to vector<16x512xf32>
      %174 = arith.mulf %171, %173 : vector<16x512xf32>
      %175 = arith.addf %170, %174 : vector<16x512xf32>
      %c4_93 = arith.constant 4 : index
      %c0_94 = arith.constant 0 : index
      %176 = vector.load %arg3[%c4_93, %c0_94] : memref<8x512xf32, #tpu.memory_space<vmem>>, vector<1x512xf32>
      %177 = vector.shape_cast %176 : vector<1x512xf32> to vector<512xf32>
      %178 = vector.shape_cast %177 : vector<512xf32> to vector<1x512xf32>
      %179 = vector.broadcast %178 : vector<1x512xf32> to vector<16x512xf32>
      %180 = arith.addf %175, %179 : vector<16x512xf32>
      %cst_95 = arith.constant 0.000000e+00 : f32
      %181 = vector.broadcast %cst_95 : f32 to vector<16x512xf32>
      %182 = arith.maximumf %180, %181 : vector<16x512xf32>
      %183 = arith.addf %131, %182 : vector<16x512xf32>
      %c256_i32 = arith.constant 256 : i32
      %184 = tpu.dynamic_rotate %183 by %c256_i32 dim 1 : vector<16x512xf32>, i32 -> vector<16x512xf32>
      %c4_i32_96 = arith.constant 4 : i32
      %185 = tpu.dynamic_rotate %184 by %c4_i32_96 dim 0 : vector<16x512xf32>, i32 -> vector<16x512xf32>
      %c128_i32_97 = arith.constant 128 : i32
      %186 = tpu.dynamic_rotate %185 by %c128_i32_97 dim 1 : vector<16x512xf32>, i32 -> vector<16x512xf32>
      %c29 = arith.constant 29 : index
      %c0_98 = arith.constant 0 : index
      %c0_99 = arith.constant 0 : index
      %187 = vector.load %arg2[%c29, %c0_98, %c0_99] : memref<56x16x512xf32, #tpu.memory_space<vmem>>, vector<1x16x512xf32>
      %188 = vector.shape_cast %187 : vector<1x16x512xf32> to vector<16x512xf32>
      %189 = arith.mulf %186, %188 : vector<16x512xf32>
      %c30 = arith.constant 30 : index
      %c0_100 = arith.constant 0 : index
      %c0_101 = arith.constant 0 : index
      %190 = vector.load %arg2[%c30, %c0_100, %c0_101] : memref<56x16x512xf32, #tpu.memory_space<vmem>>, vector<1x16x512xf32>
      %191 = vector.shape_cast %190 : vector<1x16x512xf32> to vector<16x512xf32>
      %192 = arith.mulf %185, %191 : vector<16x512xf32>
      %193 = arith.addf %189, %192 : vector<16x512xf32>
      %c384_i32_102 = arith.constant 384 : i32
      %194 = tpu.dynamic_rotate %185 by %c384_i32_102 dim 1 : vector<16x512xf32>, i32 -> vector<16x512xf32>
      %c31 = arith.constant 31 : index
      %c0_103 = arith.constant 0 : index
      %c0_104 = arith.constant 0 : index
      %195 = vector.load %arg2[%c31, %c0_103, %c0_104] : memref<56x16x512xf32, #tpu.memory_space<vmem>>, vector<1x16x512xf32>
      %196 = vector.shape_cast %195 : vector<1x16x512xf32> to vector<16x512xf32>
      %197 = arith.mulf %194, %196 : vector<16x512xf32>
      %198 = arith.addf %193, %197 : vector<16x512xf32>
      %c128_i32_105 = arith.constant 128 : i32
      %199 = tpu.dynamic_rotate %184 by %c128_i32_105 dim 1 : vector<16x512xf32>, i32 -> vector<16x512xf32>
      %c32 = arith.constant 32 : index
      %c0_106 = arith.constant 0 : index
      %c0_107 = arith.constant 0 : index
      %200 = vector.load %arg2[%c32, %c0_106, %c0_107] : memref<56x16x512xf32, #tpu.memory_space<vmem>>, vector<1x16x512xf32>
      %201 = vector.shape_cast %200 : vector<1x16x512xf32> to vector<16x512xf32>
      %202 = arith.mulf %199, %201 : vector<16x512xf32>
      %203 = arith.addf %198, %202 : vector<16x512xf32>
      %c33 = arith.constant 33 : index
      %c0_108 = arith.constant 0 : index
      %c0_109 = arith.constant 0 : index
      %204 = vector.load %arg2[%c33, %c0_108, %c0_109] : memref<56x16x512xf32, #tpu.memory_space<vmem>>, vector<1x16x512xf32>
      %205 = vector.shape_cast %204 : vector<1x16x512xf32> to vector<16x512xf32>
      %206 = arith.mulf %184, %205 : vector<16x512xf32>
      %207 = arith.addf %203, %206 : vector<16x512xf32>
      %c384_i32_110 = arith.constant 384 : i32
      %208 = tpu.dynamic_rotate %184 by %c384_i32_110 dim 1 : vector<16x512xf32>, i32 -> vector<16x512xf32>
      %c34 = arith.constant 34 : index
      %c0_111 = arith.constant 0 : index
      %c0_112 = arith.constant 0 : index
      %209 = vector.load %arg2[%c34, %c0_111, %c0_112] : memref<56x16x512xf32, #tpu.memory_space<vmem>>, vector<1x16x512xf32>
      %210 = vector.shape_cast %209 : vector<1x16x512xf32> to vector<16x512xf32>
      %211 = arith.mulf %208, %210 : vector<16x512xf32>
      %212 = arith.addf %207, %211 : vector<16x512xf32>
      %c12_i32_113 = arith.constant 12 : i32
      %213 = tpu.dynamic_rotate %184 by %c12_i32_113 dim 0 : vector<16x512xf32>, i32 -> vector<16x512xf32>
      %c128_i32_114 = arith.constant 128 : i32
      %214 = tpu.dynamic_rotate %213 by %c128_i32_114 dim 1 : vector<16x512xf32>, i32 -> vector<16x512xf32>
      %c35 = arith.constant 35 : index
      %c0_115 = arith.constant 0 : index
      %c0_116 = arith.constant 0 : index
      %215 = vector.load %arg2[%c35, %c0_115, %c0_116] : memref<56x16x512xf32, #tpu.memory_space<vmem>>, vector<1x16x512xf32>
      %216 = vector.shape_cast %215 : vector<1x16x512xf32> to vector<16x512xf32>
      %217 = arith.mulf %214, %216 : vector<16x512xf32>
      %218 = arith.addf %212, %217 : vector<16x512xf32>
      %c36 = arith.constant 36 : index
      %c0_117 = arith.constant 0 : index
      %c0_118 = arith.constant 0 : index
      %219 = vector.load %arg2[%c36, %c0_117, %c0_118] : memref<56x16x512xf32, #tpu.memory_space<vmem>>, vector<1x16x512xf32>
      %220 = vector.shape_cast %219 : vector<1x16x512xf32> to vector<16x512xf32>
      %221 = arith.mulf %213, %220 : vector<16x512xf32>
      %222 = arith.addf %218, %221 : vector<16x512xf32>
      %c384_i32_119 = arith.constant 384 : i32
      %223 = tpu.dynamic_rotate %213 by %c384_i32_119 dim 1 : vector<16x512xf32>, i32 -> vector<16x512xf32>
      %c37 = arith.constant 37 : index
      %c0_120 = arith.constant 0 : index
      %c0_121 = arith.constant 0 : index
      %224 = vector.load %arg2[%c37, %c0_120, %c0_121] : memref<56x16x512xf32, #tpu.memory_space<vmem>>, vector<1x16x512xf32>
      %225 = vector.shape_cast %224 : vector<1x16x512xf32> to vector<16x512xf32>
      %226 = arith.mulf %223, %225 : vector<16x512xf32>
      %227 = arith.addf %222, %226 : vector<16x512xf32>
      %c5_122 = arith.constant 5 : index
      %c0_123 = arith.constant 0 : index
      %228 = vector.load %arg3[%c5_122, %c0_123] : memref<8x512xf32, #tpu.memory_space<vmem>>, vector<1x512xf32>
      %229 = vector.shape_cast %228 : vector<1x512xf32> to vector<512xf32>
      %230 = vector.shape_cast %229 : vector<512xf32> to vector<1x512xf32>
      %231 = vector.broadcast %230 : vector<1x512xf32> to vector<16x512xf32>
      %232 = arith.addf %227, %231 : vector<16x512xf32>
      %cst_124 = arith.constant 0.000000e+00 : f32
      %233 = vector.broadcast %cst_124 : f32 to vector<16x512xf32>
      %234 = arith.maximumf %232, %233 : vector<16x512xf32>
      %235 = arith.addf %183, %234 : vector<16x512xf32>
      %c128_i32_125 = arith.constant 128 : i32
      %236 = tpu.dynamic_rotate %235 by %c128_i32_125 dim 1 : vector<16x512xf32>, i32 -> vector<16x512xf32>
      %c8_i32_126 = arith.constant 8 : i32
      %237 = tpu.dynamic_rotate %236 by %c8_i32_126 dim 0 : vector<16x512xf32>, i32 -> vector<16x512xf32>
      %c256_i32_127 = arith.constant 256 : i32
      %238 = tpu.dynamic_rotate %237 by %c256_i32_127 dim 1 : vector<16x512xf32>, i32 -> vector<16x512xf32>
      %c38 = arith.constant 38 : index
      %c0_128 = arith.constant 0 : index
      %c0_129 = arith.constant 0 : index
      %239 = vector.load %arg2[%c38, %c0_128, %c0_129] : memref<56x16x512xf32, #tpu.memory_space<vmem>>, vector<1x16x512xf32>
      %240 = vector.shape_cast %239 : vector<1x16x512xf32> to vector<16x512xf32>
      %241 = arith.mulf %238, %240 : vector<16x512xf32>
      %c39 = arith.constant 39 : index
      %c0_130 = arith.constant 0 : index
      %c0_131 = arith.constant 0 : index
      %242 = vector.load %arg2[%c39, %c0_130, %c0_131] : memref<56x16x512xf32, #tpu.memory_space<vmem>>, vector<1x16x512xf32>
      %243 = vector.shape_cast %242 : vector<1x16x512xf32> to vector<16x512xf32>
      %244 = arith.mulf %237, %243 : vector<16x512xf32>
      %245 = arith.addf %241, %244 : vector<16x512xf32>
      %c256_i32_132 = arith.constant 256 : i32
      %246 = tpu.dynamic_rotate %237 by %c256_i32_132 dim 1 : vector<16x512xf32>, i32 -> vector<16x512xf32>
      %c40 = arith.constant 40 : index
      %c0_133 = arith.constant 0 : index
      %c0_134 = arith.constant 0 : index
      %247 = vector.load %arg2[%c40, %c0_133, %c0_134] : memref<56x16x512xf32, #tpu.memory_space<vmem>>, vector<1x16x512xf32>
      %248 = vector.shape_cast %247 : vector<1x16x512xf32> to vector<16x512xf32>
      %249 = arith.mulf %246, %248 : vector<16x512xf32>
      %250 = arith.addf %245, %249 : vector<16x512xf32>
      %c256_i32_135 = arith.constant 256 : i32
      %251 = tpu.dynamic_rotate %236 by %c256_i32_135 dim 1 : vector<16x512xf32>, i32 -> vector<16x512xf32>
      %c41 = arith.constant 41 : index
      %c0_136 = arith.constant 0 : index
      %c0_137 = arith.constant 0 : index
      %252 = vector.load %arg2[%c41, %c0_136, %c0_137] : memref<56x16x512xf32, #tpu.memory_space<vmem>>, vector<1x16x512xf32>
      %253 = vector.shape_cast %252 : vector<1x16x512xf32> to vector<16x512xf32>
      %254 = arith.mulf %251, %253 : vector<16x512xf32>
      %255 = arith.addf %250, %254 : vector<16x512xf32>
      %c42 = arith.constant 42 : index
      %c0_138 = arith.constant 0 : index
      %c0_139 = arith.constant 0 : index
      %256 = vector.load %arg2[%c42, %c0_138, %c0_139] : memref<56x16x512xf32, #tpu.memory_space<vmem>>, vector<1x16x512xf32>
      %257 = vector.shape_cast %256 : vector<1x16x512xf32> to vector<16x512xf32>
      %258 = arith.mulf %236, %257 : vector<16x512xf32>
      %259 = arith.addf %255, %258 : vector<16x512xf32>
      %c256_i32_140 = arith.constant 256 : i32
      %260 = tpu.dynamic_rotate %236 by %c256_i32_140 dim 1 : vector<16x512xf32>, i32 -> vector<16x512xf32>
      %c43 = arith.constant 43 : index
      %c0_141 = arith.constant 0 : index
      %c0_142 = arith.constant 0 : index
      %261 = vector.load %arg2[%c43, %c0_141, %c0_142] : memref<56x16x512xf32, #tpu.memory_space<vmem>>, vector<1x16x512xf32>
      %262 = vector.shape_cast %261 : vector<1x16x512xf32> to vector<16x512xf32>
      %263 = arith.mulf %260, %262 : vector<16x512xf32>
      %264 = arith.addf %259, %263 : vector<16x512xf32>
      %c8_i32_143 = arith.constant 8 : i32
      %265 = tpu.dynamic_rotate %236 by %c8_i32_143 dim 0 : vector<16x512xf32>, i32 -> vector<16x512xf32>
      %c256_i32_144 = arith.constant 256 : i32
      %266 = tpu.dynamic_rotate %265 by %c256_i32_144 dim 1 : vector<16x512xf32>, i32 -> vector<16x512xf32>
      %c44 = arith.constant 44 : index
      %c0_145 = arith.constant 0 : index
      %c0_146 = arith.constant 0 : index
      %267 = vector.load %arg2[%c44, %c0_145, %c0_146] : memref<56x16x512xf32, #tpu.memory_space<vmem>>, vector<1x16x512xf32>
      %268 = vector.shape_cast %267 : vector<1x16x512xf32> to vector<16x512xf32>
      %269 = arith.mulf %266, %268 : vector<16x512xf32>
      %270 = arith.addf %264, %269 : vector<16x512xf32>
      %c45 = arith.constant 45 : index
      %c0_147 = arith.constant 0 : index
      %c0_148 = arith.constant 0 : index
      %271 = vector.load %arg2[%c45, %c0_147, %c0_148] : memref<56x16x512xf32, #tpu.memory_space<vmem>>, vector<1x16x512xf32>
      %272 = vector.shape_cast %271 : vector<1x16x512xf32> to vector<16x512xf32>
      %273 = arith.mulf %265, %272 : vector<16x512xf32>
      %274 = arith.addf %270, %273 : vector<16x512xf32>
      %c256_i32_149 = arith.constant 256 : i32
      %275 = tpu.dynamic_rotate %265 by %c256_i32_149 dim 1 : vector<16x512xf32>, i32 -> vector<16x512xf32>
      %c46 = arith.constant 46 : index
      %c0_150 = arith.constant 0 : index
      %c0_151 = arith.constant 0 : index
      %276 = vector.load %arg2[%c46, %c0_150, %c0_151] : memref<56x16x512xf32, #tpu.memory_space<vmem>>, vector<1x16x512xf32>
      %277 = vector.shape_cast %276 : vector<1x16x512xf32> to vector<16x512xf32>
      %278 = arith.mulf %275, %277 : vector<16x512xf32>
      %279 = arith.addf %274, %278 : vector<16x512xf32>
      %c6_152 = arith.constant 6 : index
      %c0_153 = arith.constant 0 : index
      %280 = vector.load %arg3[%c6_152, %c0_153] : memref<8x512xf32, #tpu.memory_space<vmem>>, vector<1x512xf32>
      %281 = vector.shape_cast %280 : vector<1x512xf32> to vector<512xf32>
      %282 = vector.shape_cast %281 : vector<512xf32> to vector<1x512xf32>
      %283 = vector.broadcast %282 : vector<1x512xf32> to vector<16x512xf32>
      %284 = arith.addf %279, %283 : vector<16x512xf32>
      %cst_154 = arith.constant 0.000000e+00 : f32
      %285 = vector.broadcast %cst_154 : f32 to vector<16x512xf32>
      %286 = arith.maximumf %284, %285 : vector<16x512xf32>
      %287 = arith.addf %235, %286 : vector<16x512xf32>
      %c256_i32_155 = arith.constant 256 : i32
      %288 = tpu.dynamic_rotate %287 by %c256_i32_155 dim 1 : vector<16x512xf32>, i32 -> vector<16x512xf32>
      %c8_i32_156 = arith.constant 8 : i32
      %289 = tpu.dynamic_rotate %288 by %c8_i32_156 dim 0 : vector<16x512xf32>, i32 -> vector<16x512xf32>
      %c256_i32_157 = arith.constant 256 : i32
      %290 = tpu.dynamic_rotate %289 by %c256_i32_157 dim 1 : vector<16x512xf32>, i32 -> vector<16x512xf32>
      %c47 = arith.constant 47 : index
      %c0_158 = arith.constant 0 : index
      %c0_159 = arith.constant 0 : index
      %291 = vector.load %arg2[%c47, %c0_158, %c0_159] : memref<56x16x512xf32, #tpu.memory_space<vmem>>, vector<1x16x512xf32>
      %292 = vector.shape_cast %291 : vector<1x16x512xf32> to vector<16x512xf32>
      %293 = arith.mulf %290, %292 : vector<16x512xf32>
      %c48 = arith.constant 48 : index
      %c0_160 = arith.constant 0 : index
      %c0_161 = arith.constant 0 : index
      %294 = vector.load %arg2[%c48, %c0_160, %c0_161] : memref<56x16x512xf32, #tpu.memory_space<vmem>>, vector<1x16x512xf32>
      %295 = vector.shape_cast %294 : vector<1x16x512xf32> to vector<16x512xf32>
      %296 = arith.mulf %289, %295 : vector<16x512xf32>
      %297 = arith.addf %293, %296 : vector<16x512xf32>
      %c256_i32_162 = arith.constant 256 : i32
      %298 = tpu.dynamic_rotate %289 by %c256_i32_162 dim 1 : vector<16x512xf32>, i32 -> vector<16x512xf32>
      %c49 = arith.constant 49 : index
      %c0_163 = arith.constant 0 : index
      %c0_164 = arith.constant 0 : index
      %299 = vector.load %arg2[%c49, %c0_163, %c0_164] : memref<56x16x512xf32, #tpu.memory_space<vmem>>, vector<1x16x512xf32>
      %300 = vector.shape_cast %299 : vector<1x16x512xf32> to vector<16x512xf32>
      %301 = arith.mulf %298, %300 : vector<16x512xf32>
      %302 = arith.addf %297, %301 : vector<16x512xf32>
      %c256_i32_165 = arith.constant 256 : i32
      %303 = tpu.dynamic_rotate %288 by %c256_i32_165 dim 1 : vector<16x512xf32>, i32 -> vector<16x512xf32>
      %c50 = arith.constant 50 : index
      %c0_166 = arith.constant 0 : index
      %c0_167 = arith.constant 0 : index
      %304 = vector.load %arg2[%c50, %c0_166, %c0_167] : memref<56x16x512xf32, #tpu.memory_space<vmem>>, vector<1x16x512xf32>
      %305 = vector.shape_cast %304 : vector<1x16x512xf32> to vector<16x512xf32>
      %306 = arith.mulf %303, %305 : vector<16x512xf32>
      %307 = arith.addf %302, %306 : vector<16x512xf32>
      %c51 = arith.constant 51 : index
      %c0_168 = arith.constant 0 : index
      %c0_169 = arith.constant 0 : index
      %308 = vector.load %arg2[%c51, %c0_168, %c0_169] : memref<56x16x512xf32, #tpu.memory_space<vmem>>, vector<1x16x512xf32>
      %309 = vector.shape_cast %308 : vector<1x16x512xf32> to vector<16x512xf32>
      %310 = arith.mulf %288, %309 : vector<16x512xf32>
      %311 = arith.addf %307, %310 : vector<16x512xf32>
      %c256_i32_170 = arith.constant 256 : i32
      %312 = tpu.dynamic_rotate %288 by %c256_i32_170 dim 1 : vector<16x512xf32>, i32 -> vector<16x512xf32>
      %c52 = arith.constant 52 : index
      %c0_171 = arith.constant 0 : index
      %c0_172 = arith.constant 0 : index
      %313 = vector.load %arg2[%c52, %c0_171, %c0_172] : memref<56x16x512xf32, #tpu.memory_space<vmem>>, vector<1x16x512xf32>
      %314 = vector.shape_cast %313 : vector<1x16x512xf32> to vector<16x512xf32>
      %315 = arith.mulf %312, %314 : vector<16x512xf32>
      %316 = arith.addf %311, %315 : vector<16x512xf32>
      %c8_i32_173 = arith.constant 8 : i32
      %317 = tpu.dynamic_rotate %288 by %c8_i32_173 dim 0 : vector<16x512xf32>, i32 -> vector<16x512xf32>
      %c256_i32_174 = arith.constant 256 : i32
      %318 = tpu.dynamic_rotate %317 by %c256_i32_174 dim 1 : vector<16x512xf32>, i32 -> vector<16x512xf32>
      %c53 = arith.constant 53 : index
      %c0_175 = arith.constant 0 : index
      %c0_176 = arith.constant 0 : index
      %319 = vector.load %arg2[%c53, %c0_175, %c0_176] : memref<56x16x512xf32, #tpu.memory_space<vmem>>, vector<1x16x512xf32>
      %320 = vector.shape_cast %319 : vector<1x16x512xf32> to vector<16x512xf32>
      %321 = arith.mulf %318, %320 : vector<16x512xf32>
      %322 = arith.addf %316, %321 : vector<16x512xf32>
      %c54 = arith.constant 54 : index
      %c0_177 = arith.constant 0 : index
      %c0_178 = arith.constant 0 : index
      %323 = vector.load %arg2[%c54, %c0_177, %c0_178] : memref<56x16x512xf32, #tpu.memory_space<vmem>>, vector<1x16x512xf32>
      %324 = vector.shape_cast %323 : vector<1x16x512xf32> to vector<16x512xf32>
      %325 = arith.mulf %317, %324 : vector<16x512xf32>
      %326 = arith.addf %322, %325 : vector<16x512xf32>
      %c256_i32_179 = arith.constant 256 : i32
      %327 = tpu.dynamic_rotate %317 by %c256_i32_179 dim 1 : vector<16x512xf32>, i32 -> vector<16x512xf32>
      %c55 = arith.constant 55 : index
      %c0_180 = arith.constant 0 : index
      %c0_181 = arith.constant 0 : index
      %328 = vector.load %arg2[%c55, %c0_180, %c0_181] : memref<56x16x512xf32, #tpu.memory_space<vmem>>, vector<1x16x512xf32>
      %329 = vector.shape_cast %328 : vector<1x16x512xf32> to vector<16x512xf32>
      %330 = arith.mulf %327, %329 : vector<16x512xf32>
      %331 = arith.addf %326, %330 : vector<16x512xf32>
      %c7_182 = arith.constant 7 : index
      %c0_183 = arith.constant 0 : index
      %332 = vector.load %arg3[%c7_182, %c0_183] : memref<8x512xf32, #tpu.memory_space<vmem>>, vector<1x512xf32>
      %333 = vector.shape_cast %332 : vector<1x512xf32> to vector<512xf32>
      %334 = vector.shape_cast %333 : vector<512xf32> to vector<1x512xf32>
      %335 = vector.broadcast %334 : vector<1x512xf32> to vector<16x512xf32>
      %336 = arith.addf %331, %335 : vector<16x512xf32>
      %cst_184 = arith.constant 0.000000e+00 : f32
      %337 = vector.broadcast %cst_184 : f32 to vector<16x512xf32>
      %338 = arith.maximumf %336, %337 : vector<16x512xf32>
      %339 = arith.addf %287, %338 : vector<16x512xf32>
      %cst_185 = arith.constant dense<0.000000e+00> : vector<512xf32>
      %340 = vector.multi_reduction <add>, %339, %cst_185 [0] : vector<16x512xf32> to vector<512xf32>
      %341 = vector.shape_cast %340 : vector<512xf32> to vector<1x512xf32>
      %c32_i32 = arith.constant 32 : i32
      %342 = tpu.dynamic_rotate %341 by %c32_i32 dim 1 : vector<1x512xf32>, i32 -> vector<1x512xf32>
      %343 = arith.addf %341, %342 : vector<1x512xf32>
      %c64_i32_186 = arith.constant 64 : i32
      %344 = tpu.dynamic_rotate %343 by %c64_i32_186 dim 1 : vector<1x512xf32>, i32 -> vector<1x512xf32>
      %345 = arith.addf %343, %344 : vector<1x512xf32>
      %c128_i32_187 = arith.constant 128 : i32
      %346 = tpu.dynamic_rotate %345 by %c128_i32_187 dim 1 : vector<1x512xf32>, i32 -> vector<1x512xf32>
      %347 = arith.addf %345, %346 : vector<1x512xf32>
      %c256_i32_188 = arith.constant 256 : i32
      %348 = tpu.dynamic_rotate %347 by %c256_i32_188 dim 1 : vector<1x512xf32>, i32 -> vector<1x512xf32>
      %349 = arith.addf %347, %348 : vector<1x512xf32>
      %cst_189 = arith.constant 3.906250e-03 : f32
      %350 = vector.broadcast %cst_189 : f32 to vector<1x512xf32>
      %351 = arith.mulf %349, %350 : vector<1x512xf32>
      %352 = vector.broadcast %351 : vector<1x512xf32> to vector<16x512xf32>
      %353 = arith.mulf %339, %352 : vector<16x512xf32>
      %354 = arith.index_cast %arg6 : i32 to index
      %c0_190 = arith.constant 0 : index
      %c0_191 = arith.constant 0 : index
      %355 = vector.load %arg4[%354, %c0_190, %c0_191] : memref<2x16x512xf32, #tpu.memory_space<vmem>>, vector<1x16x512xf32>
      %356 = vector.shape_cast %355 : vector<1x16x512xf32> to vector<16x512xf32>
      %357 = vector.shape_cast %353 : vector<16x512xf32> to vector<1x16x512xf32>
      tpu.vector_store %arg4[%354, %c0_190, %c0_191], %357 {strides = array<i32>} : memref<2x16x512xf32, #tpu.memory_space<vmem>>, vector<1x16x512xf32>,
      %358 = arith.index_cast %arg6 : i32 to index
      %c0_192 = arith.constant 0 : index
      %c0_193 = arith.constant 0 : index
      %359 = vector.load %arg5[%358, %c0_192, %c0_193] : memref<2x1x512xf32, #tpu.memory_space<vmem>>, vector<1x1x512xf32>
      %360 = vector.shape_cast %359 : vector<1x1x512xf32> to vector<1x512xf32>
      %361 = vector.shape_cast %351 : vector<1x512xf32> to vector<1x1x512xf32>
      tpu.vector_store %arg5[%358, %c0_192, %c0_193], %361 {strides = array<i32>} : memref<2x1x512xf32, #tpu.memory_space<vmem>>, vector<1x1x512xf32>,
    }
    %c2_i32_0 = arith.constant 2 : i32
    return
  }
  func.func @transform_0(%arg0: i32) -> (i32, i32, i32) {
    %c0_i32 = arith.constant 0 : i32
    %c0_i32_0 = arith.constant 0 : i32
    %c0_i32_1 = arith.constant 0 : i32
    return %arg0, %c0_i32, %c0_i32_0 : i32, i32, i32
  }
  func.func @transform_1(%arg0: i32) -> (i32, i32, i32) {
    %c0_i32 = arith.constant 0 : i32
    %c0_i32_0 = arith.constant 0 : i32
    %c0_i32_1 = arith.constant 0 : i32
    %c0_i32_2 = arith.constant 0 : i32
    return %c0_i32, %c0_i32_0, %c0_i32_1 : i32, i32, i32
  }
  func.func @transform_2(%arg0: i32) -> (i32, i32) {
    %c0_i32 = arith.constant 0 : i32
    %c0_i32_0 = arith.constant 0 : i32
    %c0_i32_1 = arith.constant 0 : i32
    return %c0_i32, %c0_i32_0 : i32, i32
  }
  func.func @transform_3(%arg0: i32) -> (i32, i32, i32) {
    %c0_i32 = arith.constant 0 : i32
    %c0_i32_0 = arith.constant 0 : i32
    %c0_i32_1 = arith.constant 0 : i32
    return %arg0, %c0_i32, %c0_i32_0 : i32, i32, i32
  }
  func.func @transform_4(%arg0: i32) -> (i32, i32, i32) {
    %c0_i32 = arith.constant 0 : i32
    %c0_i32_0 = arith.constant 0 : i32
    %c0_i32_1 = arith.constant 0 : i32
    return %arg0, %c0_i32, %c0_i32_0 : i32, i32, i32
  }
}

</mosaic_0001>

<bundles_post_ra>
// kernel: tpu_custom_call.1
= control target key start
LH: loop header
LB: loop body
LE: loop exit
PB: predicated region body
PF: predicated region fallthrough
CT: control target
= control target key end

     0   :  { %10 = vsyncpa [#allocation3], 0  ;;  %s4787_s0 = inlined_call_operand.hbm [shape: f32[4,16,512], index: 0, kind: input, shape index: {}]   ;;  %s4788_s1 = inlined_call_operand.hbm [shape: f32[56,16,512], index: 1, kind: input, shape index: {}]   ;;  %s4789_s2 = inlined_call_operand.hbm [shape: f32[8,512], index: 2, kind: input, shape index: {}]   ;;  %s4790_s3 = inlined_call_operand.hbm [shape: f32[4,16,512], index: 3, kind: output, shape index: {0}]   ;;  %s4791_s4 = inlined_call_operand.hbm [shape: f32[4,1,512], index: 4, kind: output, shape index: {1}]  }
   0x1   :  { %12 = vsyncpa [#allocation3 + $0x1], 0 }
   0x2   :  { %13 = vsyncpa [#allocation6], 0 }
   0x3   :  { %14 = vsyncpa [#allocation4], 0 }
   0x4   :  { %16 = vsyncpa [#allocation4 + $0x1], 0 }
   0x5   :  { %17 = vsyncpa [#allocation10], 0 }
   0x6   :  { %19 = vsyncpa [#allocation10 + $0x1], 0  ;;  %s2923_s15 = smov 0   ;;  %s2925_s16 = smov 0  }
   0x7   :  { %s2927_s17 = smov 0   ;;  %s2929_s18 = smov 0  }
   0x8 LB: > { %s2944_s19 = sadd.s32 4294967295, %s2878_s18   ;;  %s2558_s20 = sadd.s32 4294967294, %s2878_s18   ;;  %s2878_s18 = sphi %s2929_s18, %s5031_s18   ;;  %s2874_s17 = sphi %s2927_s17, %s5030_s17   ;;  %s2870_s16 = sphi %s2925_s16, %s5029_s16   ;;  %s2866_s15 = sphi %s2923_s15, %s5028_s15  }
   0x9   : > { %p45_p0 = scmp.ne.s32.totalorder %s2870_s16, %s2866_s15  ;;  %p4792_p1 = scmp.eq.s32.totalorder %s2944_s19, 0 }
   0xa   : > { %p117_p3 = scmp.eq.s32.totalorder %s2558_s20, 1  ;;  %p2559_p5 = scmp.ge.s32.totalorder %s2878_s18, 1 }
   0xb   : > { %p2953_p4 = por %p4792_p1, %p45_p0  ;;  %p150_p7 = scmp.lt.s32.totalorder %s2878_s18, 3 }
   0xc   : > { %p2958_p6 = por %p117_p3, %p45_p0  ;;  %s2884_s24 = smov [#allocation5]  }
   0xd   : > { %s4862_s21 = scalar_select %p2953_p4, 1, 0 }
   0xe   : > { %s4863_s22 = scalar_select %p2958_p6, 1, 0 }
   0xf   : > { %p2963_p8 = pnand %p2559_p5, %p150_p7  ;;  %s162_s25 = sshll.u32 %s2884_s24, 4  ;;  %s2967_s25 = int_to_ptr.vmem [resolvable:$true] %s162_s25 }
  0x10   : > { %s2885_s27 = smov [#allocation7]   ;;  %s2686_s5 = scalar_lea.hbm %s4788_s1, 57344 }
  0x11   : > { %p2609_p9 = pneg %p2963_p8  ;;  %s176_s28 = sshll.u32 %s2885_s27, 4  ;;  %s2978_s28 = int_to_ptr.vmem [resolvable:$true] %s176_s28 }
  0x12   : > { %p2687_p12 = scmp.ne.s32.totalorder %s4788_s1, %s2686_s5  ;;  %p2693_p5 = scmp.lt.u32.totalorder %s2686_s5, %s4788_s1 }
  0x13   : > { %p2974_p11 = pnand %p2609_p9, %p4792_p1 }
  0x15   : > { %p2688_p13 = pneg %p2974_p11 }
  0x17   : > { %p2689_p0 = pnand %p2688_p13, %p2687_p12 }
  0x19   : > { %p2690_p3 = pneg %p2689_p0 }
  0x1b   : > { %p2695_p7 = pnand %p2693_p5, %p2690_p3 }
  0x1d   : > { %2698 = shalt.err (!%p2695_p7)
}
  0x1e   : > { %s2699_s10 = scalar_lea.vmem %s2967_s25, 57344  ;;  %p2707_p2 = scmp.lt.s32.totalorder %s2967_s25, %s2967_s25 }
  0x1f   : > { %p2700_p9 = scmp.ne.s32.totalorder %s2967_s25, %s2699_s10  ;;  %p2708_p12 = scmp.lt.s32.totalorder %s2699_s10, %s2699_s10 }
  0x21   : > { %p2702_p10 = pnand %p2700_p9, %p2688_p13  ;;  %p2709_p0 = por %p2708_p12, %p2707_p2 }
  0x23   : > { %p2703_p1 = pneg %p2702_p10 }
  0x25   : > { %p2710_p6 = pnand %p2709_p0, %p2703_p1 }
  0x27   : > { %2713 = shalt.err (!%p2710_p6)
}
  0x28   : > { %s2886_s11 = smov 512   ;;  %s2887_s12 = smov 32  }
  0x29   : > { %2612 = dma.hbm_to_vmem [thread:$0]  (!%p2974_p11), %s4788_s1, 57344, %s2967_s25, [#allocation6], %s2886_s11, %s2886_s11, %s2887_s12  }
  0x2a   : > { %s2714_s27 = scalar_lea.hbm %s4789_s2, 512 }
  0x2b   : > { %p2715_p1 = scmp.ne.s32.totalorder %s4789_s2, %s2714_s27  ;;  %p2721_p10 = scmp.lt.u32.totalorder %s2714_s27, %s4789_s2 }
  0x2d   : > { %p2717_p2 = pnand %p2715_p1, %p2688_p13 }
  0x2f   : > { %p2718_p6 = pneg %p2717_p2 }
  0x31   : > { %p2723_p3 = pnand %p2721_p10, %p2718_p6 }
  0x33   : > { %2726 = shalt.err (!%p2723_p3)
}
  0x34   : > { %s2727_s25 = scalar_lea.vmem %s2978_s28, 512  ;;  %p2735_p12 = scmp.lt.s32.totalorder %s2978_s28, %s2978_s28 }
  0x35   : > { %p2728_p5 = scmp.ne.s32.totalorder %s2978_s28, %s2727_s25  ;;  %p2736_p0 = scmp.lt.s32.totalorder %s2727_s25, %s2727_s25 }
  0x37   : > { %p2730_p7 = pnand %p2728_p5, %p2688_p13  ;;  %p2737_p1 = por %p2736_p0, %p2735_p12 }
  0x39   : > { %p2731_p9 = pneg %p2730_p7 }
  0x3b   : > { %p2738_p2 = pnand %p2737_p1, %p2731_p9 }
  0x3d   : > { %2741 = shalt.err (!%p2738_p2)
}
  0x3e   : > { %2615 = dma.hbm_to_vmem [thread:$0]  (!%p2974_p11), %s4789_s2, 512, %s2978_s28, [#allocation6]  }
  0x3f   : > { %s3036_s9 = sadd.s32 1, %s2878_s18   ;;  %s32_s26 = sadd.s32 1, %s2874_s17 }
  0x40   : > { %s29_s10 = ssub.s32 %s2878_s18, %s3036_s9  ;;  %p39_p13 = scmp.ne.s32.totalorder %s2874_s17, %s2870_s16 }
  0x41   : > { %p30_p6 = scmp.eq.s32.totalorder %s29_s10, 0  ;;  %p40_p10 = scmp.eq.s32.totalorder %s2878_s18, 0 }
  0x42   : > { %p4866_p3 = scmp.eq.s32.totalorder %s2944_s19, 1  ;;  %p2629_p7 = scmp.lt.s32.totalorder %s2878_s18, 2 }
  0x43   : > { %s3052_s14 = scalar_select %p30_p6, %s2874_s17, %s32_s26  }
  0x44   : > { %p3046_p5 = por %p4866_p3, %p39_p13  ;;  %p41_p9 = por %p40_p10, %p39_p13 }
  0x45   : > { %s187_s20 = sand.u32 1, %s2874_s17   ;;  %s2588_s28 = sshll.u32 %s2878_s18, 11 }
  0x46   : > { %s4867_s13 = scalar_select %p3046_p5, 1, 0 }
  0x47   : > { %s2563_s24 = sshll.u32 %s187_s20, 7  ;;  %s3059_s30 = scalar_lea.hbm %s4787_s0, %s2588_s28 }
  0x48   : > { %s191_s5 = scalar_lea.vmem [#allocation2], %s2563_s24  ;;  %p3063_p11 = pnand %p2629_p7, %p41_p9 }
  0x49   : > { %s199_s6 = sshll.u32 %s191_s5, 4  ;;  %s3067_s7 = scalar_lea.sflag [#allocation3], %s187_s20  ;;  %s3061_s6 = int_to_ptr.vmem [resolvable:$true] %s199_s6 }
  0x4a   : > { %s2742_s8 = scalar_lea.hbm %s3059_s30, 2048  ;;  %p2744_p0 = pneg %p3063_p11 }
  0x4b   : > { %p2743_p12 = scmp.ne.s32.totalorder %s3059_s30, %s2742_s8  ;;  %s2747_s24 = scalar_lea.hbm %s4787_s0, 4096 }
  0x4c   : > { %p2748_p13 = scmp.lt.u32.totalorder %s3059_s30, %s4787_s0  ;;  %p2749_p6 = scmp.lt.u32.totalorder %s2747_s24, %s2742_s8 }
  0x4d   : > { %p2745_p1 = pnand %p2744_p0, %p2743_p12  ;;  %p2751_p3 = scmp.lt.u32.totalorder %s2742_s8, %s3059_s30 }
  0x4e   : > { %p2750_p10 = por %p2749_p6, %p2748_p13 }
  0x4f   : > { %p2746_p2 = pneg %p2745_p1 }
  0x50   : > { %p2752_p7 = por %p2751_p3, %p2750_p10 }
  0x52   : > { %p2753_p9 = pnand %p2752_p7, %p2746_p2 }
  0x54   : > { %2756 = shalt.err (!%p2753_p9)
}
  0x55   : > { %s2757_s20 = scalar_lea.vmem %s3061_s6, 2048  ;;  %s2888_s29 = smov [#allocation2]  }
  0x56   : > { %p2758_p12 = scmp.ne.s32.totalorder %s3061_s6, %s2757_s20  ;;  %s2762_s5 = sshll.u32 %s2888_s29, 4  ;;  %s2763_s5 = int_to_ptr.vmem [resolvable:$false] %s2762_s5 }
  0x57   : > { %s2764_s26 = scalar_lea.vmem %s2763_s5, 4096  ;;  %p2765_p4 = scmp.lt.s32.totalorder %s3061_s6, %s2763_s5 }
  0x58   : > { %p2760_p1 = pnand %p2758_p12, %p2744_p0  ;;  %p2766_p13 = scmp.lt.s32.totalorder %s2764_s26, %s2757_s20 }
  0x5a   : > { %p2761_p5 = pneg %p2760_p1  ;;  %p2767_p6 = por %p2766_p13, %p2765_p4 }
  0x5c   : > { %p2768_p10 = pnand %p2767_p6, %p2761_p5 }
  0x5e   : > { %2771 = shalt.err (!%p2768_p10)
}
  0x5f   : > { %2619 = dma.hbm_to_vmem [thread:$0]  (!%p3063_p11), %s3059_s30, 2048, %s3061_s6, %s3067_s7, %s2886_s11, %s2886_s11, %s2887_s12  }
  0x60   : > { %211 = sbr.rel (%p2963_p8) target bundleno = 978 (0x3d2), region = 32  ;;  %s3101_s8 = sand.u32 (!%p2963_p8), 1, %s2870_s16  }
  0x61   : > { %s2568_s10 = sshll.u32 (!%p2963_p8), %s3101_s8, 7  ;;  %s214_s24 = scalar_lea.sflag (!%p2963_p8), [#allocation3], %s3101_s8 }
  0x62   : > { %s3105_s28 = scalar_lea.vmem (!%p2963_p8), [#allocation2], %s2568_s10  ;;  %p4869_p4 = scmp.ne.s32.totalorder (!%p2963_p8), %s4862_s21, 0 }
  0x67   : > { %2849 = dma.done.wait (%p4869_p4), %s214_s24, 2048  }
  0x68   : > { %2851 = vsyncadd (%p4869_p4), %s214_s24, 4294965248  ;;  %p4870_p5 = scmp.eq.s32.totalorder %s2944_s19, 0 }
  0x6a   : > { %2853 = dma.done.wait (%p4870_p5), [#allocation6], 57856   ;;  %p4871_p8 = pmov %p4870_p5 }
  0x6b   : > { %s2572_s23 = sshll.u32 %s3101_s8, 3  ;;  %s3116_s11 = scalar_lea.vmem [#allocation8], %s2568_s10 }
  0x6c   : > { %2855 = vsyncadd (%p4871_p8), [#allocation6], 4294909440  ;;  %s3118_s12 = scalar_lea.vmem [#allocation9], %s2572_s23  ;;  %s3120_s30 = smov 0  }
  0x6d LB: >> { %v4795_v0 = vlaneseq  ;;  %s2589_s21 = sshll.u32 %s2882_s30, 6  ;;  %v294_v2 = vld [vmem:[#allocation5] sm:$0xff]  ;;  %v295_v14 = vld [vmem:[#allocation5 + $0x8] sm:$0xff]  ;;  %v296_v34 = vld [vmem:[#allocation5 + $0x10] sm:$0xff]  ;;  %s2889_s25 = smov 64   ;;  %s2882_s30 = sphi %s3120_s30, %s263_s30  }
  0x6e   : >> { %s3132_s6 = scalar_lea.vmem %s3105_s28, %s2589_s21 [#allocation2]  ;;  %v298_v3 = vld [vmem:[#allocation5 + $0x20] sm:$0xff]  ;;  %v299_v18 = vld [vmem:[#allocation5 + $0x28] sm:$0xff]  ;;  %v300_v35 = vld [vmem:[#allocation5 + $0x30] sm:$0xff]  ;;  %s2890_s7 = smov 32  }
  0x6f   : >> { %v3127_v1 = vshrl.u32 %v4795_v0, 7  ;;  %v3134_v4 = vld [vmem:[#allocation7] ss:$8 sm:$0xf]  ;;  %s2351_s27 = scalar_lea.vmem %s3116_s11, %s2589_s21 [#allocation8]  ;;  %s2576_s20 = sshll.u32 %s2882_s30, 2 }
  0x70   : >> { %v3136_v5 = vld [vmem:[#allocation7 + $0x1] ss:$8 sm:$0xf]  ;;  %s2380_s29 = scalar_lea.vmem %s3118_s12, %s2576_s20 [#allocation9]  ;;  %s263_s30 = sadd.s32 1, %s2882_s30  }
  0x71   : >> { %4872 = vst [vmem:[#allocation15_spill] sm:$0xff] %v3127_v1  ;;  %v267_v6 = vld [vmem:[%s3132_s6] sm:$0xff]  ;;  %vm285_vm0 = vcmp.lt.s32.totalorder %v3127_v1, 4  ;;  %v3142_v8 = vsub.s32 0, %v3127_v1  ;;  %v268_v9 = vld [vmem:[%s3132_s6 + $0x8] sm:$0xff]  ;;  %v3147_v15 = vsub.s32 1, %v3127_v1 }
  0x72   : >> { %v271_v7 = vld [vmem:[%s3132_s6 + $0x20] sm:$0xff]  ;;  %v275_v10 = vrot.slane %v267_v6, 4  ;;  %v272_v12 = vld [vmem:[%s3132_s6 + $0x28] sm:$0xff]  ;;  %v276_v13 = vrot.slane %v268_v9, 4  ;;  %v269_v19 = vld [vmem:[%s3132_s6 + $0x10] sm:$0xff]  ;;  %v3154_v21 = vsub.s32 2, %v3127_v1 }
  0x73   : >> { %4873 = vst [vmem:[#allocation16_spill] sm:$0xff] %v3142_v8  ;;  %v279_v11 = vrot.slane %v271_v7, 4  ;;  %4874 = vst [vmem:[#allocation17_spill] sm:$0xff] %v3147_v15  ;;  %v315_v16 = vrot.slane %v3134_v4, %v3142_v8  ;;  %v280_v17 = vrot.slane %v272_v12, 4  ;;  %v273_v20 = vld [vmem:[%s3132_s6 + $0x30] sm:$0xff]  ;;  %v379_v24 = vrot.slane %v3136_v5, %v3142_v8  ;;  %v3173_v40 = vld [vmem:[%s3132_s6 + $0x18] sm:$0xff] }
  0x74   : >> { %4875 = vst [vmem:[#allocation18_spill] sm:$0xff] %v3154_v21  ;;  %v319_v25 = vrot.slane %v3134_v4, %v3147_v15  ;;  %v277_v32 = vrot.slane %v269_v19, 4  ;;  %v281_v33 = vrot.slane %v273_v20, 4  ;;  %v383_v38 = vrot.slane %v3136_v5, %v3147_v15  ;;  %v3176_v41 = vld [vmem:[%s3132_s6 + $0x38] sm:$0xff]  ;;  %v357_v50 = vld [vmem:[#allocation5 + $0x40] sm:$0xff]  ;;  %v358_v58 = vld [vmem:[#allocation5 + $0x48] sm:$0xff] }
  0x75   : >> { %v286_v22 = vsel %vm285_vm0, %v275_v10, %v279_v11  ;;  %v290_v23 = vsel %vm285_vm0, %v279_v11, %v275_v10  ;;  %v287_v28 = vsel %vm285_vm0, %v276_v13, %v280_v17  ;;  %v291_v29 = vsel %vm285_vm0, %v280_v17, %v276_v13  ;;  %v361_v51 = vld [vmem:[#allocation5 + $0x60] sm:$0xff]  ;;  %v362_v59 = vld [vmem:[#allocation5 + $0x68] sm:$0xff]  ;;  %v297_v62 = vld [vmem:[#allocation5 + $0x18] sm:$0xff]  ;;  %p260_p11 = scmp.ge.s32.totalorder %s263_s30, 2  }
  0x76   : >> { %v302_v26 = vmul.f32 %v294_v2, %v286_v22  ;;  %v306_v27 = vmul.f32 %v298_v3, %v290_v23  ;;  %v303_v30 = vmul.f32 %v295_v14, %v287_v28  ;;  %v307_v31 = vmul.f32 %v299_v18, %v291_v29  ;;  %v301_v17 = vld [vmem:[#allocation5 + $0x38] sm:$0xff]  ;;  %v359_v18 = vld [vmem:[#allocation5 + $0x50] sm:$0xff]  ;;  %s2592_s5 = sshll.u32 (%p260_p11), %s2944_s19, 11  ;;  %s2406_s23 = sshll.u32 (%p260_p11), %s3116_s11, 4  ;;  %s4710_s23 = int_to_ptr.vmem [resolvable:$true] %s2406_s23 }
  0x77   : >> { %v323_v39 = vrot.slane %v3134_v4, %v3154_v21  ;;  %v288_v44 = vsel %vm285_vm0, %v277_v32, %v281_v33  ;;  %v292_v45 = vsel %vm285_vm0, %v281_v33, %v277_v32  ;;  %v278_v54 = vrot.slane %v3173_v40, 4  ;;  %v363_v22 = vld [vmem:[#allocation5 + $0x70] sm:$0xff]  ;;  %s4707_s24 = scalar_lea.hbm (%p260_p11), %s4790_s3, %s2592_s5  ;;  %s2387_s21 = scalar_lea.sflag (%p260_p11), [#allocation4], %s3101_s8 }
  0x78   : >> { %v332_v36 = vadd.f32 %v315_v16, %v302_v26  ;;  %v336_v37 = vadd.f32 %v315_v16, %v306_v27  ;;  %v333_v42 = vadd.f32 %v319_v25, %v303_v30  ;;  %v337_v43 = vadd.f32 %v319_v25, %v307_v31  ;;  %s2772_s6 = scalar_lea.vmem (%p260_p11), %s4710_s23, 2048  ;;  %p5025_p2 = scmp.ne.s32.totalorder (%p260_p11), %s4867_s13, 0 }
  0x79   : >> { %v304_v48 = vmul.f32 %v296_v34, %v288_v44  ;;  %v308_v49 = vmul.f32 %v300_v35, %v292_v45  ;;  %v282_v55 = vrot.slane %v3176_v41, 4  ;;  %v387_v23 = vrot.slane %v3136_v5, %v3154_v21  ;;  %v483_v21 = vld [vmem:[#allocation5 + $0x90] sm:$0xff]  ;;  %p2773_p0 = scmp.ne.s32.totalorder (%p260_p11), %s4710_s23, %s2772_s6  ;;  %s2892_s28 = smov (%p260_p11), [#allocation8]  }
  0x7a   : >> { %v340_v46 = vmax.f32 %v332_v36, 0.0  ;;  %v344_v47 = vmax.f32 %v336_v37, 0.0  ;;  %v341_v52 = vmax.f32 %v333_v42, 0.0  ;;  %v345_v53 = vmax.f32 %v337_v43, 0.0  ;;  %s2776_s30 = sshll.u32 (%p260_p11), %s2892_s28, 4  ;;  %s2777_s30 = int_to_ptr.vmem [resolvable:$false] %s2776_s30 }
  0x7b   : >> { %v334_v60 = vadd.f32 %v323_v39, %v304_v48  ;;  %v338_v61 = vadd.f32 %v323_v39, %v308_v49  ;;  %v289_v3 = vsel %vm285_vm0, %v278_v54, %v282_v55  ;;  %v293_v10 = vsel %vm285_vm0, %v282_v55, %v278_v54  ;;  %p2774_p3 = pnand (%p260_p11), %p2773_p0, %p5025_p2  ;;  %p2779_p9 = scmp.lt.s32.totalorder (%p260_p11), %s4710_s23, %s2777_s30 }
  0x7c   : >> { %v348_v56 = vadd.f32 %v340_v46, %v267_v6  ;;  %v352_v57 = vadd.f32 %v344_v47, %v271_v7  ;;  %v349_v63 = vadd.f32 %v341_v52, %v268_v9  ;;  %v353_v2 = vadd.f32 %v345_v53, %v272_v12 }
  0x7d   : >> { %v342_v14 = vmax.f32 %v334_v60, 0.0  ;;  %v346_v16 = vmax.f32 %v338_v61, 0.0  ;;  %v305_v9 = vmul.f32 %v297_v62, %v289_v3  ;;  %v309_v30 = vmul.f32 %v301_v17, %v293_v10  ;;  %v360_v61 = vld [vmem:[#allocation5 + $0x58] sm:$0xff]  ;;  %p2775_p7 = pneg (%p260_p11), %p2774_p3 }
  0x7e   : >> { %v365_v11 = vmul.f32 %v357_v50, %v352_v57  ;;  %v369_v13 = vmul.f32 %v361_v51, %v348_v56  ;;  %v366_v6 = vmul.f32 %v358_v58, %v353_v2  ;;  %v370_v7 = vmul.f32 %v362_v59, %v349_v63 }
  0x7f   : >> { %v350_v26 = vadd.f32 %v342_v14, %v269_v19  ;;  %v354_v27 = vadd.f32 %v346_v16, %v273_v20  ;;  %v3191_v31 = vsub.s32 3, %v3127_v1  ;;  %vm444_vm1 = vcmp.lt.s32.totalorder %v3127_v1, 2 }
  0x80   : >> { %v396_v12 = vadd.f32 %v379_v24, %v365_v11  ;;  %v400_v25 = vadd.f32 %v379_v24, %v369_v13  ;;  %v397_v28 = vadd.f32 %v383_v38, %v366_v6  ;;  %v401_v29 = vadd.f32 %v383_v38, %v370_v7 }
  0x81   : >> { %4876 = vst [vmem:[#allocation19_spill] sm:$0xff] %v3191_v31  ;;  %v367_v34 = vmul.f32 %v359_v18, %v354_v27  ;;  %v371_v35 = vmul.f32 %v363_v22, %v350_v26  ;;  %v327_v39 = vrot.slane %v3134_v4, %v3191_v31  ;;  %v391_v3 = vrot.slane %v3136_v5, %v3191_v31 }
  0x82   : >> { %v404_v32 = vmax.f32 %v396_v12, 0.0  ;;  %v408_v33 = vmax.f32 %v400_v25, 0.0  ;;  %v405_v36 = vmax.f32 %v397_v28, 0.0  ;;  %v409_v37 = vmax.f32 %v401_v29, 0.0 }
  0x83   : >> { %v398_v19 = vadd.f32 %v387_v23, %v367_v34  ;;  %v402_v20 = vadd.f32 %v387_v23, %v371_v35  ;;  %v335_v44 = vadd.f32 %v327_v39, %v305_v9  ;;  %v339_v45 = vadd.f32 %v327_v39, %v309_v30 }
  0x84   : >> { %v3195_v42 = vadd.f32 %v404_v32, %v348_v56  ;;  %v3197_v24 = vadd.f32 %v408_v33, %v352_v57  ;;  %v3199_v38 = vadd.f32 %v405_v36, %v349_v63  ;;  %v3201_v43 = vadd.f32 %v409_v37, %v353_v2  ;;  %v364_v2 = vld [vmem:[#allocation5 + $0x78] sm:$0xff] }
  0x85   : >> { %v406_v48 = vmax.f32 %v398_v19, 0.0  ;;  %v410_v49 = vmax.f32 %v402_v20, 0.0  ;;  %v343_v51 = vmax.f32 %v335_v44, 0.0  ;;  %v347_v52 = vmax.f32 %v339_v45, 0.0 }
  0x86   : >> { %4877 = vst [vmem:[#allocation20_spill] sm:$0xff] %v3195_v42  ;;  %4878 = vst [vmem:[#allocation21_spill] sm:$0xff] %v3197_v24  ;;  %v420_v46 = vrot.slane %v3195_v42, 4  ;;  %v424_v47 = vrot.slane %v3197_v24, 4  ;;  %v421_v4 = vrot.slane %v3199_v38, 4  ;;  %v425_v50 = vrot.slane %v3201_v43, 4 }
  0x87   : >> { %4879 = vst [vmem:[#allocation22_spill] sm:$0xff] %v3199_v38  ;;  %4880 = vst [vmem:[#allocation23_spill] sm:$0xff] %v3201_v43  ;;  %v3215_v55 = vadd.f32 %v406_v48, %v350_v26  ;;  %v3217_v56 = vadd.f32 %v410_v49, %v354_v27  ;;  %v351_v62 = vadd.f32 %v343_v51, %v3173_v40  ;;  %vm654_vm2 = vcmp.lt.s32.totalorder %v3127_v1, 6  ;;  %v487_v43 = vld [vmem:[#allocation5 + $0xb0] sm:$0xff] }
  0x88   : >> { %v3209_v53 = vsel %vm285_vm0, %v424_v47, %v420_v46  ;;  %v3213_v54 = vsel %vm285_vm0, %v420_v46, %v424_v47  ;;  %v3225_v57 = vsel %vm285_vm0, %v425_v50, %v421_v4  ;;  %v3229_v58 = vsel %vm285_vm0, %v421_v4, %v425_v50 }
  0x89   : >> { %4881 = vst [vmem:[#allocation24_spill] sm:$0xff] %v3215_v55  ;;  %4882 = vst [vmem:[#allocation25_spill] sm:$0xff] %v3217_v56  ;;  %547 = vrot.lane.b32.xlu0 %v3209_v53, %s2889_s25  ;;  %549 = vrot.lane.b32.xlu1 %v3213_v54, %s2889_s25  ;;  %v422_v59 = vrot.slane %v3215_v55, 4  ;;  %v426_v60 = vrot.slane %v3217_v56, 4  ;;  %v355_v63 = vadd.f32 %v347_v52, %v3176_v41  ;;  %v436_v18 = vrot.slane %v3209_v53, 6 }
  0x8a   : >> { %v372_v41 = vmul.f32 %v364_v2, %v351_v62  ;;  %v437_v23 = vrot.slane %v3225_v57, 6  ;;  %v441_v9 = vrot.slane %v3229_v58, 6  ;;  %v440_v12 = vrot.slane %v3213_v54, 6 }
  0x8b   : >> { %v368_v10 = vmul.f32 %v360_v61, %v355_v63  ;;  %v3243_v11 = vsel %vm285_vm0, %v426_v60, %v422_v59  ;;  %v3247_v40 = vsel %vm285_vm0, %v422_v59, %v426_v60  ;;  %v646_v20 = vrot.slane %v3209_v53, 2 }
  0x8c   : >> { %v403_v14 = vadd.f32 %v391_v3, %v372_v41  ;;  %v3278_v27 = vsel %vm444_vm1, %v441_v9, %v437_v23  ;;  %v3282_v28 = vsel %vm444_vm1, %v440_v12, %v436_v18  ;;  %v3290_v29 = vsel %vm444_vm1, %v437_v23, %v441_v9  ;;  %v599_v23 = vld [vmem:[#allocation5 + $0x190] sm:$0xff] }
  0x8d   : >> { %551 = vrot.lane.b32.xlu0 %v3225_v57, %s2889_s25  ;;  %553 = vrot.lane.b32.xlu1 %v3229_v58, %s2889_s25  ;;  %v399_v13 = vadd.f32 %v391_v3, %v368_v10  ;;  %v3294_v30 = vsel %vm444_vm1, %v436_v18, %v440_v12  ;;  %v438_v32 = vrot.slane %v3243_v11, 6  ;;  %v442_v33 = vrot.slane %v3247_v40, 6  ;;  %v598_v18 = vld [vmem:[#allocation5 + $0x188] sm:$0xff]  ;;  %v603_v9 = vld [vmem:[#allocation5 + $0x1b0] sm:$0xff] }
  0x8e   : >> { %v411_v16 = vmax.f32 %v403_v14, 0.0  ;;  %v650_v44 = vrot.slane %v3213_v54, 2  ;;  %v647_v47 = vrot.slane %v3225_v57, 2  ;;  %v651_v48 = vrot.slane %v3229_v58, 2  ;;  %v499_v12 = vld [vmem:[#allocation5 + $0xc8] sm:$0xff] }
  0x8f   : >> { %v407_v5 = vmax.f32 %v399_v13, 0.0  ;;  %v3304_v34 = vsel %vm444_vm1, %v438_v32, %v442_v33  ;;  %v3308_v35 = vsel %vm444_vm1, %v442_v33, %v438_v32  ;;  %v648_v50 = vrot.slane %v3243_v11, 2  ;;  %v498_v32 = vld [vmem:[#allocation5 + $0xc0] sm:$0xff]  ;;  %v503_v33 = vld [vmem:[#allocation5 + $0xe8] sm:$0xff] }
  0x90   : >> { %v3255_v6 = vadd.f32 %v411_v16, %v355_v63  ;;  %v3333_v45 = vsel %vm654_vm2, %v650_v44, %v646_v20  ;;  %v3337_v46 = vsel %vm654_vm2, %v646_v20, %v650_v44  ;;  %v3347_v49 = vsel %vm654_vm2, %v651_v48, %v647_v47  ;;  %v597_v16 = vld [vmem:[#allocation5 + $0x180] sm:$0xff]  ;;  %v504_v44 = vld [vmem:[#allocation5 + $0xf0] sm:$0xff] }
  0x91   : >> { %555 = vrot.lane.b32.xlu0 %v3243_v11, %s2889_s25  ;;  %557 = vrot.lane.b32.xlu1 %v3247_v40, %s2889_s25  ;;  %v3253_v17 = vadd.f32 %v407_v5, %v351_v62  ;;  %v3351_v4 = vsel %vm654_vm2, %v647_v47, %v651_v48  ;;  %v652_v51 = vrot.slane %v3247_v40, 2  ;;  %v3392_v5 = vand.u32 127, %v4795_v0  ;;  %v502_v20 = vld [vmem:[#allocation5 + $0xe0] sm:$0xff]  ;;  %v500_v47 = vld [vmem:[#allocation5 + $0xd0] sm:$0xff]  ;;  %v718_v0 = vld [vmem:[#allocation5 + $0x268] sm:$0xff] }
  0x92   : >> { %4884 = vst [vmem:[#allocation27_spill] sm:$0xff] %v3255_v6  ;;  %v427_v22 = vrot.slane %v3255_v6, 4  ;;  %v3400_v48 = vmul.f32 %v597_v16, %v3209_v53  ;;  %v3415_v55 = vmul.f32 %v603_v9, %v3247_v40  ;;  %v3418_v53 = vmul.f32 %v499_v12, %v3278_v27  ;;  %v719_v16 = vld [vmem:[#allocation5 + $0x270] sm:$0xff]  ;;  %v505_v9 = vld [vmem:[#allocation5 + $0xf8] sm:$0xff] }
  0x93   : >> { %4883 = vst [vmem:[#allocation26_spill] sm:$0xff] %v3253_v17  ;;  %v423_v7 = vrot.slane %v3253_v17, 4  ;;  %v661_v52 = vsel %vm654_vm2, %v652_v51, %v648_v50  ;;  %v657_v59 = vsel %vm654_vm2, %v648_v50, %v652_v51  ;;  %4885 = vst [vmem:[#allocation28_spill] sm:$0xff] %v3392_v5  ;;  %vm471_vm3 = vcmp.lt.s32.totalorder %v3392_v5, 64  ;;  %v501_v12 = vld [vmem:[#allocation5 + $0xd8] sm:$0xff] }
  0x94   : >> { %v3406_v51 = vmul.f32 %v598_v18, %v3225_v57  ;;  %v3412_v17 = vmul.f32 %v599_v23, %v3243_v11  ;;  %v600_v57 = vld [vmem:[#allocation5 + $0x198] sm:$0xff]  ;;  %v3421_v6 = vmul.f32 %v498_v32, %v3282_v28  ;;  %v3427_v11 = vmul.f32 %v502_v20, %v3294_v30 }
  0x95   : >> { %v3266_v25 = vsel %vm285_vm0, %v427_v22, %v423_v7  ;;  %v3270_v26 = vsel %vm285_vm0, %v423_v7, %v427_v22  ;;  %v601_v7 = vld [vmem:[#allocation5 + $0x1a0] sm:$0xff]  ;;  %v602_v22 = vld [vmem:[#allocation5 + $0x1a8] sm:$0xff]  ;;  %v604_v18 = vld [vmem:[#allocation5 + $0x1b8] sm:$0xff]  ;;  %v3430_v40 = vmul.f32 %v504_v44, %v3304_v34  ;;  %v3437_v23 = vmul.f32 %v500_v47, %v3308_v35 }
  0x96   : >> { %559 = vrot.lane.b32.xlu0 %v3266_v25, %s2889_s25  ;;  %561 = vrot.lane.b32.xlu1 %v3270_v26, %s2889_s25  ;;  %v439_v36 = vrot.slane %v3266_v25, 6  ;;  %v443_v37 = vrot.slane %v3270_v26, 6  ;;  %v649_v60 = vrot.slane %v3266_v25, 2  ;;  %v653_v61 = vrot.slane %v3270_v26, 2  ;;  %v573_v44 = vld [vmem:[#allocation5 + $0x148] sm:$0xff] }
  0x97   : >> { %v3403_v50 = vmul.f32 %v601_v7, %v3213_v54  ;;  %v3409_v1 = vmul.f32 %v602_v22, %v3229_v58  ;;  %v714_v54 = vld [vmem:[#allocation5 + $0x248] sm:$0xff]  ;;  %v715_v7 = vld [vmem:[#allocation5 + $0x250] sm:$0xff]  ;;  %v3424_v58 = vmul.f32 %v503_v33, %v3290_v29  ;;  %v3451_v33 = vmul.f32 %v719_v16, %v661_v52 }
  0x98   : >> { %v3318_v39 = vsel %vm444_vm1, %v439_v36, %v443_v37  ;;  %v3322_v19 = vsel %vm444_vm1, %v443_v37, %v439_v36  ;;  %v3369_v62 = vsel %vm654_vm2, %v653_v61, %v649_v60  ;;  %v3373_v63 = vsel %vm654_vm2, %v649_v60, %v653_v61  ;;  %v717_v60 = vld [vmem:[#allocation5 + $0x260] sm:$0xff]  ;;  %v482_v47 = vld [vmem:[#allocation5 + $0x88] sm:$0xff]  ;;  %v578_v16 = vld [vmem:[#allocation5 + $0x170] sm:$0xff] }
  0x99   : >> { %v713_v61 = vld [vmem:[#allocation5 + $0x240] sm:$0xff]  ;;  %v3449_v32 = vmul.f32 %v714_v54, %v3351_v4  ;;  %4888 = vst [vmem:[#allocation31_spill] sm:$0xff] %v3451_v33  ;;  %v3453_v20 = vmul.f32 %v715_v7, %v657_v59  ;;  %v627_v7 = vld [vmem:[#allocation5 + $0x1e8] sm:$0xff] }
  0x9a   : >> { %457 = vrot.lane.b32.xlu1 %v3278_v27, %s2889_s25  ;;  %453 = vrot.lane.b32.xlu0 %v3282_v28, %s2889_s25  ;;  %v3440_v28 = vmul.f32 %v717_v60, %v3333_v45  ;;  %v486_v60 = vld [vmem:[#allocation5 + $0xa8] sm:$0xff] }
  0x9b   : >> { %4889 = vst [vmem:[#allocation32_spill] sm:$0xff] %v3453_v20 }
  0x9c   : >> { %4886 = vst [vmem:[#allocation29_spill] sm:$0xff] %v3440_v28 }
  0x9e   : >> { %459 = vrot.lane.b32.xlu1 %v3290_v29, %s2889_s25  ;;  %455 = vrot.lane.b32.xlu0 %v3294_v30, %s2889_s25  ;;  %v3443_v29 = vmul.f32 %v713_v61, %v3337_v46  ;;  %v3446_v30 = vmul.f32 %v718_v0, %v3347_v49  ;;  %v3463_v0 = vmul.f32 %v604_v18, %v3270_v26  ;;  %v623_v61 = vld [vmem:[#allocation5 + $0x1c8] sm:$0xff] }
  0x9f   : >> { %v3481_v26 = vmul.f32 %v501_v12, %v3322_v19 }
  0xa0   : >> { %4887 = vst [vmem:[#allocation30_spill] sm:$0xff] %v3443_v29  ;;  %v528_v29 = vld [vmem:[#allocation5 + $0x128] sm:$0xff] }
  0xa2   : >> { %463 = vrot.lane.b32.xlu1 %v3304_v34, %s2889_s25  ;;  %461 = vrot.lane.b32.xlu0 %v3308_v35, %s2889_s25  ;;  %v720_v34 = vld [vmem:[#allocation5 + $0x278] sm:$0xff] }
  0xa3   : >> { %v716_v35 = vld [vmem:[#allocation5 + $0x258] sm:$0xff] }
  0xa4   : >> { %v3503_v38 = vmul.f32 %v716_v35, %v3373_v63 }
  0xa6   : >> { %467 = vrot.lane.b32.xlu1 %v3318_v39, %s2889_s25  ;;  %465 = vrot.lane.b32.xlu0 %v3322_v19, %s2889_s25  ;;  %v572_v19 = vld [vmem:[#allocation5 + $0x140] sm:$0xff]  ;;  %4893 = vst [vmem:[#allocation36_spill] sm:$0xff] %v3503_v38 }
  0xaa   : >> { %665 = vrot.lane.b32.xlu1 %v3333_v45, %s2889_s25  ;;  %663 = vrot.lane.b32.xlu0 %v3337_v46, %s2889_s25  ;;  %v3460_v46 = vmul.f32 %v600_v57, %v3266_v25  ;;  %v3478_v25 = vmul.f32 %v505_v9, %v3318_v39  ;;  %v3492_v39 = vmul.f32 %v720_v34, %v3369_v62 }
  0xac   : >> { %4891 = vst [vmem:[#allocation34_spill] sm:$0xff] %v3492_v39  ;;  %v524_v39 = vld [vmem:[#allocation5 + $0x108] sm:$0xff] }
  0xae   : >> { %669 = vrot.lane.b32.xlu1 %v3347_v49, %s2889_s25  ;;  %667 = vrot.lane.b32.xlu0 %v3351_v4, %s2889_s25  ;;  %v577_v4 = vld [vmem:[#allocation5 + $0x168] sm:$0xff] }
  0xb2   : >> { %673 = vrot.lane.b32.xlu1 %v661_v52, %s2889_s25  ;;  %671 = vrot.lane.b32.xlu0 %v657_v59, %s2889_s25  ;;  %v574_v59 = vld [vmem:[#allocation5 + $0x150] sm:$0xff] }
  0xb6   : >> { %677 = vrot.lane.b32.xlu1 %v3369_v62, %s2889_s25  ;;  %675 = vrot.lane.b32.xlu0 %v3373_v63, %s2889_s25  ;;  %v576_v62 = vld [vmem:[#allocation5 + $0x160] sm:$0xff] }
  0xfb   : >> { %v3379_v2 = vpop.permute.xlu0 %547  ;;  %v3381_v3 = vpop.permute.xlu1 %549 }
  0xff   : >> { %v3383_v10 = vpop.permute.xlu0 %551  ;;  %v3385_v41 = vpop.permute.xlu1 %553 }
 0x100   : >> { %v3469_v49 = vsel %vm471_vm3, %v3379_v2, %v3383_v10  ;;  %v3475_v52 = vsel %vm471_vm3, %v3381_v3, %v3385_v41 }
 0x101   : >> { %4890 = vst [vmem:[#allocation33_spill] sm:$0xff] %v3469_v49  ;;  %v585_v42 = vmul.f32 %v577_v4, %v3475_v52 }
 0x103   : >> { %v3387_v13 = vpop.permute.xlu0 %555  ;;  %v3389_v14 = vpop.permute.xlu1 %557 }
 0x104   : >> { %v565_v54 = vsel %vm471_vm3, %v3383_v10, %v3387_v13  ;;  %v566_v57 = vsel %vm471_vm3, %v3385_v41, %v3389_v14  ;;  %v581_v41 = vmul.f32 %v573_v44, %v3469_v49  ;;  %v579_v44 = vld [vmem:[#allocation5 + $0x178] sm:$0xff] }
 0x105   : >> { %v3507_v24 = vmul.f32 %v574_v59, %v565_v54  ;;  %v3509_v31 = vmul.f32 %v623_v61, %v565_v54  ;;  %v527_v61 = vld [vmem:[#allocation5 + $0x120] sm:$0xff] }
 0x108   : >> { %v3394_v36 = vpop.permute.xlu0 %559  ;;  %v3396_v37 = vpop.permute.xlu1 %561 }
 0x109   : >> { %v3498_v9 = vsel %vm471_vm3, %v3394_v36, %v3379_v2  ;;  %v3511_v2 = vmul.f32 %v578_v16, %v566_v57  ;;  %v3519_v63 = vsel %vm471_vm3, %v3387_v13, %v3394_v36  ;;  %v3528_v4 = vsel %vm471_vm3, %v3389_v14, %v3396_v37 }
 0x10a   : >> { %4892 = vst [vmem:[#allocation35_spill] sm:$0xff] %v3498_v9  ;;  %v3522_v35 = vmul.f32 %v572_v19, %v3498_v9  ;;  %v3534_v59 = vsel %vm471_vm3, %v3396_v37, %v3381_v3  ;;  %v587_v28 = vmul.f32 %v579_v44, %v3528_v4  ;;  %v526_v44 = vld [vmem:[#allocation5 + $0x118] sm:$0xff] }
 0x10b   : >> { %4894 = vst [vmem:[#allocation37_spill] sm:$0xff] %v3534_v59  ;;  %v584_v37 = vmul.f32 %v576_v62, %v3534_v59 }
 0x10c   : >> { %v3432_v22 = vpop.permute.xlu1 %457  ;;  %v3434_v27 = vpop.permute.xlu0 %453 }
 0x10d   : >> { %v476_v45 = vsel %vm471_vm3, %v3434_v27, %v3432_v22 }
 0x10e   : >> { %v490_v10 = vmul.f32 %v482_v47, %v476_v45  ;;  %v3513_v47 = vmul.f32 %v627_v7, %v566_v57 }
 0x110   : >> { %v460_v18 = vpop.permute.xlu1 %459  ;;  %v456_v56 = vpop.permute.xlu0 %455  ;;  %v515_v54 = vadd.f32 %v3418_v53, %v490_v10  ;;  %v485_v53 = vld [vmem:[#allocation5 + $0xa0] sm:$0xff]  ;;  %v488_v10 = vld [vmem:[#allocation5 + $0xb8] sm:$0xff] }
 0x111   : >> { %v477_v12 = vsel %vm471_vm3, %v456_v56, %v460_v18 }
 0x112   : >> { %v494_v34 = vmul.f32 %v486_v60, %v477_v12  ;;  %v523_v60 = vld [vmem:[#allocation5 + $0x100] sm:$0xff]  ;;  %v535_v9 = vmul.f32 %v527_v61, %v477_v12  ;;  %v525_v12 = vld [vmem:[#allocation5 + $0x110] sm:$0xff] }
 0x113   : >> { %v531_v20 = vmul.f32 %v523_v60, %v476_v45 }
 0x114   : >> { %v464_v13 = vpop.permute.xlu1 %463  ;;  %v462_v36 = vpop.permute.xlu0 %461  ;;  %v519_v16 = vadd.f32 %v3424_v58, %v494_v34  ;;  %v529_v58 = vld [vmem:[#allocation5 + $0x130] sm:$0xff] }
 0x115   : >> { %v475_v7 = vsel %vm471_vm3, %v460_v18, %v464_v13  ;;  %v474_v14 = vsel %vm471_vm3, %v3432_v22, %v462_v36  ;;  %v530_v22 = vld [vmem:[#allocation5 + $0x138] sm:$0xff] }
 0x116   : >> { %v495_v57 = vmul.f32 %v487_v43, %v475_v7  ;;  %v536_v19 = vmul.f32 %v528_v29, %v475_v7  ;;  %v491_v38 = vmul.f32 %v483_v21, %v474_v14  ;;  %v532_v3 = vmul.f32 %v524_v39, %v474_v14  ;;  %v481_v29 = vld [vmem:[#allocation5 + $0x80] sm:$0xff]  ;;  %v484_v21 = vld [vmem:[#allocation5 + $0x98] sm:$0xff] }
 0x118   : >> { %v520_v34 = vadd.f32 %v3430_v40, %v495_v57  ;;  %v544_v18 = vadd.f32 %v536_v19, %v519_v16  ;;  %v516_v33 = vadd.f32 %v3437_v23, %v491_v38  ;;  %v540_v49 = vadd.f32 %v532_v3, %v515_v54  ;;  %v468_v43 = vpop.permute.xlu1 %467  ;;  %v466_v39 = vpop.permute.xlu0 %465  ;;  %v575_v57 = vld [vmem:[#allocation5 + $0x158] sm:$0xff] }
 0x119   : >> { %v473_v62 = vsel %vm471_vm3, %v464_v13, %v468_v43  ;;  %v479_v45 = vsel %vm471_vm3, %v468_v43, %v456_v56  ;;  %v472_v40 = vsel %vm471_vm3, %v462_v36, %v466_v39  ;;  %v478_v38 = vsel %vm471_vm3, %v466_v39, %v3434_v27  ;;  %v628_v27 = vld [vmem:[#allocation5 + $0x1f0] sm:$0xff]  ;;  %v693_v39 = vld [vmem:[#allocation5 + $0x228] sm:$0xff] }
 0x11a   : >> { %v593_v23 = vadd.f32 %v585_v42, %v544_v18  ;;  %v589_v60 = vadd.f32 %v581_v41, %v540_v49  ;;  %v493_v61 = vmul.f32 %v485_v53, %v479_v45  ;;  %v496_v54 = vmul.f32 %v488_v10, %v473_v62 }
 0x11b   : >> { %v537_v16 = vmul.f32 %v529_v58, %v473_v62  ;;  %v538_v7 = vmul.f32 %v530_v22, %v479_v45  ;;  %v489_v14 = vmul.f32 %v481_v29, %v478_v38  ;;  %v492_v13 = vmul.f32 %v484_v21, %v472_v40  ;;  %v689_v62 = vld [vmem:[#allocation5 + $0x208] sm:$0xff] }
 0x11c   : >> { %v518_v56 = vadd.f32 %v3427_v11, %v493_v61  ;;  %v521_v19 = vadd.f32 %v3478_v25, %v496_v54  ;;  %v533_v3 = vmul.f32 %v525_v12, %v472_v40  ;;  %v534_v43 = vmul.f32 %v526_v44, %v478_v38  ;;  %v3558_v36 = vpop.permute.xlu1 %665  ;;  %v3560_v59 = vpop.permute.xlu0 %663  ;;  %v3582_v44 = vld [vmem:[#allocation7 + $0x2] ss:$8 sm:$0xf] }
 0x11d   : >> { %v545_v42 = vadd.f32 %v537_v16, %v520_v34  ;;  %v514_v49 = vadd.f32 %v3421_v6, %v489_v14  ;;  %v517_v41 = vadd.f32 %v3481_v26, %v492_v13  ;;  %v618_v53 = vadd.f32 %v3409_v1, %v593_v23  ;;  %v694_v40 = vld [vmem:[#allocation5 + $0x230] sm:$0xff]  ;;  %v626_v61 = vld [vmem:[#allocation5 + $0x1e0] sm:$0xff] }
 0x11e   : >> { %v543_v10 = vadd.f32 %v535_v9, %v518_v56  ;;  %v546_v58 = vadd.f32 %v538_v7, %v521_v19  ;;  %v541_v18 = vadd.f32 %v533_v3, %v516_v33  ;;  %v614_v11 = vadd.f32 %v3406_v51, %v589_v60  ;;  %v690_v7 = vld [vmem:[#allocation5 + $0x210] sm:$0xff]  ;;  %v629_v56 = vld [vmem:[#allocation5 + $0x1f8] sm:$0xff]  ;;  %v743_v19 = vld [vmem:[#allocation5 + $0x2a8] sm:$0xff] }
 0x11f   : >> { %v583_v25 = vmul.f32 %v575_v57, %v3519_v63  ;;  %v594_v22 = vadd.f32 %v3511_v2, %v545_v42  ;;  %v539_v29 = vadd.f32 %v531_v20, %v514_v49  ;;  %v542_v21 = vadd.f32 %v534_v43, %v517_v41  ;;  %v624_v2 = vld [vmem:[#allocation5 + $0x1d0] sm:$0xff]  ;;  %v622_v57 = vld [vmem:[#allocation5 + $0x1c0] sm:$0xff]  ;;  %v695_v41 = vld [vmem:[#allocation5 + $0x238] sm:$0xff] }
 0x120   : >> { %v636_v34 = vmul.f32 %v628_v27, %v3528_v4  ;;  %v592_v6 = vadd.f32 %v584_v37, %v543_v10  ;;  %v595_v45 = vadd.f32 %v587_v28, %v546_v58  ;;  %v590_v26 = vadd.f32 %v3507_v24, %v541_v18  ;;  %v670_v1 = vpop.permute.xlu1 %669  ;;  %v668_v9 = vpop.permute.xlu0 %667  ;;  %v692_v49 = vld [vmem:[#allocation5 + $0x220] sm:$0xff]  ;;  %v625_v18 = vld [vmem:[#allocation5 + $0x1d8] sm:$0xff] }
 0x121   : >> { %v588_v33 = vadd.f32 %v3522_v35, %v539_v29  ;;  %v591_v12 = vadd.f32 %v583_v25, %v542_v21  ;;  %v684_v51 = vsel %vm471_vm3, %v3558_v36, %v670_v1  ;;  %v3577_v20 = vsel %vm471_vm3, %v3560_v59, %v668_v9  ;;  %v4895_v10 = vld [vmem:[#allocation33_spill] sm:$0xff] }
 0x122   : >> { %v643_v4 = vadd.f32 %v3513_v47, %v618_v53  ;;  %v701_v28 = vmul.f32 %v693_v39, %v684_v51  ;;  %v639_v24 = vadd.f32 %v3509_v31, %v614_v11  ;;  %v697_v37 = vmul.f32 %v689_v62, %v3577_v20  ;;  %v4896_v11 = vld [vmem:[#allocation37_spill] sm:$0xff] }
 0x123   : >> { %v619_v35 = vadd.f32 %v3415_v55, %v594_v22  ;;  %v615_v38 = vadd.f32 %v3412_v17, %v590_v26  ;;  %v617_v23 = vadd.f32 %v3403_v50, %v592_v6  ;;  %v620_v60 = vadd.f32 %v3463_v0, %v595_v45  ;;  %v742_v22 = vld [vmem:[#allocation5 + $0x2a0] sm:$0xff]  ;;  %v4897_v45 = vld [vmem:[#allocation31_spill] sm:$0xff] }
 0x124   : >> { %v709_v54 = vadd.f32 %v701_v28, %v643_v4  ;;  %v705_v16 = vadd.f32 %v697_v37, %v639_v24  ;;  %v674_v47 = vpop.permute.xlu1 %673  ;;  %v672_v14 = vpop.permute.xlu0 %671  ;;  %v613_v31 = vadd.f32 %v3400_v48, %v588_v33  ;;  %v616_v13 = vadd.f32 %v3460_v46, %v591_v12  ;;  %v4898_v4 = vld [vmem:[#allocation35_spill] sm:$0xff] }
 0x125   : >> { %v632_v55 = vmul.f32 %v624_v2, %v3519_v63  ;;  %v3593_v17 = vrot.slane %v3582_v44, %v3147_v15  ;;  %v682_v50 = vsel %vm471_vm3, %v670_v1, %v674_v47  ;;  %v681_v0 = vsel %vm471_vm3, %v668_v9, %v672_v14  ;;  %v744_v1 = vld [vmem:[#allocation5 + $0x2b0] sm:$0xff]  ;;  %v691_v2 = vld [vmem:[#allocation5 + $0x218] sm:$0xff] }
 0x126   : >> { %v644_v3 = vadd.f32 %v636_v34, %v619_v35  ;;  %v702_v43 = vmul.f32 %v694_v40, %v682_v50  ;;  %v734_v48 = vadd.f32 %v3446_v30, %v709_v54  ;;  %v730_v46 = vadd.f32 %v3449_v32, %v705_v16  ;;  %v739_v30 = vld [vmem:[#allocation5 + $0x288] sm:$0xff]  ;;  %v688_v35 = vld [vmem:[#allocation5 + $0x200] sm:$0xff]  ;;  %v4899_v40 = vld [vmem:[#allocation32_spill] sm:$0xff] }
 0x127   : >> { %v634_v63 = vmul.f32 %v626_v61, %v3475_v52  ;;  %v640_v27 = vadd.f32 %v632_v55, %v615_v38  ;;  %v698_v42 = vmul.f32 %v690_v7, %v681_v0  ;;  %v768_v53 = vrot.slane %v3582_v44, %v3142_v8 }
 0x128   : >> { %v630_v58 = vmul.f32 %v622_v57, %v4895_v10  ;;  %v637_v25 = vmul.f32 %v629_v56, %v4896_v11  ;;  %v710_v29 = vadd.f32 %v702_v43, %v644_v3  ;;  %v751_v21 = vmul.f32 %v743_v19, %v682_v50  ;;  %v678_v39 = vpop.permute.xlu1 %677  ;;  %v676_v6 = vpop.permute.xlu0 %675  ;;  %v4900_v57 = vld [vmem:[#allocation29_spill] sm:$0xff]  ;;  %v740_v3 = vld [vmem:[#allocation5 + $0x290] sm:$0xff] }
 0x129   : >> { %v706_v32 = vadd.f32 %v698_v42, %v640_v27  ;;  %v642_v62 = vadd.f32 %v634_v63, %v617_v23  ;;  %v680_v52 = vsel %vm471_vm3, %v674_v47, %v678_v39  ;;  %v686_v34 = vsel %vm471_vm3, %v678_v39, %v3558_v36 }
 0x12a   : >> { %v735_v26 = vadd.f32 %v4897_v45, %v710_v29  ;;  %v645_v9 = vadd.f32 %v637_v25, %v620_v60  ;;  %v700_v33 = vmul.f32 %v692_v49, %v686_v34  ;;  %v703_v12 = vmul.f32 %v695_v41, %v680_v52  ;;  %v745_v49 = vld [vmem:[#allocation5 + $0x2b8] sm:$0xff] }
 0x12b   : >> { %v633_v28 = vmul.f32 %v625_v18, %v4898_v4  ;;  %v750_v24 = vmul.f32 %v742_v22, %v684_v51  ;;  %v747_v37 = vmul.f32 %v739_v30, %v681_v0  ;;  %v731_v38 = vadd.f32 %v4899_v40, %v706_v32  ;;  %v4901_v51 = vld [vmem:[#allocation34_spill] sm:$0xff]  ;;  %v738_v0 = vld [vmem:[#allocation5 + $0x280] sm:$0xff]  ;;  %v4903_v41 = vld [vmem:[#allocation36_spill] sm:$0xff] }
 0x12c   : >> { %v759_v23 = vadd.f32 %v751_v21, %v734_v48  ;;  %v708_v61 = vadd.f32 %v700_v33, %v642_v62  ;;  %v711_v54 = vadd.f32 %v703_v12, %v645_v9  ;;  %v679_v36 = vsel %vm471_vm3, %v672_v14, %v676_v6  ;;  %v4902_v48 = vld [vmem:[#allocation18_spill] sm:$0xff]  ;;  %v4905_v32 = vld [vmem:[#allocation19_spill] sm:$0xff] }
 0x12d   : >> { %v752_v16 = vmul.f32 %v744_v1, %v680_v52  ;;  %v641_v47 = vadd.f32 %v633_v28, %v616_v13  ;;  %v685_v60 = vsel %vm471_vm3, %v676_v6, %v3560_v59  ;;  %v699_v7 = vmul.f32 %v691_v2, %v679_v36  ;;  %v741_v52 = vld [vmem:[#allocation5 + $0x298] sm:$0xff]  ;;  %v4906_v1 = vld [vmem:[#allocation21_spill] sm:$0xff] }
 0x12e   : >> { %v733_v55 = vadd.f32 %v4900_v57, %v708_v61  ;;  %v736_v56 = vadd.f32 %v4901_v51, %v711_v54  ;;  %v638_v19 = vadd.f32 %v630_v58, %v613_v31  ;;  %v696_v50 = vmul.f32 %v688_v35, %v685_v60  ;;  %v4904_v31 = vld [vmem:[#allocation30_spill] sm:$0xff] }
 0x12f   : >> { %v707_v43 = vadd.f32 %v699_v7, %v641_v47  ;;  %v776_v63 = vrot.slane %v3582_v44, %v4902_v48  ;;  %v790_v13 = vadd.f32 %v3593_v17, %v759_v23  ;;  %v755_v42 = vadd.f32 %v747_v37, %v730_v46  ;;  %v4920_v51 = vld [vmem:[#allocation26_spill] sm:$0xff] }
 0x130   : >> { %v758_v14 = vadd.f32 %v750_v24, %v733_v55  ;;  %v704_v27 = vadd.f32 %v696_v50, %v638_v19  ;;  %v760_v59 = vadd.f32 %v752_v16, %v735_v26  ;;  %v746_v18 = vmul.f32 %v738_v0, %v3577_v20  ;;  %v4910_v24 = vld [vmem:[#allocation20_spill] sm:$0xff] }
 0x131   : >> { %v732_v10 = vadd.f32 %v4903_v41, %v707_v43  ;;  %v748_v25 = vmul.f32 %v740_v3, %v679_v36  ;;  %v753_v22 = vmul.f32 %v745_v49, %v686_v34  ;;  %v798_v30 = vmax.f32 %v790_v13, 0.0  ;;  %v4908_v34 = vld [vmem:[#allocation23_spill] sm:$0xff] }
 0x132   : >> { %v789_v11 = vadd.f32 %v768_v53, %v758_v14  ;;  %v729_v58 = vadd.f32 %v4904_v31, %v704_v27  ;;  %v786_v39 = vadd.f32 %v3593_v17, %v755_v42  ;;  %v780_v62 = vrot.slane %v3582_v44, %v4905_v32  ;;  %v4916_v36 = vld [vmem:[#allocation27_spill] sm:$0xff] }
 0x133   : >> { %v791_v46 = vadd.f32 %v776_v63, %v760_v59  ;;  %v761_v6 = vadd.f32 %v753_v22, %v736_v56  ;;  %v756_v45 = vadd.f32 %v748_v25, %v731_v38  ;;  %v749_v9 = vmul.f32 %v741_v52, %v685_v60  ;;  %v4914_v38 = vld [vmem:[#allocation25_spill] sm:$0xff]  ;;  %v4918_v60 = vld [vmem:[#allocation24_spill] sm:$0xff] }
 0x134   : >> { %v797_v29 = vmax.f32 %v789_v11, 0.0  ;;  %v754_v21 = vadd.f32 %v746_v18, %v729_v58  ;;  %v3636_v12 = vadd.f32 %v798_v30, %v4908_v34  ;;  %v794_v17 = vmax.f32 %v786_v39, 0.0 }
 0x135   : >> { %v799_v2 = vmax.f32 %v791_v46, 0.0  ;;  %v792_v4 = vadd.f32 %v780_v62, %v761_v6  ;;  %v757_v44 = vadd.f32 %v749_v9, %v732_v10  ;;  %v787_v28 = vadd.f32 %v776_v63, %v756_v45 }
 0x136   : >> { %v785_v26 = vadd.f32 %v768_v53, %v754_v21  ;;  %v3631_v20 = vadd.f32 %v797_v29, %v4906_v1  ;;  %4909 = vst [vmem:[#allocation37_spill] sm:$0xff] %v3636_v12  ;;  %v4912_v53 = vld [vmem:[#allocation22_spill] sm:$0xff]  ;;  %v810_v0 = vrot.slane %v3636_v12, 6  ;;  %v1016_v25 = vrot.slane %v3636_v12, 2 }
 0x137   : >> { %v3646_v35 = vadd.f32 %v794_v17, %v4912_v53  ;;  %v800_v40 = vmax.f32 %v792_v4, 0.0  ;;  %v3649_v23 = vadd.f32 %v799_v2, %v4914_v38  ;;  %v788_v61 = vadd.f32 %v780_v62, %v757_v44  ;;  %v868_v4 = vld [vmem:[#allocation5 + $0x308] sm:$0xff]  ;;  %v873_v53 = vld [vmem:[#allocation5 + $0x330] sm:$0xff]  ;;  %v867_v38 = vld [vmem:[#allocation5 + $0x300] sm:$0xff] }
 0x138   : >> { %4907 = vst [vmem:[#allocation33_spill] sm:$0xff] %v3631_v20  ;;  %v793_v33 = vmax.f32 %v785_v26, 0.0  ;;  %916 = vrot.lane.b32.xlu0 %v3631_v20, %s2889_s25  ;;  %v795_v54 = vmax.f32 %v787_v28, 0.0  ;;  %v809_v57 = vrot.slane %v3631_v20, 6  ;;  %v1015_v18 = vrot.slane %v3631_v20, 2  ;;  %v872_v44 = vld [vmem:[#allocation5 + $0x328] sm:$0xff] }
 0x139   : >> { %4913 = vst [vmem:[#allocation35_spill] sm:$0xff] %v3646_v35  ;;  %4915 = vst [vmem:[#allocation32_spill] sm:$0xff] %v3649_v23  ;;  %v3656_v16 = vadd.f32 %v800_v40, %v4916_v36  ;;  %v796_v47 = vmax.f32 %v788_v61, 0.0  ;;  %v814_v3 = vrot.slane %v3646_v35, 6  ;;  %v811_v14 = vrot.slane %v3649_v23, 6  ;;  %v1082_v28 = vld [vmem:[#allocation5 + $0x488] sm:$0xff] }
 0x13a   : >> { %v3639_v37 = vadd.f32 %v793_v33, %v4910_v24  ;;  %v3659_v7 = vadd.f32 %v795_v54, %v4918_v60  ;;  %v1020_v22 = vrot.slane %v3646_v35, 2  ;;  %v1017_v30 = vrot.slane %v3649_v23, 2  ;;  %v869_v24 = vld [vmem:[#allocation5 + $0x310] sm:$0xff]  ;;  %v1086_v40 = vld [vmem:[#allocation5 + $0x4a8] sm:$0xff]  ;;  %v870_v61 = vld [vmem:[#allocation5 + $0x318] sm:$0xff] }
 0x13b   : >> { %4917 = vst [vmem:[#allocation29_spill] sm:$0xff] %v3656_v16  ;;  %v3668_v56 = vadd.f32 %v796_v47, %v4920_v51  ;;  %v822_v63 = vsel %vm444_vm1, %v814_v3, %v810_v0  ;;  %v818_v13 = vsel %vm444_vm1, %v810_v0, %v814_v3  ;;  %v812_v49 = vrot.slane %v3656_v16, 6  ;;  %v1083_v54 = vld [vmem:[#allocation5 + $0x490] sm:$0xff]  ;;  %v967_v47 = vld [vmem:[#allocation5 + $0x3c8] sm:$0xff]  ;;  %v871_v60 = vld [vmem:[#allocation5 + $0x320] sm:$0xff] }
 0x13c   : >> { %4911 = vst [vmem:[#allocation31_spill] sm:$0xff] %v3639_v37  ;;  %918 = vrot.lane.b32.xlu1 %v3639_v37, %s2889_s25  ;;  %920 = vrot.lane.b32.xlu0 %v3636_v12, %s2889_s25  ;;  %4919 = vst [vmem:[#allocation34_spill] sm:$0xff] %v3659_v7  ;;  %v813_v55 = vrot.slane %v3639_v37, 6  ;;  %v815_v27 = vrot.slane %v3659_v7, 6  ;;  %v1019_v11 = vrot.slane %v3639_v37, 2  ;;  %v1024_v21 = vsel %vm654_vm2, %v1016_v25, %v1020_v22  ;;  %v1087_v36 = vld [vmem:[#allocation5 + $0x4b0] sm:$0xff] }
 0x13d   : >> { %4921 = vst [vmem:[#allocation36_spill] sm:$0xff] %v3668_v56  ;;  %v816_v59 = vrot.slane %v3668_v56, 6  ;;  %v1021_v39 = vrot.slane %v3659_v7, 2  ;;  %v1028_v62 = vsel %vm654_vm2, %v1020_v22, %v1016_v25  ;;  %v1018_v52 = vrot.slane %v3656_v16, 2 }
 0x13e   : >> { %v3672_v50 = vsel %vm444_vm1, %v813_v55, %v809_v57  ;;  %v3682_v43 = vsel %vm444_vm1, %v809_v57, %v813_v55  ;;  %v823_v42 = vsel %vm444_vm1, %v815_v27, %v811_v14  ;;  %v819_v41 = vsel %vm444_vm1, %v811_v14, %v815_v27  ;;  %v874_v57 = vld [vmem:[#allocation5 + $0x338] sm:$0xff]  ;;  %v1081_v55 = vld [vmem:[#allocation5 + $0x480] sm:$0xff] }
 0x13f   : >> { %v824_v10 = vsel %vm444_vm1, %v816_v59, %v812_v49  ;;  %v820_v31 = vsel %vm444_vm1, %v812_v49, %v816_v59  ;;  %v1023_v58 = vsel %vm654_vm2, %v1015_v18, %v1019_v11  ;;  %v1027_v29 = vsel %vm654_vm2, %v1019_v11, %v1015_v18  ;;  %v1085_v27 = vld [vmem:[#allocation5 + $0x4a0] sm:$0xff]  ;;  %v1084_v59 = vld [vmem:[#allocation5 + $0x498] sm:$0xff]  ;;  %v971_v18 = vld [vmem:[#allocation5 + $0x3e8] sm:$0xff] }
 0x140   : >> { %922 = vrot.lane.b32.xlu1 %v3646_v35, %s2889_s25  ;;  %924 = vrot.lane.b32.xlu0 %v3649_v23, %s2889_s25  ;;  %v1025_v46 = vsel %vm654_vm2, %v1017_v30, %v1021_v39  ;;  %v1022_v6 = vrot.slane %v3668_v56, 2  ;;  %v1029_v45 = vsel %vm654_vm2, %v1021_v39, %v1017_v30  ;;  %v3754_v3 = vmul.f32 %v868_v4, %v822_v63  ;;  %v968_v39 = vld [vmem:[#allocation5 + $0x3d0] sm:$0xff] }
 0x141   : >> { %v3756_v14 = vmul.f32 %v872_v44, %v818_v13  ;;  %v3758_v49 = vmul.f32 %v1082_v28, %v1024_v21  ;;  %v3760_v11 = vmul.f32 %v869_v24, %v823_v42  ;;  %v3762_v25 = vmul.f32 %v873_v53, %v819_v41  ;;  %v973_v44 = vld [vmem:[#allocation5 + $0x3f8] sm:$0xff] }
 0x142   : >> { %v1026_v26 = vsel %vm654_vm2, %v1018_v52, %v1022_v6  ;;  %v1030_v1 = vsel %vm654_vm2, %v1022_v6, %v1018_v52  ;;  %v3764_v22 = vmul.f32 %v870_v61, %v824_v10  ;;  %v3766_v30 = vmul.f32 %v1086_v40, %v1028_v62  ;;  %v972_v52 = vld [vmem:[#allocation5 + $0x3f0] sm:$0xff]  ;;  %v966_v6 = vld [vmem:[#allocation5 + $0x3c0] sm:$0xff]  ;;  %v1088_v24 = vld [vmem:[#allocation5 + $0x4b8] sm:$0xff] }
 0x143   : >> { %v3776_v4 = vmul.f32 %v1081_v55, %v1023_v58  ;;  %v3782_v28 = vmul.f32 %v1087_v36, %v1029_v45  ;;  %v3795_v40 = vmul.f32 %v968_v39, %v3649_v23  ;;  %v1411_v36 = vld [vmem:[#allocation7 + $0x4] ss:$8 sm:$0xf] }
 0x144   : >> { %926 = vrot.lane.b32.xlu1 %v3659_v7, %s2889_s25  ;;  %928 = vrot.lane.b32.xlu0 %v3656_v16, %s2889_s25  ;;  %v991_v39 = vld [vmem:[#allocation5 + $0x400] sm:$0xff] }
 0x145   : >> { %4923 = vst [vmem:[#allocation30_spill] sm:$0xff] %v3776_v4  ;;  %4925 = vst [vmem:[#allocation23_spill] sm:$0xff] %v3782_v28 }
 0x148   : >> { %930 = vrot.lane.b32.xlu1 %v3668_v56, %s2889_s25  ;;  %825 = vrot.lane.b32.xlu0 %v3672_v50, %s2889_s25 }
 0x14c   : >> { %827 = vrot.lane.b32.xlu1 %v3682_v43, %s2889_s25  ;;  %829 = vrot.lane.b32.xlu0 %v822_v63, %s2889_s25  ;;  %v3769_v63 = vmul.f32 %v867_v38, %v3672_v50 }
 0x150   : >> { %831 = vrot.lane.b32.xlu1 %v818_v13, %s2889_s25  ;;  %833 = vrot.lane.b32.xlu0 %v823_v42, %s2889_s25  ;;  %v3772_v13 = vmul.f32 %v871_v60, %v3682_v43  ;;  %v969_v42 = vld [vmem:[#allocation5 + $0x3d8] sm:$0xff]  ;;  %v3789_v43 = vmul.f32 %v967_v47, %v3636_v12  ;;  %v3814_v47 = vmul.f32 %v1088_v24, %v1030_v1  ;;  %v851_v60 = vld [vmem:[#allocation5 + $0x2c8] sm:$0xff]  ;;  %v943_v24 = vld [vmem:[#allocation5 + $0x390] sm:$0xff] }
 0x151   : >> { %v3806_v38 = vmul.f32 %v969_v42, %v3656_v16 }
 0x152   : >> { %4929 = vst [vmem:[#allocation27_spill] sm:$0xff] %v3814_v47 }
 0x154   : >> { %835 = vrot.lane.b32.xlu1 %v819_v41, %s2889_s25  ;;  %837 = vrot.lane.b32.xlu0 %v824_v10, %s2889_s25  ;;  %v970_v41 = vld [vmem:[#allocation5 + $0x3e0] sm:$0xff]  ;;  %v3778_v10 = vmul.f32 %v1085_v27, %v1027_v29 }
 0x155   : >> { %v3809_v61 = vmul.f32 %v970_v41, %v3639_v37  ;;  %v3825_v27 = vld [vmem:[#allocation7 + $0x5] ss:$8 sm:$0xf] }
 0x156   : >> { %4924 = vst [vmem:[#allocation21_spill] sm:$0xff] %v3778_v10  ;;  %4933 = vst [vmem:[#allocation39_spill] sm:$0xff] %v3825_v27  ;;  %v3853_v10 = vrot.slane %v1411_v36, %v3147_v15  ;;  %v947_v37 = vld [vmem:[#allocation5 + $0x3b0] sm:$0xff]  ;;  %v3867_v47 = vrot.slane %v3825_v27, %v3142_v8 }
 0x157   : >> { %4927 = vst [vmem:[#allocation22_spill] sm:$0xff] %v3809_v61  ;;  %v856_v61 = vld [vmem:[#allocation5 + $0x2f0] sm:$0xff] }
 0x158   : >> { %839 = vrot.lane.b32.xlu1 %v820_v31, %s2889_s25  ;;  %1031 = vrot.lane.b32.xlu0 %v1023_v58, %s2889_s25  ;;  %v3792_v58 = vmul.f32 %v971_v18, %v3646_v35  ;;  %4937 = vst [vmem:[#allocation43_spill] sm:$0xff] %v3853_v10  ;;  %4940 = vst [vmem:[#allocation46_spill] sm:$0xff] %v3867_v47 }
 0x15c   : >> { %1033 = vrot.lane.b32.xlu1 %v1027_v29, %s2889_s25  ;;  %1035 = vrot.lane.b32.xlu0 %v1024_v21, %s2889_s25  ;;  %v3774_v21 = vmul.f32 %v874_v57, %v820_v31  ;;  %v1131_v31 = vld [vmem:[#allocation7 + $0x3] ss:$8 sm:$0xf]  ;;  %v3798_v29 = vmul.f32 %v972_v52, %v3659_v7 }
 0x15d   : >> { %v3817_v57 = vrot.slane %v1131_v31, %v3147_v15  ;;  %v3820_v55 = vrot.slane %v1131_v31, %v3142_v8  ;;  %v3840_v41 = vrot.slane %v1131_v31, %v4905_v32 }
 0x15f   : >> { %4930 = vst [vmem:[#allocation24_spill] sm:$0xff] %v3817_v57  ;;  %4931 = vst [vmem:[#allocation26_spill] sm:$0xff] %v3820_v55  ;;  %v855_v55 = vld [vmem:[#allocation5 + $0x2e8] sm:$0xff] }
 0x160   : >> { %1037 = vrot.lane.b32.xlu1 %v1028_v62, %s2889_s25  ;;  %1039 = vrot.lane.b32.xlu0 %v1025_v46, %s2889_s25  ;;  %v3780_v62 = vmul.f32 %v1083_v54, %v1025_v46  ;;  %v3801_v46 = vmul.f32 %v966_v6, %v3631_v20  ;;  %v3812_v54 = vmul.f32 %v973_v44, %v3668_v56  ;;  %v992_v20 = vld [vmem:[#allocation5 + $0x408] sm:$0xff] }
 0x161   : >> { %4935 = vst [vmem:[#allocation41_spill] sm:$0xff] %v3840_v41  ;;  %v3843_v44 = vrot.slane %v1411_v36, %v3142_v8  ;;  %v996_v56 = vld [vmem:[#allocation5 + $0x428] sm:$0xff]  ;;  %v941_v41 = vld [vmem:[#allocation5 + $0x380] sm:$0xff]  ;;  %v993_v8 = vld [vmem:[#allocation5 + $0x410] sm:$0xff] }
 0x162   : >> { %4928 = vst [vmem:[#allocation25_spill] sm:$0xff] %v3812_v54  ;;  %v854_v54 = vld [vmem:[#allocation5 + $0x2e0] sm:$0xff] }
 0x163   : >> { %4936 = vst [vmem:[#allocation42_spill] sm:$0xff] %v3843_v44 }
 0x164   : >> { %1041 = vrot.lane.b32.xlu1 %v1029_v45, %s2889_s25  ;;  %1043 = vrot.lane.b32.xlu0 %v1026_v26, %s2889_s25  ;;  %v3803_v45 = vmul.f32 %v1084_v59, %v1026_v26  ;;  %v3823_v26 = vrot.slane %v1131_v31, %v4902_v48  ;;  %v946_v59 = vld [vmem:[#allocation5 + $0x3a8] sm:$0xff]  ;;  %v3856_v31 = vrot.slane %v1411_v36, %v4902_v48 }
 0x165   : >> { %v893_v48 = vld [vmem:[#allocation5 + $0x348] sm:$0xff] }
 0x166   : >> { %4926 = vst [vmem:[#allocation20_spill] sm:$0xff] %v3803_v45  ;;  %4932 = vst [vmem:[#allocation38_spill] sm:$0xff] %v3823_v26  ;;  %v897_v26 = vld [vmem:[#allocation5 + $0x368] sm:$0xff]  ;;  %v850_v45 = vld [vmem:[#allocation5 + $0x2c0] sm:$0xff] }
 0x167   : >> { %4938 = vst [vmem:[#allocation44_spill] sm:$0xff] %v3856_v31 }
 0x168   : >> { %1045 = vrot.lane.b32.xlu1 %v1030_v1, %s2889_s25  ;;  %v942_v1 = vld [vmem:[#allocation5 + $0x388] sm:$0xff] }
 0x1aa   : >> { %v3740_v9 = vpop.permute.xlu0 %916 }
 0x1ae   : >> { %v3742_v33 = vpop.permute.xlu1 %918  ;;  %v3744_v34 = vpop.permute.xlu0 %920 }
 0x1af   : >> { %v936_v52 = vsel %vm471_vm3, %v3740_v9, %v3744_v34 }
 0x1b0   : >> { %v950_v19 = vmul.f32 %v942_v1, %v936_v52  ;;  %v3872_v31 = vmul.f32 %v991_v39, %v936_v52  ;;  %v852_v52 = vld [vmem:[#allocation5 + $0x2d0] sm:$0xff] }
 0x1b2   : >> { %v3746_v17 = vpop.permute.xlu1 %922  ;;  %v3748_v2 = vpop.permute.xlu0 %924 }
 0x1b3   : >> { %v3831_v18 = vsel %vm471_vm3, %v3742_v33, %v3746_v17  ;;  %v934_v16 = vsel %vm471_vm3, %v3744_v34, %v3748_v2  ;;  %v3863_v34 = vrot.slane %v1411_v36, %v4905_v32 }
 0x1b4   : >> { %4934 = vst [vmem:[#allocation40_spill] sm:$0xff] %v3831_v18  ;;  %v3870_v10 = vmul.f32 %v946_v59, %v3831_v18  ;;  %v3880_v36 = vmul.f32 %v992_v20, %v934_v16 }
 0x1b5   : >> { %4939 = vst [vmem:[#allocation45_spill] sm:$0xff] %v3863_v34  ;;  %v944_v34 = vld [vmem:[#allocation5 + $0x398] sm:$0xff] }
 0x1b6   : >> { %v3750_v51 = vpop.permute.xlu1 %926  ;;  %v3752_v0 = vpop.permute.xlu0 %928 }
 0x1b7   : >> { %v935_v44 = vsel %vm471_vm3, %v3746_v17, %v3750_v51  ;;  %v3876_v17 = vrot.slane %v3825_v27, %v3147_v15  ;;  %v932_v59 = vsel %vm471_vm3, %v3748_v2, %v3752_v0  ;;  %v938_v1 = vsel %vm471_vm3, %v3752_v0, %v3740_v9 }
 0x1b8   : >> { %v3905_v0 = vmul.f32 %v996_v56, %v935_v44  ;;  %v949_v27 = vmul.f32 %v941_v41, %v938_v1  ;;  %v952_v12 = vmul.f32 %v944_v34, %v932_v59  ;;  %v853_v41 = vld [vmem:[#allocation5 + $0x2d8] sm:$0xff] }
 0x1b9   : >> { %4941 = vst [vmem:[#allocation47_spill] sm:$0xff] %v3876_v17  ;;  %v3890_v17 = vmul.f32 %v947_v37, %v935_v44 }
 0x1ba   : >> { %v3784_v53 = vpop.permute.xlu1 %930  ;;  %v3786_v50 = vpop.permute.xlu0 %825 }
 0x1bb   : >> { %v3896_v20 = vsel %vm471_vm3, %v3784_v53, %v3742_v33  ;;  %v3909_v33 = vmul.f32 %v993_v8, %v932_v59  ;;  %v894_v8 = vld [vmem:[#allocation5 + $0x350] sm:$0xff] }
 0x1be   : >> { %v3837_v6 = vpop.permute.xlu1 %827  ;;  %v830_v42 = vpop.permute.xlu0 %829 }
 0x1bf   : >> { %v845_v23 = vsel %vm471_vm3, %v3786_v50, %v830_v42 }
 0x1c0   : >> { %v859_v7 = vmul.f32 %v851_v60, %v845_v23  ;;  %v3878_v60 = vmul.f32 %v943_v24, %v934_v16  ;;  %v945_v24 = vld [vmem:[#allocation5 + $0x3a0] sm:$0xff]  ;;  %v994_v16 = vld [vmem:[#allocation5 + $0x418] sm:$0xff] }
 0x1c1   : >> { %v3916_v56 = vmul.f32 %v945_v24, %v3896_v20 }
 0x1c2   : >> { %v832_v39 = vpop.permute.xlu1 %831  ;;  %v834_v47 = vpop.permute.xlu0 %833  ;;  %v884_v37 = vadd.f32 %v3754_v3, %v859_v7  ;;  %v3918_v7 = vmul.f32 %v994_v16, %v938_v1  ;;  %v892_v3 = vld [vmem:[#allocation5 + $0x340] sm:$0xff] }
 0x1c3   : >> { %v3901_v2 = vsel %vm471_vm3, %v3837_v6, %v832_v39  ;;  %v843_v9 = vsel %vm471_vm3, %v830_v42, %v834_v47  ;;  %v933_v42 = vsel %vm471_vm3, %v3750_v51, %v3784_v53  ;;  %4942 = vst [vmem:[#allocation48_spill] sm:$0xff] %v3916_v56  ;;  %v898_v56 = vld [vmem:[#allocation5 + $0x370] sm:$0xff] }
 0x1c4   : >> { %v863_v15 = vmul.f32 %v855_v55, %v3901_v2  ;;  %v901_v32 = vmul.f32 %v893_v48, %v843_v9  ;;  %v860_v18 = vmul.f32 %v852_v52, %v843_v9  ;;  %v895_v52 = vld [vmem:[#allocation5 + $0x358] sm:$0xff]  ;;  %v900_v9 = vmul.f32 %v892_v3, %v845_v23 }
 0x1c6   : >> { %v909_v48 = vadd.f32 %v901_v32, %v884_v37  ;;  %v836_v55 = vpop.permute.xlu1 %835  ;;  %v838_v44 = vpop.permute.xlu0 %837  ;;  %v888_v34 = vadd.f32 %v3756_v14, %v863_v15  ;;  %v885_v37 = vadd.f32 %v3760_v11, %v860_v18  ;;  %v857_v14 = vld [vmem:[#allocation5 + $0x2f8] sm:$0xff] }
 0x1c7   : >> { %v844_v59 = vsel %vm471_vm3, %v832_v39, %v836_v55  ;;  %v841_v51 = vsel %vm471_vm3, %v834_v47, %v838_v44  ;;  %v847_v53 = vsel %vm471_vm3, %v838_v44, %v3786_v50 }
 0x1c8   : >> { %v958_v1 = vadd.f32 %v950_v19, %v909_v48  ;;  %v864_v24 = vmul.f32 %v856_v61, %v844_v59  ;;  %v905_v32 = vmul.f32 %v897_v26, %v844_v59  ;;  %v858_v16 = vmul.f32 %v850_v45, %v847_v53  ;;  %v948_v19 = vld [vmem:[#allocation5 + $0x3b8] sm:$0xff]  ;;  %v997_v48 = vld [vmem:[#allocation5 + $0x430] sm:$0xff] }
 0x1c9   : >> { %v861_v4 = vmul.f32 %v853_v41, %v841_v51  ;;  %v902_v15 = vmul.f32 %v894_v8, %v841_v51  ;;  %v903_v47 = vmul.f32 %v895_v52, %v847_v53  ;;  %v899_v61 = vld [vmem:[#allocation5 + $0x378] sm:$0xff]  ;;  %v956_v59 = vmul.f32 %v948_v19, %v933_v42 }
 0x1ca   : >> { %v889_v39 = vadd.f32 %v3762_v25, %v864_v24  ;;  %v913_v35 = vadd.f32 %v905_v32, %v888_v34  ;;  %v883_v28 = vadd.f32 %v3769_v63, %v858_v16  ;;  %v840_v57 = vpop.permute.xlu1 %839  ;;  %v3931_v50 = vpop.permute.xlu0 %1031  ;;  %v983_v3 = vadd.f32 %v3789_v43, %v958_v1  ;;  %v998_v41 = vld [vmem:[#allocation5 + $0x438] sm:$0xff]  ;;  %v1057_v34 = vld [vmem:[#allocation5 + $0x448] sm:$0xff]  ;;  %v1058_v16 = vld [vmem:[#allocation5 + $0x450] sm:$0xff] }
 0x1cb   : >> { %v886_v45 = vadd.f32 %v3764_v22, %v861_v4  ;;  %v910_v23 = vadd.f32 %v902_v15, %v885_v37  ;;  %v842_v11 = vsel %vm471_vm3, %v836_v55, %v840_v57  ;;  %v848_v25 = vsel %vm471_vm3, %v840_v57, %v3837_v6  ;;  %v1061_v24 = vld [vmem:[#allocation5 + $0x468] sm:$0xff] }
 0x1cc   : >> { %v962_v63 = vadd.f32 %v3870_v10, %v913_v35  ;;  %v908_v26 = vadd.f32 %v900_v9, %v883_v28  ;;  %v865_v18 = vmul.f32 %v857_v14, %v842_v11  ;;  %v862_v4 = vmul.f32 %v854_v54, %v848_v25  ;;  %v896_v10 = vld [vmem:[#allocation5 + $0x360] sm:$0xff]  ;;  %v1107_v37 = vld [vmem:[#allocation5 + $0x4c8] sm:$0xff] }
 0x1cd   : >> { %v911_v8 = vadd.f32 %v903_v47, %v886_v45  ;;  %v959_v22 = vadd.f32 %v3878_v60, %v910_v23  ;;  %v906_v44 = vmul.f32 %v898_v56, %v842_v11  ;;  %v907_v51 = vmul.f32 %v899_v61, %v848_v25  ;;  %v1062_v23 = vld [vmem:[#allocation5 + $0x470] sm:$0xff]  ;;  %v1111_v61 = vld [vmem:[#allocation5 + $0x4e8] sm:$0xff] }
 0x1ce   : >> { %v957_v55 = vadd.f32 %v949_v27, %v908_v26  ;;  %v890_v52 = vadd.f32 %v3774_v21, %v865_v18  ;;  %v3943_v57 = vpop.permute.xlu1 %1033  ;;  %v1036_v35 = vpop.permute.xlu0 %1035  ;;  %v987_v54 = vadd.f32 %v3792_v58, %v962_v63  ;;  %v1005_v60 = vmul.f32 %v997_v48, %v933_v42  ;;  %v1056_v18 = vld [vmem:[#allocation5 + $0x440] sm:$0xff] }
 0x1cf   : >> { %v960_v28 = vadd.f32 %v952_v12, %v911_v8  ;;  %v914_v6 = vadd.f32 %v906_v44, %v889_v39  ;;  %v3948_v43 = vsel %vm471_vm3, %v3931_v50, %v1036_v35  ;;  %v3952_v56 = vmul.f32 %v998_v41, %v3896_v20 }
 0x1d0   : >> { %v1008_v21 = vadd.f32 %v3880_v36, %v983_v3  ;;  %v1065_v27 = vmul.f32 %v1057_v34, %v3948_v43  ;;  %v887_v53 = vadd.f32 %v3772_v13, %v862_v4  ;;  %v915_v1 = vadd.f32 %v907_v51, %v890_v52  ;;  %v1108_v3 = vld [vmem:[#allocation5 + $0x4d0] sm:$0xff] }
 0x1d1   : >> { %v963_v12 = vadd.f32 %v3890_v17, %v914_v6  ;;  %v984_v32 = vadd.f32 %v3795_v40, %v959_v22  ;;  %v904_v9 = vmul.f32 %v896_v10, %v3901_v2  ;;  %v985_v15 = vadd.f32 %v3806_v38, %v960_v28  ;;  %v4944_v10 = vld [vmem:[#allocation48_spill] sm:$0xff] }
 0x1d2   : >> { %v1073_v58 = vadd.f32 %v1065_v27, %v1008_v21  ;;  %v1038_v42 = vpop.permute.xlu1 %1037  ;;  %v1040_v20 = vpop.permute.xlu0 %1039  ;;  %v982_v36 = vadd.f32 %v3801_v46, %v957_v55  ;;  %v1012_v14 = vadd.f32 %v3905_v0, %v987_v54  ;;  %v964_v19 = vadd.f32 %v956_v59, %v915_v1  ;;  %v1106_v59 = vld [vmem:[#allocation5 + $0x4c0] sm:$0xff]  ;;  %v4943_v55 = vld [vmem:[#allocation24_spill] sm:$0xff] }
 0x1d3   : >> { %v3966_v13 = vsel %vm471_vm3, %v3943_v57, %v1038_v42  ;;  %v1049_v40 = vsel %vm471_vm3, %v1036_v35, %v1040_v20  ;;  %v988_v17 = vadd.f32 %v3798_v29, %v963_v12  ;;  %v1009_v39 = vadd.f32 %v3909_v33, %v984_v32  ;;  %v1059_v29 = vld [vmem:[#allocation5 + $0x458] sm:$0xff] }
 0x1d4   : >> { %v1069_v2 = vmul.f32 %v1061_v24, %v3966_v13  ;;  %v1098_v38 = vadd.f32 %v3758_v49, %v1073_v58  ;;  %v1066_v47 = vmul.f32 %v1058_v16, %v1049_v40  ;;  %v912_v46 = vadd.f32 %v904_v9, %v887_v53  ;;  %v1109_v53 = vld [vmem:[#allocation5 + $0x4d8] sm:$0xff]  ;;  %v4946_v9 = vld [vmem:[#allocation23_spill] sm:$0xff] }
 0x1d5   : >> { %v1115_v0 = vmul.f32 %v1107_v37, %v1049_v40  ;;  %v1013_v45 = vadd.f32 %v1005_v60, %v988_v17  ;;  %v1010_v26 = vadd.f32 %v3918_v7, %v985_v15  ;;  %v1007_v33 = vadd.f32 %v3872_v31, %v982_v36  ;;  %v4945_v60 = vld [vmem:[#allocation25_spill] sm:$0xff]  ;;  %v1063_v24 = vld [vmem:[#allocation5 + $0x478] sm:$0xff]  ;;  %v4949_v36 = vld [vmem:[#allocation30_spill] sm:$0xff] }
 0x1d6   : >> { %v1077_v11 = vadd.f32 %v1069_v2, %v1012_v14  ;;  %v1074_v25 = vadd.f32 %v1066_v47, %v1009_v39  ;;  %v1042_v63 = vpop.permute.xlu1 %1041  ;;  %v1044_v48 = vpop.permute.xlu0 %1043  ;;  %v961_v28 = vadd.f32 %v4944_v10, %v912_v46  ;;  %v989_v21 = vadd.f32 %v4945_v60, %v964_v19  ;;  %v4950_v40 = vld [vmem:[#allocation20_spill] sm:$0xff]  ;;  %v4951_v2 = vld [vmem:[#allocation38_spill] sm:$0xff] }
 0x1d7   : >> { %v1123_v41 = vadd.f32 %v1115_v0, %v1098_v38  ;;  %v1050_v49 = vsel %vm471_vm3, %v1038_v42, %v1042_v63  ;;  %v1047_v8 = vsel %vm471_vm3, %v1040_v20, %v1044_v48  ;;  %v1053_v22 = vsel %vm471_vm3, %v1044_v48, %v3931_v50  ;;  %v1112_v42 = vld [vmem:[#allocation5 + $0x4f0] sm:$0xff]  ;;  %v4953_v0 = vld [vmem:[#allocation40_spill] sm:$0xff] }
 0x1d8   : >> { %v1102_v4 = vadd.f32 %v3766_v30, %v1077_v11  ;;  %v1070_v7 = vmul.f32 %v1062_v23, %v1050_v49  ;;  %v1119_v44 = vmul.f32 %v1111_v61, %v1050_v49  ;;  %v1099_v34 = vadd.f32 %v3780_v62, %v1074_v25  ;;  %v995_v62 = vld [vmem:[#allocation5 + $0x420] sm:$0xff]  ;;  %v4947_v20 = vld [vmem:[#allocation35_spill] sm:$0xff]  ;;  %v1262_v61 = vld [vmem:[#allocation5 + $0x5c8] sm:$0xff] }
 0x1d9   : >> { %v1154_v31 = vadd.f32 %v4943_v55, %v1123_v41  ;;  %v1064_v52 = vmul.f32 %v1056_v18, %v1053_v22  ;;  %v1067_v51 = vmul.f32 %v1059_v29, %v1047_v8  ;;  %v1116_v35 = vmul.f32 %v1108_v3, %v1047_v8  ;;  %v1110_v23 = vld [vmem:[#allocation5 + $0x4e0] sm:$0xff]  ;;  %v4956_v8 = vld [vmem:[#allocation18_spill] sm:$0xff]  ;;  %v1318_v10 = vld [vmem:[#allocation5 + $0x678] sm:$0xff] }
 0x1da   : >> { %v1078_v6 = vadd.f32 %v1070_v7, %v1013_v45  ;;  %v1127_v54 = vadd.f32 %v1119_v44, %v1102_v4  ;;  %v1046_v27 = vpop.permute.xlu1 %1045  ;;  %v1114_v32 = vmul.f32 %v1106_v59, %v3948_v43  ;;  %v1117_v47 = vmul.f32 %v1109_v53, %v1053_v22  ;;  %v4952_v43 = vld [vmem:[#allocation22_spill] sm:$0xff]  ;;  %v4954_v18 = vld [vmem:[#allocation37_spill] sm:$0xff]  ;;  %v4957_v22 = vld [vmem:[#allocation39_spill] sm:$0xff] }
 0x1db   : >> { %v1162_v50 = vmax.f32 %v1154_v31, 0.0  ;;  %v1072_v30 = vadd.f32 %v1064_v52, %v1007_v33  ;;  %v1075_v1 = vadd.f32 %v1067_v51, %v1010_v26  ;;  %v1124_v12 = vadd.f32 %v1116_v35, %v1099_v34  ;;  %v1060_v33 = vld [vmem:[#allocation5 + $0x460] sm:$0xff]  ;;  %v1314_v34 = vld [vmem:[#allocation5 + $0x658] sm:$0xff] }
 0x1dc   : >> { %v1158_v16 = vadd.f32 %v4943_v55, %v1127_v54  ;;  %v1103_v58 = vadd.f32 %v4946_v9, %v1078_v6  ;;  %v1048_v37 = vsel %vm471_vm3, %v1042_v63, %v1046_v27  ;;  %v986_v46 = vadd.f32 %v4952_v43, %v961_v28  ;;  %v1286_v41 = vld [vmem:[#allocation5 + $0x600] sm:$0xff]  ;;  %v1266_v55 = vld [vmem:[#allocation5 + $0x5e8] sm:$0xff]  ;;  %v1113_v52 = vld [vmem:[#allocation5 + $0x4f8] sm:$0xff] }
 0x1dd   : >> { %v3994_v15 = vadd.f32 %v1162_v50, %v4947_v20  ;;  %v1097_v14 = vadd.f32 %v4949_v36, %v1072_v30  ;;  %v1100_v17 = vadd.f32 %v4950_v40, %v1075_v1  ;;  %v1155_v39 = vadd.f32 %v4951_v2, %v1124_v12  ;;  %v1290_v35 = vld [vmem:[#allocation5 + $0x620] sm:$0xff]  ;;  %v4961_v28 = vld [vmem:[#allocation26_spill] sm:$0xff]  ;;  %v1239_v30 = vld [vmem:[#allocation5 + $0x598] sm:$0xff] }
 0x1de   : >> { %v1166_v38 = vmax.f32 %v1158_v16, 0.0  ;;  %v1071_v19 = vmul.f32 %v1063_v24, %v1048_v37  ;;  %v1003_v45 = vmul.f32 %v995_v62, %v4953_v0  ;;  %v1014_v11 = vadd.f32 %v3952_v56, %v989_v21  ;;  %v4959_v56 = vld [vmem:[#allocation19_spill] sm:$0xff]  ;;  %v4962_v54 = vld [vmem:[#allocation41_spill] sm:$0xff]  ;;  %v1195_v50 = vld [vmem:[#allocation5 + $0x508] sm:$0xff] }
 0x1df   : >> { %4948 = vst [vmem:[#allocation24_spill] sm:$0xff] %v3994_v15  ;;  %v1054_v25 = vsel %vm471_vm3, %v1046_v27, %v3943_v57  ;;  %v1120_v63 = vmul.f32 %v1112_v42, %v1048_v37  ;;  %v1177_v26 = vrot.slane %v3994_v15, 4  ;;  %v1122_v3 = vadd.f32 %v1114_v32, %v1097_v14  ;;  %v1211_v53 = vld [vmem:[#allocation5 + $0x540] sm:$0xff]  ;;  %v4964_v62 = vld [vmem:[#allocation27_spill] sm:$0xff]  ;;  %v1337_v9 = vld [vmem:[#allocation5 + $0x688] sm:$0xff] }
 0x1e0   : >> { %v4007_v29 = vadd.f32 %v1166_v38, %v4954_v18  ;;  %v1125_v48 = vadd.f32 %v1117_v47, %v1100_v17  ;;  %v1163_v49 = vmax.f32 %v1155_v39, 0.0  ;;  %v4011_v4 = vrot.slane %v4957_v22, %v4956_v8  ;;  %v1361_v42 = vld [vmem:[#allocation5 + $0x6c0] sm:$0xff]  ;;  %v1263_v37 = vld [vmem:[#allocation5 + $0x5d0] sm:$0xff]  ;;  %v4965_v20 = vld [vmem:[#allocation34_spill] sm:$0xff] }
 0x1e1   : >> { %v4015_v7 = vrot.slane %v4957_v22, %v4959_v56  ;;  %v1079_v57 = vadd.f32 %v1071_v19, %v1014_v11  ;;  %v4018_v44 = vmul.f32 %v1110_v23, %v3966_v13  ;;  %v4021_v59 = vmul.f32 %v1262_v61, %v3994_v15  ;;  %v1287_v39 = vld [vmem:[#allocation5 + $0x608] sm:$0xff]  ;;  %v1311_v38 = vld [vmem:[#allocation5 + $0x640] sm:$0xff]  ;;  %v1243_v23 = vld [vmem:[#allocation5 + $0x5b8] sm:$0xff] }
 0x1e2   : >> { %4955 = vst [vmem:[#allocation48_spill] sm:$0xff] %v4007_v29  ;;  %4958 = vst [vmem:[#allocation25_spill] sm:$0xff] %v4011_v4  ;;  %v1181_v31 = vrot.slane %v4007_v29, 4  ;;  %v1011_v51 = vadd.f32 %v1003_v45, %v986_v46  ;;  %v1153_v6 = vadd.f32 %v4961_v28, %v1122_v3  ;;  %v1156_v60 = vadd.f32 %v4962_v54, %v1125_v48  ;;  %v1199_v46 = vld [vmem:[#allocation5 + $0x528] sm:$0xff]  ;;  %v1215_v45 = vld [vmem:[#allocation5 + $0x560] sm:$0xff] }
 0x1e3   : >> { %4960 = vst [vmem:[#allocation23_spill] sm:$0xff] %v4015_v7  ;;  %v1068_v21 = vmul.f32 %v1060_v33, %v1054_v25  ;;  %v1128_v27 = vadd.f32 %v1120_v63, %v1103_v58  ;;  %v4027_v13 = vmul.f32 %v1286_v41, %v3994_v15  ;;  %v1104_v32 = vadd.f32 %v4964_v62, %v1079_v57  ;;  %v1341_v61 = vld [vmem:[#allocation5 + $0x6a8] sm:$0xff]  ;;  %v4969_v3 = vld [vmem:[#allocation36_spill] sm:$0xff]  ;;  %v1365_v33 = vld [vmem:[#allocation5 + $0x6e0] sm:$0xff] }
 0x1e4   : >> { %v1185_v12 = vsel %vm285_vm0, %v1177_v26, %v1181_v31  ;;  %v1189_v24 = vsel %vm285_vm0, %v1181_v31, %v1177_v26  ;;  %v4035_v16 = vmul.f32 %v1314_v34, %v3994_v15  ;;  %v4038_v58 = vmul.f32 %v1266_v55, %v4007_v29  ;;  %v1389_v41 = vld [vmem:[#allocation5 + $0x718] sm:$0xff]  ;;  %v4971_v22 = vld [vmem:[#allocation31_spill] sm:$0xff]  ;;  %v1261_v31 = vld [vmem:[#allocation5 + $0x5c0] sm:$0xff] }
 0x1e5   : >> { %v4041_v36 = vadd.f32 %v1163_v49, %v4965_v20  ;;  %v1121_v14 = vmul.f32 %v1113_v52, %v1054_v25  ;;  %v4044_v40 = vmul.f32 %v1290_v35, %v4007_v29  ;;  %v4047_v17 = vmul.f32 %v1318_v10, %v4007_v29  ;;  %v1393_v49 = vld [vmem:[#allocation5 + $0x738] sm:$0xff]  ;;  %v1194_v4 = vld [vmem:[#allocation5 + $0x500] sm:$0xff] }
 0x1e6   : >> { %v1161_v47 = vmax.f32 %v1153_v6, 0.0  ;;  %v1164_v43 = vmax.f32 %v1156_v60, 0.0  ;;  %v4049_v19 = vmul.f32 %v1195_v50, %v1189_v24  ;;  %v4051_v0 = vmul.f32 %v1211_v53, %v1189_v24  ;;  %v1264_v52 = vld [vmem:[#allocation5 + $0x5d8] sm:$0xff] }
 0x1e7   : >> { %4966 = vst [vmem:[#allocation35_spill] sm:$0xff] %v4041_v36  ;;  %v1076_v11 = vadd.f32 %v1068_v21, %v1011_v51  ;;  %v1159_v25 = vadd.f32 %v4951_v2, %v1128_v27  ;;  %v4054_v63 = vmul.f32 %v1239_v30, %v1189_v24  ;;  %v4056_v26 = vmul.f32 %v1337_v9, %v1185_v12  ;;  %v1288_v51 = vld [vmem:[#allocation5 + $0x610] sm:$0xff]  ;;  %v1289_v21 = vld [vmem:[#allocation5 + $0x618] sm:$0xff]  ;;  %v1312_v27 = vld [vmem:[#allocation5 + $0x648] sm:$0xff] }
 0x1e8   : >> { %v4058_v18 = vmul.f32 %v1361_v42, %v1185_v12  ;;  %v4061_v48 = vadd.f32 %v1164_v43, %v4969_v3  ;;  %v4064_v57 = vadd.f32 %v1161_v47, %v4971_v22  ;;  %v1178_v34 = vrot.slane %v4041_v36, 4  ;;  %v1313_v9 = vld [vmem:[#allocation5 + $0x650] sm:$0xff] }
 0x1e9   : >> { %4967 = vst [vmem:[#allocation30_spill] sm:$0xff] %v4056_v26  ;;  %v4068_v55 = vmul.f32 %v1263_v37, %v4041_v36  ;;  %v4071_v2 = vmul.f32 %v1287_v39, %v4041_v36  ;;  %v4074_v35 = vmul.f32 %v1311_v38, %v4041_v36  ;;  %v4076_v10 = vmul.f32 %v1199_v46, %v1185_v12  ;;  %v4977_v37 = vld [vmem:[#allocation21_spill] sm:$0xff]  ;;  %v1196_v22 = vld [vmem:[#allocation5 + $0x510] sm:$0xff] }
 0x1ea   : >> { %4968 = vst [vmem:[#allocation20_spill] sm:$0xff] %v4058_v18  ;;  %4970 = vst [vmem:[#allocation38_spill] sm:$0xff] %v4061_v48  ;;  %v4078_v6 = vmul.f32 %v1215_v45, %v1185_v12  ;;  %v4080_v60 = vmul.f32 %v1243_v23, %v1185_v12  ;;  %v4082_v50 = vmul.f32 %v1341_v61, %v1189_v24  ;;  %v1167_v38 = vmax.f32 %v1159_v25, 0.0  ;;  %v1955_v47 = vld [vmem:[#allocation7 + $0x6] ss:$8 sm:$0xf] }
 0x1eb   : >> { %4972 = vst [vmem:[#allocation22_spill] sm:$0xff] %v4064_v57  ;;  %v4084_v53 = vmul.f32 %v1365_v33, %v1189_v24  ;;  %v4086_v30 = vmul.f32 %v1389_v41, %v1185_v12  ;;  %v4088_v62 = vmul.f32 %v1393_v49, %v1189_v24  ;;  %v1101_v20 = vadd.f32 %v4977_v37, %v1076_v11  ;;  %v1267_v24 = vld [vmem:[#allocation5 + $0x5f0] sm:$0xff]  ;;  %v1291_v61 = vld [vmem:[#allocation5 + $0x628] sm:$0xff]  ;;  %v1315_v11 = vld [vmem:[#allocation5 + $0x660] sm:$0xff] }
 0x1ec   : >> { %4973 = vst [vmem:[#allocation40_spill] sm:$0xff] %v4082_v50  ;;  %v1129_v39 = vadd.f32 %v1121_v14, %v1104_v32  ;;  %v4094_v46 = vmul.f32 %v1261_v31, %v4064_v57  ;;  %v4097_v45 = vmul.f32 %v1264_v52, %v4061_v48  ;;  %v4100_v12 = vmul.f32 %v1288_v51, %v4061_v48  ;;  %v4978_v25 = vld [vmem:[#allocation32_spill] sm:$0xff]  ;;  %v4980_v31 = vld [vmem:[#allocation17_spill] sm:$0xff] }
 0x1ed   : >> { %4974 = vst [vmem:[#allocation37_spill] sm:$0xff] %v4084_v53  ;;  %4975 = vst [vmem:[#allocation39_spill] sm:$0xff] %v4086_v30  ;;  %v4103_v23 = vmul.f32 %v1289_v21, %v4064_v57  ;;  %v1126_v32 = vadd.f32 %v4018_v44, %v1101_v20  ;;  %v4108_v3 = vadd.f32 %v1167_v38, %v4978_v25  ;;  %v2219_v33 = vld [vmem:[#allocation7 + $0x7] ss:$8 sm:$0xf] }
 0x1ee   : >> { %4976 = vst [vmem:[#allocation26_spill] sm:$0xff] %v4088_v62  ;;  %v1160_v14 = vadd.f32 %v4962_v54, %v1129_v39  ;;  %v4111_v41 = vmul.f32 %v1312_v27, %v4061_v48  ;;  %v4114_v49 = vmul.f32 %v1313_v9, %v4064_v57  ;;  %v4117_v52 = vrot.slane %v1955_v47, %v4980_v31  ;;  %v1200_v44 = vld [vmem:[#allocation5 + $0x530] sm:$0xff]  ;;  %v1212_v21 = vld [vmem:[#allocation5 + $0x548] sm:$0xff]  ;;  %v1236_v9 = vld [vmem:[#allocation5 + $0x580] sm:$0xff] }
 0x1ef   : >> { %4979 = vst [vmem:[#allocation41_spill] sm:$0xff] %v4108_v3  ;;  %v4120_v51 = vrot.slane %v1955_v47, %v4956_v8  ;;  %v1216_v54 = vld [vmem:[#allocation5 + $0x568] sm:$0xff]  ;;  %v1157_v37 = vadd.f32 %v4961_v28, %v1126_v32  ;;  %v1182_v39 = vrot.slane %v4108_v3, 4  ;;  %v4125_v27 = vrot.slane %v1955_v47, %v4959_v56  ;;  %v1240_v38 = vld [vmem:[#allocation5 + $0x5a0] sm:$0xff]  ;;  %v1268_v28 = vld [vmem:[#allocation5 + $0x5f8] sm:$0xff] }
 0x1f0   : >> { %4981 = vst [vmem:[#allocation27_spill] sm:$0xff] %v4117_v52  ;;  %v1168_v20 = vmax.f32 %v1160_v14, 0.0  ;;  %v4128_v25 = vmul.f32 %v1267_v24, %v4108_v3  ;;  %v4131_v43 = vmul.f32 %v1291_v61, %v4108_v3  ;;  %v4134_v42 = vmul.f32 %v1315_v11, %v4108_v3  ;;  %v1292_v32 = vld [vmem:[#allocation5 + $0x630] sm:$0xff]  ;;  %v4985_v8 = vld [vmem:[#allocation29_spill] sm:$0xff]  ;;  %v1197_v61 = vld [vmem:[#allocation5 + $0x518] sm:$0xff] }
 0x1f1   : >> { %4982 = vst [vmem:[#allocation34_spill] sm:$0xff] %v4120_v51  ;;  %4983 = vst [vmem:[#allocation36_spill] sm:$0xff] %v4125_v27  ;;  %v4137_v5 = vrot.slane %v2219_v33, %v4980_v31  ;;  %v1165_v14 = vmax.f32 %v1157_v37, 0.0  ;;  %v4144_v56 = vsel %vm285_vm0, %v1178_v34, %v1182_v39  ;;  %v4148_v24 = vsel %vm285_vm0, %v1182_v39, %v1178_v34  ;;  %v1265_v11 = vld [vmem:[#allocation5 + $0x5e0] sm:$0xff]  ;;  %v1241_v3 = vld [vmem:[#allocation5 + $0x5a8] sm:$0xff] }
 0x1f2   : >> { %v4140_v47 = vadd.f32 %v1168_v20, %v4985_v8  ;;  %4986 = vst [vmem:[#allocation21_spill] sm:$0xff] %v4148_v24  ;;  %v1204_v51 = vmul.f32 %v1196_v22, %v4148_v24  ;;  %v1208_v33 = vmul.f32 %v1200_v44, %v4144_v56  ;;  %v1220_v31 = vmul.f32 %v1212_v21, %v4148_v24  ;;  %v1201_v8 = vld [vmem:[#allocation5 + $0x538] sm:$0xff]  ;;  %v1213_v20 = vld [vmem:[#allocation5 + $0x550] sm:$0xff]  ;;  %v4987_v52 = vld [vmem:[#allocation33_spill] sm:$0xff] }
 0x1f3   : >> { %4984 = vst [vmem:[#allocation31_spill] sm:$0xff] %v4137_v5  ;;  %v1224_v37 = vmul.f32 %v1216_v54, %v4144_v56  ;;  %v1217_v5 = vld [vmem:[#allocation5 + $0x570] sm:$0xff]  ;;  %v4155_v27 = vadd.f32 %v1165_v14, %v4987_v52  ;;  %v1244_v34 = vmul.f32 %v1236_v9, %v4148_v24  ;;  %v1248_v39 = vmul.f32 %v1240_v38, %v4144_v56  ;;  %v1237_v22 = vld [vmem:[#allocation5 + $0x588] sm:$0xff]  ;;  %v1198_v36 = vld [vmem:[#allocation5 + $0x520] sm:$0xff] }
 0x1f4   : >> { %v1183_v7 = vrot.slane %v4140_v47, 4  ;;  %v1228_v44 = vadd.f32 %v1220_v31, %v4049_v19  ;;  %v1276_v54 = vmul.f32 %v1268_v28, %v4140_v47  ;;  %v1300_v29 = vmul.f32 %v1292_v32, %v4140_v47  ;;  %v1214_v52 = vld [vmem:[#allocation5 + $0x558] sm:$0xff]  ;;  %v1238_v28 = vld [vmem:[#allocation5 + $0x590] sm:$0xff] }
 0x1f5   : >> { %v1232_v21 = vadd.f32 %v1224_v37, %v4076_v10  ;;  %v1218_v14 = vld [vmem:[#allocation5 + $0x578] sm:$0xff]  ;;  %v1184_v15 = vrot.slane %v4155_v27, 4  ;;  %v4988_v9 = vrot.slane %v4061_v48, 4  ;;  %v1273_v10 = vmul.f32 %v1265_v11, %v4155_v27  ;;  %v1242_v32 = vld [vmem:[#allocation5 + $0x5b0] sm:$0xff] }
 0x1f6   : >> { %v1293_v24 = vld [vmem:[#allocation5 + $0x638] sm:$0xff] }
 0x1f7   : >> { %v4169_v38 = vsel %vm285_vm0, %v4988_v9, %v1183_v7  ;;  %v4989_v62 = vmov %v4988_v9  ;;  %v4991_v9 = vrot.slane %v4064_v57, 4 }
 0x1f8   : >> { %v4175_v19 = vsel %vm285_vm0, %v1183_v7, %v4989_v62  ;;  %v1209_v37 = vmul.f32 %v1201_v8, %v4169_v38  ;;  %v1225_v53 = vmul.f32 %v1217_v5, %v4169_v38  ;;  %v1249_v11 = vmul.f32 %v1241_v3, %v4169_v38 }
 0x1f9   : >> { %4990 = vst [vmem:[#allocation32_spill] sm:$0xff] %v4175_v19  ;;  %v1205_v31 = vmul.f32 %v1197_v61, %v4175_v19  ;;  %v1221_v30 = vmul.f32 %v1213_v20, %v4175_v19  ;;  %v4186_v48 = vsel %vm285_vm0, %v4991_v9, %v1184_v15  ;;  %v4992_v7 = vmov %v4991_v9 }
 0x1fa   : >> { %v4192_v62 = vsel %vm285_vm0, %v1184_v15, %v4992_v7  ;;  %v1245_v61 = vmul.f32 %v1237_v22, %v4175_v19  ;;  %v1206_v5 = vmul.f32 %v1198_v36, %v4186_v48  ;;  %v1226_v18 = vmul.f32 %v1218_v14, %v4186_v48 }
 0x1fb   : >> { %v1202_v8 = vmul.f32 %v1194_v4, %v4192_v62  ;;  %v1222_v20 = vmul.f32 %v1214_v52, %v4192_v62  ;;  %v1229_v9 = vadd.f32 %v1221_v30, %v1204_v51  ;;  %v1233_v50 = vadd.f32 %v1225_v53, %v1208_v33 }
 0x1fc   : >> { %v1246_v57 = vmul.f32 %v1238_v28, %v4192_v62  ;;  %v1250_v1 = vmul.f32 %v1242_v32, %v4186_v48  ;;  %v1231_v22 = vadd.f32 %v4078_v6, %v1206_v5  ;;  %v1234_v3 = vadd.f32 %v1226_v18, %v1209_v37  ;;  %v1316_v18 = vld [vmem:[#allocation5 + $0x668] sm:$0xff] }
 0x1fd   : >> { %v1227_v15 = vadd.f32 %v4051_v0, %v1202_v8  ;;  %v1230_v7 = vadd.f32 %v1222_v20, %v1205_v31  ;;  %v1253_v26 = vadd.f32 %v1245_v61, %v1228_v44  ;;  %v1257_v19 = vadd.f32 %v1249_v11, %v1232_v21  ;;  %v1317_v44 = vld [vmem:[#allocation5 + $0x670] sm:$0xff]  ;;  %v1362_v61 = vld [vmem:[#allocation5 + $0x6c8] sm:$0xff]  ;;  %v1364_v8 = vld [vmem:[#allocation5 + $0x6d8] sm:$0xff] }
 0x1fe   : >> { %v1254_v4 = vadd.f32 %v1246_v57, %v1229_v9  ;;  %v1258_v36 = vadd.f32 %v1250_v1, %v1233_v50  ;;  %v1256_v30 = vadd.f32 %v1248_v39, %v1231_v22  ;;  %v1259_v53 = vadd.f32 %v4080_v60, %v1234_v3  ;;  %v1363_v11 = vld [vmem:[#allocation5 + $0x6d0] sm:$0xff] }
 0x1ff   : >> { %v1252_v52 = vadd.f32 %v1244_v34, %v1227_v15  ;;  %v1255_v14 = vadd.f32 %v4054_v63, %v1230_v7  ;;  %v1278_v51 = vadd.f32 %v4021_v59, %v1253_v26  ;;  %v1282_v0 = vadd.f32 %v4038_v58, %v1257_v19  ;;  %v1338_v58 = vld [vmem:[#allocation5 + $0x690] sm:$0xff]  ;;  %v1340_v19 = vld [vmem:[#allocation5 + $0x6a0] sm:$0xff] }
 0x200   : >> { %v1279_v33 = vadd.f32 %v4068_v55, %v1254_v4  ;;  %v1283_v6 = vadd.f32 %v4128_v25, %v1258_v36  ;;  %v1281_v50 = vadd.f32 %v1273_v10, %v1256_v30  ;;  %v1284_v34 = vadd.f32 %v1276_v54, %v1259_v53  ;;  %v1336_v55 = vld [vmem:[#allocation5 + $0x680] sm:$0xff]  ;;  %v1342_v54 = vld [vmem:[#allocation5 + $0x6b0] sm:$0xff]  ;;  %v4994_v15 = vld [vmem:[#allocation32_spill] sm:$0xff] }
 0x201   : >> { %v1277_v57 = vadd.f32 %v4094_v46, %v1252_v52  ;;  %v1280_v1 = vadd.f32 %v4097_v45, %v1255_v14  ;;  %v1301_v63 = vmul.f32 %v1293_v24, %v4155_v27  ;;  %v1303_v60 = vadd.f32 %v4071_v2, %v1278_v51  ;;  %v1339_v45 = vld [vmem:[#allocation5 + $0x698] sm:$0xff]  ;;  %v1367_v9 = vld [vmem:[#allocation5 + $0x6f0] sm:$0xff]  ;;  %v1386_v51 = vld [vmem:[#allocation5 + $0x700] sm:$0xff] }
 0x202   : >> { %v1304_v59 = vadd.f32 %v4100_v12, %v1279_v33  ;;  %v1307_v26 = vadd.f32 %v4131_v43, %v1282_v0  ;;  %v1306_v46 = vadd.f32 %v4044_v40, %v1281_v50  ;;  %v1308_v21 = vadd.f32 %v1300_v29, %v1283_v6  ;;  %v1343_v43 = vld [vmem:[#allocation5 + $0x6b8] sm:$0xff]  ;;  %v1387_v33 = vld [vmem:[#allocation5 + $0x708] sm:$0xff] }
 0x203   : >> { %v1302_v25 = vadd.f32 %v4027_v13, %v1277_v57  ;;  %v1305_v39 = vadd.f32 %v4103_v23, %v1280_v1  ;;  %v1309_v10 = vadd.f32 %v1301_v63, %v1284_v34  ;;  %v1324_v24 = vmul.f32 %v1316_v18, %v4140_v47  ;;  %v4996_v4 = vld [vmem:[#allocation40_spill] sm:$0xff]  ;;  %v1388_v57 = vld [vmem:[#allocation5 + $0x710] sm:$0xff]  ;;  %v1390_v1 = vld [vmem:[#allocation5 + $0x720] sm:$0xff] }
 0x204   : >> { %v1325_v2 = vmul.f32 %v1317_v44, %v4155_v27  ;;  %v1328_v12 = vadd.f32 %v4111_v41, %v1303_v60  ;;  %v1329_v13 = vadd.f32 %v4114_v49, %v1304_v59  ;;  %v1331_v40 = vadd.f32 %v4134_v42, %v1306_v46  ;;  %v4993_v49 = vld [vmem:[#allocation21_spill] sm:$0xff]  ;;  %v1368_v42 = vld [vmem:[#allocation5 + $0x6f8] sm:$0xff]  ;;  %v1391_v50 = vld [vmem:[#allocation5 + $0x728] sm:$0xff] }
 0x205   : >> { %v1327_v28 = vadd.f32 %v4074_v35, %v1302_v25  ;;  %v1330_v23 = vadd.f32 %v4035_v16, %v1305_v39  ;;  %v1332_v29 = vadd.f32 %v1324_v24, %v1307_v26  ;;  %v1334_v31 = vadd.f32 %v4047_v17, %v1309_v10  ;;  %v1366_v16 = vld [vmem:[#allocation5 + $0x6e8] sm:$0xff]  ;;  %v4997_v59 = vld [vmem:[#allocation20_spill] sm:$0xff]  ;;  %v4998_v46 = vld [vmem:[#allocation37_spill] sm:$0xff] }
 0x206   : >> { %v1333_v32 = vadd.f32 %v1325_v2, %v1308_v21  ;;  %v1344_v37 = vmul.f32 %v1336_v55, %v4186_v48  ;;  %v1346_v41 = vmul.f32 %v1338_v58, %v4144_v56  ;;  %v1347_v5 = vmul.f32 %v1339_v45, %v4169_v38  ;;  %v4995_v17 = vld [vmem:[#allocation30_spill] sm:$0xff]  ;;  %v1392_v55 = vld [vmem:[#allocation5 + $0x730] sm:$0xff] }
 0x207   : >> { %v1348_v35 = vmul.f32 %v1340_v19, %v4192_v62  ;;  %v1350_v20 = vmul.f32 %v1342_v54, %v4993_v49  ;;  %v1351_v7 = vmul.f32 %v1343_v43, %v4994_v15  ;;  %v1353_v3 = vadd.f32 %v4995_v17, %v1328_v12 }
 0x208   : >> { %v1352_v22 = vadd.f32 %v1344_v37, %v1327_v28  ;;  %v1357_v36 = vadd.f32 %v4996_v4, %v1332_v29  ;;  %v1354_v52 = vadd.f32 %v1346_v41, %v1329_v13  ;;  %v1355_v14 = vadd.f32 %v1347_v5, %v1330_v23  ;;  %v4999_v23 = vld [vmem:[#allocation39_spill] sm:$0xff]  ;;  %v5000_v29 = vld [vmem:[#allocation26_spill] sm:$0xff]  ;;  %v5002_v41 = vld [vmem:[#allocation45_spill] sm:$0xff] }
 0x209   : >> { %v1356_v30 = vadd.f32 %v1348_v35, %v1331_v40  ;;  %v1358_v53 = vadd.f32 %v1350_v20, %v1333_v32  ;;  %v1359_v0 = vadd.f32 %v1351_v7, %v1334_v31  ;;  %v1370_v6 = vmul.f32 %v1362_v61, %v4144_v56  ;;  %v5003_v35 = vld [vmem:[#allocation43_spill] sm:$0xff]  ;;  %v5004_v20 = vld [vmem:[#allocation44_spill] sm:$0xff] }
 0x20a   : >> { %v1371_v18 = vmul.f32 %v1363_v11, %v4169_v38  ;;  %v1372_v44 = vmul.f32 %v1364_v8, %v4186_v48  ;;  %v1374_v34 = vmul.f32 %v1366_v16, %v4993_v49  ;;  %v1375_v63 = vmul.f32 %v1367_v9, %v4994_v15  ;;  %v5001_v8 = vld [vmem:[#allocation42_spill] sm:$0xff] }
 0x20b   : >> { %v1376_v60 = vmul.f32 %v1368_v42, %v4192_v62  ;;  %v1377_v26 = vadd.f32 %v4997_v59, %v1352_v22  ;;  %v1378_v58 = vadd.f32 %v1370_v6, %v1353_v3  ;;  %v1381_v21 = vadd.f32 %v4998_v46, %v1356_v30  ;;  %v5007_v6 = vld [vmem:[#allocation24_spill] sm:$0xff]  ;;  %v1476_v59 = vld [vmem:[#allocation5 + $0x750] sm:$0xff]  ;;  %v1478_v46 = vld [vmem:[#allocation5 + $0x760] sm:$0xff] }
 0x20c   : >> { %v1379_v25 = vadd.f32 %v1371_v18, %v1354_v52  ;;  %v1380_v39 = vadd.f32 %v1372_v44, %v1355_v14  ;;  %v1382_v45 = vadd.f32 %v1374_v34, %v1357_v36  ;;  %v1383_v19 = vadd.f32 %v1375_v63, %v1358_v53  ;;  %v5005_v14 = vld [vmem:[#allocation22_spill] sm:$0xff]  ;;  %v5008_v44 = vld [vmem:[#allocation35_spill] sm:$0xff]  ;;  %v1474_v63 = vld [vmem:[#allocation5 + $0x740] sm:$0xff] }
 0x20d   : >> { %v1384_v54 = vadd.f32 %v1376_v60, %v1359_v0  ;;  %v1394_v10 = vmul.f32 %v1386_v51, %v4144_v56  ;;  %v1395_v24 = vmul.f32 %v1387_v33, %v4169_v38  ;;  %v1396_v2 = vmul.f32 %v1388_v57, %v4186_v48  ;;  %v5006_v53 = vld [vmem:[#allocation38_spill] sm:$0xff]  ;;  %v1541_v0 = vld [vmem:[#allocation5 + $0x800] sm:$0xff] }
 0x20e   : >> { %v1398_v12 = vmul.f32 %v1390_v1, %v4993_v49  ;;  %v1399_v43 = vmul.f32 %v1391_v50, %v4994_v15  ;;  %v1400_v28 = vmul.f32 %v1392_v55, %v4192_v62  ;;  %v1405_v40 = vadd.f32 %v4999_v23, %v1380_v39  ;;  %v5009_v50 = vld [vmem:[#allocation48_spill] sm:$0xff]  ;;  %v1475_v60 = vld [vmem:[#allocation5 + $0x748] sm:$0xff]  ;;  %v1491_v23 = vld [vmem:[#allocation5 + $0x780] sm:$0xff] }
 0x20f   : >> { %v1402_v13 = vadd.f32 %v1394_v10, %v1377_v26  ;;  %v1409_v32 = vadd.f32 %v5000_v29, %v1384_v54  ;;  %v1403_v31 = vadd.f32 %v1395_v24, %v1378_v58  ;;  %v1404_v37 = vadd.f32 %v1396_v2, %v1379_v25  ;;  %v5010_v26 = vld [vmem:[#allocation41_spill] sm:$0xff]  ;;  %v1477_v39 = vld [vmem:[#allocation5 + $0x758] sm:$0xff]  ;;  %v1479_v54 = vld [vmem:[#allocation5 + $0x768] sm:$0xff] }
 0x210   : >> { %v1406_v61 = vadd.f32 %v1398_v12, %v1381_v21  ;;  %v1407_v11 = vadd.f32 %v1399_v43, %v1382_v45  ;;  %v1408_v56 = vadd.f32 %v1400_v28, %v1383_v19  ;;  %v1436_v48 = vadd.f32 %v5002_v41, %v1405_v40  ;;  %v1480_v10 = vld [vmem:[#allocation5 + $0x770] sm:$0xff]  ;;  %v1481_v24 = vld [vmem:[#allocation5 + $0x778] sm:$0xff]  ;;  %v1492_v40 = vld [vmem:[#allocation5 + $0x788] sm:$0xff] }
 0x211   : >> { %v1433_v38 = vadd.f32 %v5001_v8, %v1402_v13  ;;  %v1440_v5 = vadd.f32 %v5002_v41, %v1409_v32  ;;  %v1434_v49 = vadd.f32 %v5003_v35, %v1403_v31  ;;  %v1435_v62 = vadd.f32 %v5004_v20, %v1404_v37  ;;  %v5011_v12 = vld [vmem:[#allocation15_spill] sm:$0xff] }
 0x212   : >> { %v1437_v16 = vadd.f32 %v5001_v8, %v1406_v61  ;;  %v1438_v9 = vadd.f32 %v5003_v35, %v1407_v11  ;;  %v1439_v42 = vadd.f32 %v5004_v20, %v1408_v56  ;;  %v1444_v7 = vmax.f32 %v1436_v48, 0.0  ;;  %v1493_v29 = vld [vmem:[#allocation5 + $0x790] sm:$0xff]  ;;  %v1494_v11 = vld [vmem:[#allocation5 + $0x798] sm:$0xff]  ;;  %v1495_v56 = vld [vmem:[#allocation5 + $0x7a0] sm:$0xff] }
 0x213   : >> { %v1441_v15 = vmax.f32 %v1433_v38, 0.0  ;;  %v1448_v22 = vmax.f32 %v1440_v5, 0.0  ;;  %v1442_v17 = vmax.f32 %v1434_v49, 0.0  ;;  %v1443_v3 = vmax.f32 %v1435_v62, 0.0  ;;  %v1496_v8 = vld [vmem:[#allocation5 + $0x7a8] sm:$0xff]  ;;  %v1497_v35 = vld [vmem:[#allocation5 + $0x7b0] sm:$0xff] }
 0x214   : >> { %v1445_v4 = vmax.f32 %v1437_v16, 0.0  ;;  %v1446_v36 = vmax.f32 %v1438_v9, 0.0  ;;  %v1447_v52 = vmax.f32 %v1439_v42, 0.0  ;;  %v4263_v51 = vadd.f32 %v1444_v7, %v5006_v53  ;;  %v1498_v49 = vld [vmem:[#allocation5 + $0x7b8] sm:$0xff] }
 0x215   : >> { %v4260_v30 = vadd.f32 %v1441_v15, %v5005_v14  ;;  %v4266_v33 = vadd.f32 %v1448_v22, %v4140_v47  ;;  %v4269_v18 = vadd.f32 %v1442_v17, %v5007_v6  ;;  %v4272_v57 = vadd.f32 %v1443_v3, %v5008_v44  ;;  %v1516_v17 = vld [vmem:[#allocation5 + $0x7c0] sm:$0xff]  ;;  %v1517_v3 = vld [vmem:[#allocation5 + $0x7c8] sm:$0xff] }
 0x216   : >> { %v4275_v1 = vadd.f32 %v1445_v4, %v4155_v27  ;;  %v4278_v34 = vadd.f32 %v1446_v36, %v5009_v50  ;;  %v4281_v55 = vadd.f32 %v1447_v52, %v5010_v26  ;;  %v1458_v47 = vrot.slane %v4263_v51, 4  ;;  %v1518_v4 = vld [vmem:[#allocation5 + $0x7d0] sm:$0xff]  ;;  %v1520_v6 = vld [vmem:[#allocation5 + $0x7e0] sm:$0xff]  ;;  %v1521_v44 = vld [vmem:[#allocation5 + $0x7e8] sm:$0xff] }
 0x217   : >> { %v1459_v58 = vrot.slane %v4260_v30, 4  ;;  %v1462_v25 = vrot.slane %v4266_v33, 4  ;;  %v1457_v27 = vrot.slane %v4272_v57, 4  ;;  %v1460_v21 = vrot.slane %v4269_v18, 4  ;;  %v1522_v26 = vld [vmem:[#allocation5 + $0x7f0] sm:$0xff] }
 0x218   : >> { %v1463_v45 = vrot.slane %v4275_v1, 4  ;;  %v1464_v19 = vrot.slane %v4278_v34, 4  ;;  %v1461_v2 = vrot.slane %v4281_v55, 4  ;;  %v4300_v13 = vmul.f32 %v1541_v0, %v4269_v18  ;;  %v1519_v0 = vld [vmem:[#allocation5 + $0x7d8] sm:$0xff] }
 0x219   : >> { %v4293_v43 = vsel %vm285_vm0, %v1458_v47, %v1462_v25  ;;  %v4297_v28 = vsel %vm285_vm0, %v1462_v25, %v1458_v47  ;;  %v1523_v47 = vld [vmem:[#allocation5 + $0x7f8] sm:$0xff] }
 0x21a   : >> { %v4304_v32 = vsel %vm285_vm0, %v1459_v58, %v1463_v45  ;;  %v4308_v31 = vsel %vm285_vm0, %v1460_v21, %v1464_v19  ;;  %v4312_v37 = vsel %vm285_vm0, %v1463_v45, %v1459_v58  ;;  %v4316_v61 = vsel %vm285_vm0, %v1464_v19, %v1460_v21 }
 0x21b   : >> { %v4320_v38 = vsel %vm285_vm0, %v1457_v27, %v1461_v2  ;;  %v4324_v41 = vsel %vm285_vm0, %v1461_v2, %v1457_v27  ;;  %v1482_v48 = vmul.f32 %v1474_v63, %v4316_v61  ;;  %v1484_v5 = vmul.f32 %v1476_v59, %v4297_v28 }
 0x21c   : >> { %v1483_v20 = vmul.f32 %v1475_v60, %v4324_v41  ;;  %v1485_v62 = vmul.f32 %v1477_v39, %v4312_v37  ;;  %v1486_v16 = vmul.f32 %v1478_v46, %v4308_v31  ;;  %v1487_v9 = vmul.f32 %v1479_v54, %v4320_v38  ;;  %v1542_v54 = vld [vmem:[#allocation5 + $0x808] sm:$0xff] }
 0x21d   : >> { %v1488_v42 = vmul.f32 %v1480_v10, %v4293_v43  ;;  %v1489_v15 = vmul.f32 %v1481_v24, %v4304_v32  ;;  %v1499_v7 = vmul.f32 %v1491_v23, %v4324_v41  ;;  %v1500_v22 = vmul.f32 %v1492_v40, %v4297_v28  ;;  %v1543_v10 = vld [vmem:[#allocation5 + $0x810] sm:$0xff]  ;;  %v1544_v24 = vld [vmem:[#allocation5 + $0x818] sm:$0xff] }
 0x21e   : >> { %v1501_v36 = vmul.f32 %v1493_v29, %v4312_v37  ;;  %v1502_v52 = vmul.f32 %v1494_v11, %v4316_v61  ;;  %v1503_v14 = vmul.f32 %v1495_v56, %v4320_v38  ;;  %v1504_v53 = vmul.f32 %v1496_v8, %v4293_v43  ;;  %v1545_v11 = vld [vmem:[#allocation5 + $0x820] sm:$0xff]  ;;  %v1546_v56 = vld [vmem:[#allocation5 + $0x828] sm:$0xff]  ;;  %v1547_v8 = vld [vmem:[#allocation5 + $0x830] sm:$0xff] }
 0x21f   : >> { %v1505_v50 = vmul.f32 %v1497_v35, %v4304_v32  ;;  %v1506_v63 = vmul.f32 %v1498_v49, %v4308_v31  ;;  %v1507_v60 = vadd.f32 %v1499_v7, %v1482_v48  ;;  %v1508_v59 = vadd.f32 %v1500_v22, %v1483_v20  ;;  %v1548_v20 = vld [vmem:[#allocation5 + $0x838] sm:$0xff] }
 0x220   : >> { %v1509_v58 = vadd.f32 %v1501_v36, %v1484_v5  ;;  %v1510_v25 = vadd.f32 %v1502_v52, %v1485_v62  ;;  %v1511_v39 = vadd.f32 %v1503_v14, %v1486_v16  ;;  %v1512_v46 = vadd.f32 %v1504_v53, %v1487_v9  ;;  %v1568_v36 = vld [vmem:[#allocation5 + $0x850] sm:$0xff]  ;;  %v1569_v52 = vld [vmem:[#allocation5 + $0x858] sm:$0xff] }
 0x221   : >> { %v1513_v27 = vadd.f32 %v1505_v50, %v1488_v42  ;;  %v1514_v21 = vadd.f32 %v1506_v63, %v1489_v15  ;;  %v1524_v45 = vmul.f32 %v1516_v17, %v4297_v28  ;;  %v1525_v19 = vmul.f32 %v1517_v3, %v4312_v37  ;;  %v1566_v15 = vld [vmem:[#allocation5 + $0x840] sm:$0xff]  ;;  %v1571_v50 = vld [vmem:[#allocation5 + $0x868] sm:$0xff]  ;;  %v1572_v63 = vld [vmem:[#allocation5 + $0x870] sm:$0xff] }
 0x222   : >> { %v1526_v2 = vmul.f32 %v1518_v4, %v4316_v61  ;;  %v1527_v23 = vmul.f32 %v1519_v0, %v4324_v41  ;;  %v1528_v40 = vmul.f32 %v1520_v6, %v4293_v43  ;;  %v1529_v29 = vmul.f32 %v1521_v44, %v4304_v32  ;;  %v1567_v4 = vld [vmem:[#allocation5 + $0x848] sm:$0xff]  ;;  %v1570_v44 = vld [vmem:[#allocation5 + $0x860] sm:$0xff] }
 0x223   : >> { %v1530_v48 = vmul.f32 %v1522_v26, %v4308_v31  ;;  %v1531_v5 = vmul.f32 %v1523_v47, %v4320_v38  ;;  %v1532_v35 = vadd.f32 %v1524_v45, %v1507_v60  ;;  %v1533_v49 = vadd.f32 %v1525_v19, %v1508_v59 }
 0x224   : >> { %v1534_v62 = vadd.f32 %v1526_v2, %v1509_v58  ;;  %v1535_v16 = vadd.f32 %v1527_v23, %v1510_v25  ;;  %v1536_v9 = vadd.f32 %v1528_v40, %v1511_v39  ;;  %v1537_v42 = vadd.f32 %v1529_v29, %v1512_v46  ;;  %v1573_v58 = vld [vmem:[#allocation5 + $0x878] sm:$0xff]  ;;  %v1593_v2 = vld [vmem:[#allocation5 + $0x890] sm:$0xff] }
 0x225   : >> { %v1538_v7 = vadd.f32 %v1530_v48, %v1513_v27  ;;  %v1539_v22 = vadd.f32 %v1531_v5, %v1514_v21  ;;  %v1550_v17 = vmul.f32 %v1542_v54, %v4272_v57  ;;  %v1551_v3 = vmul.f32 %v1543_v10, %v4263_v51  ;;  %v1591_v21 = vld [vmem:[#allocation5 + $0x880] sm:$0xff]  ;;  %v1594_v23 = vld [vmem:[#allocation5 + $0x898] sm:$0xff]  ;;  %v1597_v48 = vld [vmem:[#allocation5 + $0x8b0] sm:$0xff] }
 0x226   : >> { %v1552_v14 = vmul.f32 %v1544_v24, %v4260_v30  ;;  %v1553_v53 = vmul.f32 %v1545_v11, %v4278_v34  ;;  %v1554_v0 = vmul.f32 %v1546_v56, %v4281_v55  ;;  %v1555_v6 = vmul.f32 %v1547_v8, %v4266_v33  ;;  %v1592_v24 = vld [vmem:[#allocation5 + $0x888] sm:$0xff]  ;;  %v1595_v56 = vld [vmem:[#allocation5 + $0x8a0] sm:$0xff] }
 0x227   : >> { %v1556_v60 = vmul.f32 %v1548_v20, %v4275_v1  ;;  %v1557_v59 = vadd.f32 %v4300_v13, %v1532_v35  ;;  %v1558_v26 = vadd.f32 %v1550_v17, %v1533_v49  ;;  %v1559_v47 = vadd.f32 %v1551_v3, %v1534_v62  ;;  %v1596_v8 = vld [vmem:[#allocation5 + $0x8a8] sm:$0xff]  ;;  %v1598_v62 = vld [vmem:[#allocation5 + $0x8b8] sm:$0xff] }
 0x228   : >> { %v1560_v25 = vadd.f32 %v1552_v14, %v1535_v16  ;;  %v1561_v39 = vadd.f32 %v1553_v53, %v1536_v9  ;;  %v1562_v46 = vadd.f32 %v1554_v0, %v1537_v42  ;;  %v1563_v27 = vadd.f32 %v1555_v6, %v1538_v7  ;;  %v1616_v7 = vld [vmem:[#allocation5 + $0x8c0] sm:$0xff]  ;;  %v1619_v14 = vld [vmem:[#allocation5 + $0x8d8] sm:$0xff] }
 0x229   : >> { %v1564_v45 = vadd.f32 %v1556_v60, %v1539_v22  ;;  %v1574_v19 = vmul.f32 %v1566_v15, %v4272_v57  ;;  %v1575_v54 = vmul.f32 %v1567_v4, %v4263_v51  ;;  %v1576_v10 = vmul.f32 %v1568_v36, %v4260_v30  ;;  %v1617_v36 = vld [vmem:[#allocation5 + $0x8c8] sm:$0xff]  ;;  %v1622_v60 = vld [vmem:[#allocation5 + $0x8f0] sm:$0xff] }
 0x22a   : >> { %v1577_v13 = vmul.f32 %v1569_v52, %v4269_v18  ;;  %v1578_v40 = vmul.f32 %v1570_v44, %v4281_v55  ;;  %v1579_v29 = vmul.f32 %v1571_v50, %v4266_v33  ;;  %v1580_v11 = vmul.f32 %v1572_v63, %v4275_v1  ;;  %v1618_v52 = vld [vmem:[#allocation5 + $0x8d0] sm:$0xff]  ;;  %v1620_v50 = vld [vmem:[#allocation5 + $0x8e0] sm:$0xff]  ;;  %v1621_v63 = vld [vmem:[#allocation5 + $0x8e8] sm:$0xff] }
 0x22b   : >> { %v1581_v5 = vmul.f32 %v1573_v58, %v4278_v34  ;;  %v1582_v35 = vadd.f32 %v1574_v19, %v1557_v59  ;;  %v1583_v49 = vadd.f32 %v1575_v54, %v1558_v26  ;;  %v1584_v20 = vadd.f32 %v1576_v10, %v1559_v47 }
 0x22c   : >> { %v1585_v16 = vadd.f32 %v1577_v13, %v1560_v25  ;;  %v1586_v9 = vadd.f32 %v1578_v40, %v1561_v39  ;;  %v1587_v42 = vadd.f32 %v1579_v29, %v1562_v46  ;;  %v1588_v15 = vadd.f32 %v1580_v11, %v1563_v27  ;;  %v1623_v25 = vld [vmem:[#allocation5 + $0x8f8] sm:$0xff] }
 0x22d   : >> { %v1589_v22 = vadd.f32 %v1581_v5, %v1564_v45  ;;  %v1599_v17 = vmul.f32 %v1591_v21, %v4263_v51  ;;  %v1600_v3 = vmul.f32 %v1592_v24, %v4260_v30  ;;  %v1601_v4 = vmul.f32 %v1593_v2, %v4269_v18  ;;  %v1641_v45 = vld [vmem:[#allocation5 + $0x900] sm:$0xff]  ;;  %v1642_v2 = vld [vmem:[#allocation5 + $0x908] sm:$0xff]  ;;  %v1644_v13 = vld [vmem:[#allocation5 + $0x918] sm:$0xff] }
 0x22e   : >> { %v1602_v53 = vmul.f32 %v1594_v23, %v4272_v57  ;;  %v1603_v0 = vmul.f32 %v1595_v56, %v4266_v33  ;;  %v1604_v6 = vmul.f32 %v1596_v8, %v4275_v1  ;;  %v1605_v44 = vmul.f32 %v1597_v48, %v4278_v34  ;;  %v1643_v23 = vld [vmem:[#allocation5 + $0x910] sm:$0xff]  ;;  %v1645_v8 = vld [vmem:[#allocation5 + $0x920] sm:$0xff]  ;;  %v1646_v48 = vld [vmem:[#allocation5 + $0x928] sm:$0xff] }
 0x22f   : >> { %v1606_v59 = vmul.f32 %v1598_v62, %v4281_v55  ;;  %v1607_v26 = vadd.f32 %v1599_v17, %v1582_v35  ;;  %v1608_v47 = vadd.f32 %v1600_v3, %v1583_v49  ;;  %v1609_v58 = vadd.f32 %v1601_v4, %v1584_v20  ;;  %v1647_v5 = vld [vmem:[#allocation5 + $0x930] sm:$0xff] }
 0x230   : >> { %v1610_v39 = vadd.f32 %v1602_v53, %v1585_v16  ;;  %v1611_v46 = vadd.f32 %v1603_v0, %v1586_v9  ;;  %v1612_v27 = vadd.f32 %v1604_v6, %v1587_v42  ;;  %v1613_v21 = vadd.f32 %v1605_v44, %v1588_v15  ;;  %v1648_v16 = vld [vmem:[#allocation5 + $0x938] sm:$0xff] }
 0x231   : >> { %v1614_v19 = vadd.f32 %v1606_v59, %v1589_v22  ;;  %v1624_v54 = vmul.f32 %v1616_v7, %v4308_v31  ;;  %v1625_v10 = vmul.f32 %v1617_v36, %v4320_v38  ;;  %v1626_v24 = vmul.f32 %v1618_v52, %v4293_v43  ;;  %v1666_v22 = vld [vmem:[#allocation5 + $0x940] sm:$0xff]  ;;  %v1667_v52 = vld [vmem:[#allocation5 + $0x948] sm:$0xff]  ;;  %v1669_v53 = vld [vmem:[#allocation5 + $0x958] sm:$0xff] }
 0x232   : >> { %v1627_v40 = vmul.f32 %v1619_v14, %v4304_v32  ;;  %v1628_v29 = vmul.f32 %v1620_v50, %v4316_v61  ;;  %v1629_v11 = vmul.f32 %v1621_v63, %v4324_v41  ;;  %v1630_v56 = vmul.f32 %v1622_v60, %v4297_v28  ;;  %v1668_v14 = vld [vmem:[#allocation5 + $0x950] sm:$0xff]  ;;  %v1670_v63 = vld [vmem:[#allocation5 + $0x960] sm:$0xff]  ;;  %v1671_v60 = vld [vmem:[#allocation5 + $0x968] sm:$0xff] }
 0x233   : >> { %v1631_v35 = vmul.f32 %v1623_v25, %v4312_v37  ;;  %v1632_v49 = vadd.f32 %v1624_v54, %v1607_v26  ;;  %v1633_v20 = vadd.f32 %v1625_v10, %v1608_v47  ;;  %v1634_v62 = vadd.f32 %v1626_v24, %v1609_v58  ;;  %v1672_v59 = vld [vmem:[#allocation5 + $0x970] sm:$0xff] }
 0x234   : >> { %v1635_v9 = vadd.f32 %v1627_v40, %v1610_v39  ;;  %v1636_v42 = vadd.f32 %v1628_v29, %v1611_v46  ;;  %v1637_v15 = vadd.f32 %v1629_v11, %v1612_v27  ;;  %v1638_v7 = vadd.f32 %v1630_v56, %v1613_v21  ;;  %v1673_v39 = vld [vmem:[#allocation5 + $0x978] sm:$0xff] }
 0x235   : >> { %v1639_v17 = vadd.f32 %v1631_v35, %v1614_v19  ;;  %v1649_v3 = vmul.f32 %v1641_v45, %v4320_v38  ;;  %v1650_v4 = vmul.f32 %v1642_v2, %v4293_v43  ;;  %v1651_v36 = vmul.f32 %v1643_v23, %v4304_v32 }
 0x236   : >> { %v1652_v0 = vmul.f32 %v1644_v13, %v4308_v31  ;;  %v1653_v6 = vmul.f32 %v1645_v8, %v4324_v41  ;;  %v1654_v44 = vmul.f32 %v1646_v48, %v4297_v28  ;;  %v1655_v50 = vmul.f32 %v1647_v5, %v4312_v37 }
 0x237   : >> { %v1656_v26 = vmul.f32 %v1648_v16, %v4316_v61  ;;  %v1657_v47 = vadd.f32 %v1649_v3, %v1632_v49  ;;  %v1658_v58 = vadd.f32 %v1650_v4, %v1633_v20  ;;  %v1659_v25 = vadd.f32 %v1651_v36, %v1634_v62  ;;  %v5012_v49 = vld [vmem:[#allocation46_spill] sm:$0xff]  ;;  %v5013_v20 = vld [vmem:[#allocation47_spill] sm:$0xff]  ;;  %v5014_v62 = vld [vmem:[#allocation25_spill] sm:$0xff] }
 0x238   : >> { %v1660_v46 = vadd.f32 %v1652_v0, %v1635_v9  ;;  %v1661_v27 = vadd.f32 %v1653_v6, %v1636_v42  ;;  %v1662_v21 = vadd.f32 %v1654_v44, %v1637_v15  ;;  %v1663_v45 = vadd.f32 %v1655_v50, %v1638_v7  ;;  %v5015_v16 = vld [vmem:[#allocation23_spill] sm:$0xff]  ;;  %v1741_v42 = vld [vmem:[#allocation5 + $0x998] sm:$0xff]  ;;  %v1743_v3 = vld [vmem:[#allocation5 + $0x9a8] sm:$0xff] }
 0x239   : >> { %v1664_v19 = vadd.f32 %v1656_v26, %v1639_v17  ;;  %v1674_v54 = vmul.f32 %v1666_v22, %v4293_v43  ;;  %v1675_v10 = vmul.f32 %v1667_v52, %v4304_v32  ;;  %v1676_v24 = vmul.f32 %v1668_v14, %v4308_v31  ;;  %v1740_v4 = vld [vmem:[#allocation5 + $0x990] sm:$0xff]  ;;  %v1745_v0 = vld [vmem:[#allocation5 + $0x9b8] sm:$0xff]  ;;  %v1760_v6 = vld [vmem:[#allocation5 + $0x9e8] sm:$0xff] }
 0x23a   : >> { %v1677_v2 = vmul.f32 %v1669_v53, %v4320_v38  ;;  %v1678_v23 = vmul.f32 %v1670_v63, %v4297_v28  ;;  %v1679_v13 = vmul.f32 %v1671_v60, %v4312_v37  ;;  %v1680_v40 = vmul.f32 %v1672_v59, %v4316_v61  ;;  %v1757_v44 = vld [vmem:[#allocation5 + $0x9d0] sm:$0xff]  ;;  %v1758_v50 = vld [vmem:[#allocation5 + $0x9d8] sm:$0xff] }
 0x23b   : >> { %v1681_v29 = vmul.f32 %v1673_v39, %v4324_v41  ;;  %v1682_v11 = vadd.f32 %v1674_v54, %v1657_v47  ;;  %v1683_v56 = vadd.f32 %v1675_v10, %v1658_v58  ;;  %v1684_v8 = vadd.f32 %v1676_v24, %v1659_v25  ;;  %v1783_v63 = vld [vmem:[#allocation5 + $0xa18] sm:$0xff]  ;;  %v1782_v58 = vld [vmem:[#allocation5 + $0xa10] sm:$0xff]  ;;  %v1756_v54 = vld [vmem:[#allocation5 + $0x9c8] sm:$0xff] }
 0x23c   : >> { %v1685_v48 = vadd.f32 %v1677_v2, %v1660_v46  ;;  %v1686_v5 = vadd.f32 %v1678_v23, %v1661_v27  ;;  %v1687_v43 = vadd.f32 %v1679_v13, %v1662_v21  ;;  %v1688_v35 = vadd.f32 %v1680_v40, %v1663_v45  ;;  %v1811_v25 = vld [vmem:[#allocation5 + $0xa70] sm:$0xff]  ;;  %v1837_v39 = vld [vmem:[#allocation5 + $0xab8] sm:$0xff]  ;;  %v1781_v2 = vld [vmem:[#allocation5 + $0xa08] sm:$0xff] }
 0x23d   : >> { %v1689_v32 = vadd.f32 %v1681_v29, %v1664_v19  ;;  %v1713_v31 = vadd.f32 %v5012_v49, %v1682_v11  ;;  %v1714_v38 = vadd.f32 %v5013_v20, %v1683_v56  ;;  %v1715_v28 = vadd.f32 %v5014_v62, %v1684_v8  ;;  %v1787_v11 = vld [vmem:[#allocation5 + $0xa38] sm:$0xff] }
 0x23e   : >> { %v1716_v37 = vadd.f32 %v5015_v16, %v1685_v48  ;;  %v1717_v61 = vadd.f32 %v5012_v49, %v1686_v5  ;;  %v1718_v41 = vadd.f32 %v5013_v20, %v1687_v43  ;;  %v1719_v9 = vadd.f32 %v5014_v62, %v1688_v35  ;;  %v1806_v43 = vld [vmem:[#allocation5 + $0xa48] sm:$0xff]  ;;  %v1808_v35 = vld [vmem:[#allocation5 + $0xa58] sm:$0xff] }
 0x23f   : >> { %v1720_v15 = vadd.f32 %v5015_v16, %v1689_v32  ;;  %v1721_v7 = vmax.f32 %v1713_v31, 0.0  ;;  %v1722_v22 = vmax.f32 %v1714_v38, 0.0  ;;  %v1723_v17 = vmax.f32 %v1715_v28, 0.0  ;;  %v1810_v38 = vld [vmem:[#allocation5 + $0xa68] sm:$0xff]  ;;  %v1812_v62 = vld [vmem:[#allocation5 + $0xa78] sm:$0xff] }
 0x240   : >> { %v1724_v36 = vmax.f32 %v1716_v37, 0.0  ;;  %v1725_v52 = vmax.f32 %v1717_v61, 0.0  ;;  %v1726_v14 = vmax.f32 %v1718_v41, 0.0  ;;  %v1727_v53 = vmax.f32 %v1719_v9, 0.0  ;;  %v1831_v41 = vld [vmem:[#allocation5 + $0xa88] sm:$0xff]  ;;  %v1833_v9 = vld [vmem:[#allocation5 + $0xa98] sm:$0xff] }
 0x241   : >> { %v1728_v60 = vmax.f32 %v1720_v15, 0.0  ;;  %v4407_v59 = vadd.f32 %v1721_v7, %v4260_v30  ;;  %v4410_v26 = vadd.f32 %v1722_v22, %v4269_v18  ;;  %v4413_v47 = vadd.f32 %v1723_v17, %v4272_v57  ;;  %v1739_v57 = vld [vmem:[#allocation5 + $0x988] sm:$0xff] }
 0x242   : >> { %v4416_v46 = vadd.f32 %v1724_v36, %v4263_v51  ;;  %v4419_v27 = vadd.f32 %v1725_v52, %v4275_v1  ;;  %v4422_v21 = vadd.f32 %v1726_v14, %v4278_v34  ;;  %v4425_v30 = vadd.f32 %v1727_v53, %v4281_v55  ;;  %v1762_v51 = vld [vmem:[#allocation5 + $0x9f8] sm:$0xff] }
 0x243   : >> { %v4428_v18 = vadd.f32 %v1728_v60, %v4266_v33  ;;  %v1751_v45 = vmul.f32 %v1743_v3, %v4413_v47  ;;  %v1753_v19 = vmul.f32 %v1745_v0, %v4407_v59  ;;  %v1768_v10 = vmul.f32 %v1760_v6, %v4407_v59  ;;  %v1785_v33 = vld [vmem:[#allocation5 + $0xa28] sm:$0xff]  ;;  %v1858_v53 = vld [vmem:[#allocation5 + $0xad8] sm:$0xff] }
 0x244   : >> { %v1749_v1 = vmul.f32 %v1741_v42, %v4419_v27  ;;  %v1765_v34 = vmul.f32 %v1757_v44, %v4422_v21  ;;  %v1766_v24 = vmul.f32 %v1758_v50, %v4425_v30  ;;  %v1791_v55 = vmul.f32 %v1783_v63, %v4419_v27  ;;  %v1835_v42 = vld [vmem:[#allocation5 + $0xaa8] sm:$0xff]  ;;  %v1862_v6 = vld [vmem:[#allocation5 + $0xaf8] sm:$0xff] }
 0x245   : >> { %v1748_v23 = vmul.f32 %v1740_v4, %v4428_v18  ;;  %v1790_v13 = vmul.f32 %v1782_v58, %v4428_v18  ;;  %v4440_v40 = vmul.f32 %v1811_v25, %v4428_v18  ;;  %v1845_v29 = vmul.f32 %v1837_v39, %v4425_v30  ;;  %v1856_v3 = vld [vmem:[#allocation5 + $0xac8] sm:$0xff] }
 0x246   : >> { %v1774_v56 = vadd.f32 %v1766_v24, %v1749_v1  ;;  %v1747_v8 = vmul.f32 %v1739_v57, %v4425_v30  ;;  %v1764_v48 = vmul.f32 %v1756_v54, %v4419_v27  ;;  %v1770_v5 = vmul.f32 %v1762_v51, %v4413_v47  ;;  %v1860_v0 = vld [vmem:[#allocation5 + $0xae8] sm:$0xff]  ;;  %v1887_v51 = vld [vmem:[#allocation5 + $0xb38] sm:$0xff] }
 0x247   : >> { %v1773_v32 = vadd.f32 %v1765_v34, %v1748_v23  ;;  %v1776_v49 = vadd.f32 %v1768_v10, %v1751_v45  ;;  %v1789_v31 = vmul.f32 %v1781_v2, %v4425_v30  ;;  %v1793_v20 = vmul.f32 %v1785_v33, %v4413_v47  ;;  %v1881_v58 = vld [vmem:[#allocation5 + $0xb08] sm:$0xff] }
 0x248   : >> { %v1772_v28 = vadd.f32 %v1764_v48, %v1747_v8  ;;  %v1778_v16 = vadd.f32 %v1770_v5, %v1753_v19  ;;  %v1795_v37 = vmul.f32 %v1787_v11, %v4407_v59  ;;  %v1799_v61 = vadd.f32 %v1791_v55, %v1774_v56  ;;  %v1883_v19 = vld [vmem:[#allocation5 + $0xb18] sm:$0xff]  ;;  %v1885_v54 = vld [vmem:[#allocation5 + $0xb28] sm:$0xff] }
 0x249   : >> { %v4449_v15 = vadd.f32 %v1790_v13, %v1773_v32  ;;  %v1801_v7 = vadd.f32 %v1793_v20, %v1776_v49  ;;  %v1814_v22 = vmul.f32 %v1806_v43, %v4413_v47  ;;  %v1816_v17 = vmul.f32 %v1808_v35, %v4407_v59  ;;  %v1906_v55 = vld [vmem:[#allocation5 + $0xb48] sm:$0xff]  ;;  %v1908_v11 = vld [vmem:[#allocation5 + $0xb58] sm:$0xff] }
 0x24a   : >> { %v1797_v4 = vadd.f32 %v1789_v31, %v1772_v28  ;;  %v1803_v36 = vadd.f32 %v1795_v37, %v1778_v16  ;;  %v1818_v52 = vmul.f32 %v1810_v38, %v4425_v30  ;;  %v1820_v14 = vmul.f32 %v1812_v62, %v4419_v27  ;;  %v1910_v56 = vld [vmem:[#allocation5 + $0xb68] sm:$0xff]  ;;  %v1912_v8 = vld [vmem:[#allocation5 + $0xb78] sm:$0xff] }
 0x24b   : >> { %v1824_v44 = vadd.f32 %v1816_v17, %v1799_v61  ;;  %v1839_v50 = vmul.f32 %v1831_v41, %v4407_v59  ;;  %v1841_v63 = vmul.f32 %v1833_v9, %v4413_v47  ;;  %v1843_v60 = vmul.f32 %v1835_v42, %v4419_v27  ;;  %v1931_v32 = vld [vmem:[#allocation5 + $0xb88] sm:$0xff]  ;;  %v1933_v62 = vld [vmem:[#allocation5 + $0xb98] sm:$0xff]  ;;  %v1738_v9 = vld [vmem:[#allocation5 + $0x980] sm:$0xff] }
 0x24c   : >> { %v1822_v25 = vadd.f32 %v1814_v22, %v1797_v4  ;;  %v1826_v39 = vadd.f32 %v1818_v52, %v1801_v7  ;;  %v1828_v57 = vadd.f32 %v1820_v14, %v1803_v36  ;;  %v1864_v45 = vmul.f32 %v1856_v3, %v4413_v47  ;;  %v1937_v28 = vld [vmem:[#allocation5 + $0xbb8] sm:$0xff]  ;;  %v1742_v3 = vld [vmem:[#allocation5 + $0x9a0] sm:$0xff]  ;;  %v1744_v4 = vld [vmem:[#allocation5 + $0x9b0] sm:$0xff] }
 0x24d   : >> { %v1849_v10 = vadd.f32 %v1841_v63, %v1824_v44  ;;  %v1866_v1 = vmul.f32 %v1858_v53, %v4407_v59  ;;  %v1868_v34 = vmul.f32 %v1860_v0, %v4425_v30  ;;  %v1870_v24 = vmul.f32 %v1862_v6, %v4419_v27  ;;  %v1755_v36 = vld [vmem:[#allocation5 + $0x9c0] sm:$0xff] }
 0x24e   : >> { %v1847_v2 = vadd.f32 %v1839_v50, %v1822_v25  ;;  %v1851_v33 = vadd.f32 %v1843_v60, %v1826_v39  ;;  %v1853_v23 = vadd.f32 %v1845_v29, %v1828_v57  ;;  %v1889_v13 = vmul.f32 %v1881_v58, %v4425_v30  ;;  %v1935_v29 = vld [vmem:[#allocation5 + $0xba8] sm:$0xff]  ;;  %v1759_v6 = vld [vmem:[#allocation5 + $0x9e0] sm:$0xff]  ;;  %v1761_v58 = vld [vmem:[#allocation5 + $0x9f0] sm:$0xff] }
 0x24f   : >> { %v1874_v48 = vadd.f32 %v1866_v1, %v1849_v10  ;;  %v1891_v5 = vmul.f32 %v1883_v19, %v4419_v27  ;;  %v1893_v43 = vmul.f32 %v1885_v54, %v4413_v47  ;;  %v1895_v35 = vmul.f32 %v1887_v51, %v4407_v59  ;;  %v1780_v25 = vld [vmem:[#allocation5 + $0xa00] sm:$0xff] }
 0x250   : >> { %v1872_v49 = vadd.f32 %v1864_v45, %v1847_v2  ;;  %v1876_v31 = vadd.f32 %v1868_v34, %v1851_v33  ;;  %v1878_v20 = vadd.f32 %v1870_v24, %v1853_v23  ;;  %v1914_v38 = vmul.f32 %v1906_v55, %v4419_v27  ;;  %v1784_v34 = vld [vmem:[#allocation5 + $0xa20] sm:$0xff]  ;;  %v1786_v24 = vld [vmem:[#allocation5 + $0xa30] sm:$0xff]  ;;  %v5016_v55 = vld [vmem:[#allocation36_spill] sm:$0xff] }
 0x251   : >> { %v1899_v16 = vadd.f32 %v1891_v5, %v1874_v48  ;;  %v1916_v37 = vmul.f32 %v1908_v11, %v4425_v30  ;;  %v1918_v61 = vmul.f32 %v1910_v56, %v4407_v59  ;;  %v1920_v41 = vmul.f32 %v1912_v8, %v4413_v47  ;;  %v5017_v11 = vld [vmem:[#allocation27_spill] sm:$0xff] }
 0x252   : >> { %v1897_v42 = vadd.f32 %v1889_v13, %v1872_v49  ;;  %v1901_v7 = vadd.f32 %v1893_v43, %v1876_v31  ;;  %v1903_v22 = vadd.f32 %v1895_v35, %v1878_v20  ;;  %v1939_v17 = vmul.f32 %v1931_v32, %v4425_v30  ;;  %v1805_v43 = vld [vmem:[#allocation5 + $0xa40] sm:$0xff]  ;;  %v1807_v35 = vld [vmem:[#allocation5 + $0xa50] sm:$0xff]  ;;  %v2003_v49 = vld [vmem:[#allocation5 + $0xbc8] sm:$0xff] }
 0x253   : >> { %v1924_v52 = vadd.f32 %v1916_v37, %v1899_v16  ;;  %v1941_v14 = vmul.f32 %v1933_v62, %v4419_v27  ;;  %v1943_v53 = vmul.f32 %v1935_v29, %v4413_v47  ;;  %v1945_v0 = vmul.f32 %v1937_v28, %v4407_v59  ;;  %v2007_v31 = vld [vmem:[#allocation5 + $0xbe8] sm:$0xff]  ;;  %v1809_v29 = vld [vmem:[#allocation5 + $0xa60] sm:$0xff] }
 0x254   : >> { %v1922_v44 = vadd.f32 %v1914_v38, %v1897_v42  ;;  %v1926_v50 = vadd.f32 %v1918_v61, %v1901_v7  ;;  %v1928_v63 = vadd.f32 %v1920_v41, %v1903_v22  ;;  %v1746_v60 = vmul.f32 %v1738_v9, %v4422_v21  ;;  %v2024_v61 = vld [vmem:[#allocation5 + $0xc28] sm:$0xff] }
 0x255   : >> { %v1949_v39 = vadd.f32 %v1941_v14, %v1924_v52  ;;  %v1750_v57 = vmul.f32 %v1742_v3, %v4410_v26  ;;  %v1752_v45 = vmul.f32 %v1744_v4, %v4416_v46  ;;  %v1763_v19 = vmul.f32 %v1755_v36, %v4428_v18  ;;  %v2095_v41 = vld [vmem:[#allocation5 + $0xcc8] sm:$0xff] }
 0x256   : >> { %v1947_v54 = vadd.f32 %v1939_v17, %v1922_v44  ;;  %v1951_v51 = vadd.f32 %v1943_v53, %v1926_v50  ;;  %v1953_v10 = vadd.f32 %v1945_v0, %v1928_v63  ;;  %v1767_v1 = vmul.f32 %v1759_v6, %v4416_v46  ;;  %v2174_v9 = vld [vmem:[#allocation5 + $0xda8] sm:$0xff] }
 0x257   : >> { %v1980_v2 = vadd.f32 %v5016_v55, %v1949_v39  ;;  %v1769_v33 = vmul.f32 %v1761_v58, %v4410_v26  ;;  %v1771_v23 = vadd.f32 %v1763_v19, %v1746_v60  ;;  %v1788_v13 = vmul.f32 %v1780_v25, %v4422_v21  ;;  %v2020_v22 = vld [vmem:[#allocation5 + $0xc08] sm:$0xff] }
 0x258   : >> { %v1978_v56 = vadd.f32 %v5017_v11, %v1947_v54  ;;  %v1982_v8 = vadd.f32 %v5017_v11, %v1951_v51  ;;  %v1984_v48 = vadd.f32 %v5016_v55, %v1953_v10  ;;  %v1775_v5 = vadd.f32 %v1767_v1, %v1750_v57  ;;  %v2045_v17 = vld [vmem:[#allocation5 + $0xc48] sm:$0xff] }
 0x259   : >> { %v1988_v32 = vmax.f32 %v1980_v2, 0.0  ;;  %v1777_v20 = vadd.f32 %v1769_v33, %v1752_v45  ;;  %v1792_v38 = vmul.f32 %v1784_v34, %v4410_v26  ;;  %v1794_v62 = vmul.f32 %v1786_v24, %v4416_v46  ;;  %v2049_v3 = vld [vmem:[#allocation5 + $0xc68] sm:$0xff] }
 0x25a   : >> { %v1986_v28 = vmax.f32 %v1978_v56, 0.0  ;;  %v1990_v16 = vmax.f32 %v1982_v8, 0.0  ;;  %v1992_v37 = vmax.f32 %v1984_v48, 0.0  ;;  %v1796_v42 = vadd.f32 %v1788_v13, %v1771_v23  ;;  %v2070_v6 = vld [vmem:[#allocation5 + $0xc88] sm:$0xff] }
 0x25b   : >> { %v4488_v7 = vadd.f32 %v1988_v32, %v4416_v46  ;;  %v1800_v4 = vadd.f32 %v1792_v38, %v1775_v5  ;;  %v1802_v36 = vadd.f32 %v1794_v62, %v1777_v20  ;;  %v1813_v52 = vmul.f32 %v1805_v43, %v4410_v26  ;;  %v2074_v44 = vld [vmem:[#allocation5 + $0xca8] sm:$0xff]  ;;  %v1830_v43 = vld [vmem:[#allocation5 + $0xa80] sm:$0xff]  ;;  %v1832_v20 = vld [vmem:[#allocation5 + $0xa90] sm:$0xff] }
 0x25c   : >> { %v4492_v14 = vadd.f32 %v1986_v28, %v4410_v26  ;;  %v4495_v53 = vadd.f32 %v1990_v16, %v4422_v21  ;;  %v4498_v0 = vadd.f32 %v1992_v37, %v4428_v18  ;;  %v2099_v50 = vld [vmem:[#allocation5 + $0xce8] sm:$0xff]  ;;  %v1815_v63 = vmul.f32 %v1807_v35, %v4416_v46  ;;  %v1834_v38 = vld [vmem:[#allocation5 + $0xaa0] sm:$0xff]  ;;  %v1836_v37 = vld [vmem:[#allocation5 + $0xab0] sm:$0xff] }
 0x25d   : >> { %v2032_v60 = vmul.f32 %v2024_v61, %v4488_v7  ;;  %v2103_v58 = vmul.f32 %v2095_v41, %v4488_v7  ;;  %v2120_v25 = vld [vmem:[#allocation5 + $0xd08] sm:$0xff]  ;;  %v4504_v45 = vmul.f32 %v2174_v9, %v4488_v7  ;;  %v1817_v19 = vmul.f32 %v1809_v29, %v4422_v21  ;;  %v1855_v61 = vld [vmem:[#allocation5 + $0xac0] sm:$0xff]  ;;  %v1857_v41 = vld [vmem:[#allocation5 + $0xad0] sm:$0xff] }
 0x25e   : >> { %v2124_v39 = vld [vmem:[#allocation5 + $0xd28] sm:$0xff]  ;;  %v2011_v54 = vmul.f32 %v2003_v49, %v4495_v53  ;;  %v2015_v51 = vmul.f32 %v2007_v31, %v4492_v14  ;;  %v2028_v10 = vmul.f32 %v2020_v22, %v4498_v0  ;;  %v2053_v1 = vmul.f32 %v2045_v17, %v4495_v53 }
 0x25f   : >> { %v2145_v57 = vld [vmem:[#allocation5 + $0xd48] sm:$0xff]  ;;  %v2057_v2 = vmul.f32 %v2049_v3, %v4492_v14  ;;  %v2078_v33 = vmul.f32 %v2070_v6, %v4492_v14  ;;  %v2082_v23 = vmul.f32 %v2074_v44, %v4495_v53  ;;  %v2107_v13 = vmul.f32 %v2099_v50, %v4498_v0 }
 0x260   : >> { %v2149_v34 = vld [vmem:[#allocation5 + $0xd68] sm:$0xff]  ;;  %v2036_v56 = vadd.f32 %v2028_v10, %v2011_v54  ;;  %v2040_v8 = vadd.f32 %v2032_v60, %v2015_v51  ;;  %v2128_v48 = vmul.f32 %v2120_v25, %v4492_v14  ;;  %v2132_v5 = vmul.f32 %v2124_v39, %v4495_v53  ;;  %v1859_v25 = vld [vmem:[#allocation5 + $0xae0] sm:$0xff]  ;;  %v1861_v39 = vld [vmem:[#allocation5 + $0xaf0] sm:$0xff] }
 0x261   : >> { %v2170_v24 = vld [vmem:[#allocation5 + $0xd88] sm:$0xff]  ;;  %v2153_v35 = vmul.f32 %v2145_v57, %v4495_v53  ;;  %v2157_v32 = vmul.f32 %v2149_v34, %v4492_v14  ;;  %v1821_v16 = vadd.f32 %v1813_v52, %v1796_v42  ;;  %v1823_v9 = vadd.f32 %v1815_v63, %v4449_v15  ;;  %v1882_v54 = vld [vmem:[#allocation5 + $0xb10] sm:$0xff]  ;;  %v1884_v51 = vld [vmem:[#allocation5 + $0xb20] sm:$0xff] }
 0x262   : >> { %v2195_v55 = vld [vmem:[#allocation5 + $0xdc8] sm:$0xff]  ;;  %v2178_v49 = vmul.f32 %v2170_v24, %v4498_v0  ;;  %v2061_v62 = vadd.f32 %v2053_v1, %v2036_v56  ;;  %v2065_v29 = vadd.f32 %v2057_v2, %v2040_v8  ;;  %v1825_v22 = vadd.f32 %v1817_v19, %v1800_v4  ;;  %v1880_v4 = vld [vmem:[#allocation5 + $0xb00] sm:$0xff]  ;;  %v1907_v8 = vld [vmem:[#allocation5 + $0xb50] sm:$0xff] }
 0x263   : >> { %v2199_v11 = vld [vmem:[#allocation5 + $0xde8] sm:$0xff]  ;;  %v4521_v31 = vmul.f32 %v2195_v55, %v4495_v53  ;;  %v1827_v17 = vadd.f32 %v4440_v40, %v1802_v36  ;;  %v1838_v3 = vmul.f32 %v1830_v43, %v4416_v46  ;;  %v1840_v50 = vmul.f32 %v1832_v20, %v4410_v26  ;;  %v1886_v55 = vld [vmem:[#allocation5 + $0xb30] sm:$0xff]  ;;  %v1905_v56 = vld [vmem:[#allocation5 + $0xb40] sm:$0xff] }
 0x264   : >> { %v4524_v28 = vmul.f32 %v2199_v11, %v4492_v14  ;;  %v2086_v6 = vadd.f32 %v2078_v33, %v2061_v62  ;;  %v2090_v44 = vadd.f32 %v2082_v23, %v2065_v29  ;;  %v1842_v60 = vmul.f32 %v1834_v38, %v4428_v18  ;;  %v1909_v38 = vld [vmem:[#allocation5 + $0xb60] sm:$0xff] }
 0x265   : >> { %v1844_v42 = vmul.f32 %v1836_v37, %v4422_v21  ;;  %v1846_v52 = vadd.f32 %v1838_v3, %v1821_v16  ;;  %v1863_v57 = vmul.f32 %v1855_v61, %v4410_v26  ;;  %v1865_v15 = vmul.f32 %v1857_v41, %v4416_v46  ;;  %v1911_v61 = vld [vmem:[#allocation5 + $0xb70] sm:$0xff] }
 0x266   : >> { %v2111_v63 = vadd.f32 %v2103_v58, %v2086_v6  ;;  %v2115_v40 = vadd.f32 %v2107_v13, %v2090_v44  ;;  %v1848_v36 = vadd.f32 %v1840_v50, %v1823_v9  ;;  %v1850_v19 = vadd.f32 %v1842_v60, %v1825_v22 }
 0x267   : >> { %v1852_v10 = vadd.f32 %v1844_v42, %v1827_v17  ;;  %v1867_v1 = vmul.f32 %v1859_v25, %v4422_v21  ;;  %v1869_v34 = vmul.f32 %v1861_v39, %v4428_v18  ;;  %v1871_v24 = vadd.f32 %v1863_v57, %v1846_v52  ;;  %v1932_v17 = vld [vmem:[#allocation5 + $0xb90] sm:$0xff] }
 0x268   : >> { %v2136_v2 = vadd.f32 %v2128_v48, %v2111_v63  ;;  %v2140_v33 = vadd.f32 %v2132_v5, %v2115_v40  ;;  %v1873_v23 = vadd.f32 %v1865_v15, %v1848_v36  ;;  %v1888_v11 = vmul.f32 %v1880_v4, %v4422_v21  ;;  %v1930_v48 = vld [vmem:[#allocation5 + $0xb80] sm:$0xff]  ;;  %v2005_v4 = vld [vmem:[#allocation5 + $0xbd8] sm:$0xff] }
 0x269   : >> { %v1875_v58 = vadd.f32 %v1867_v1, %v1850_v19  ;;  %v1877_v13 = vadd.f32 %v1869_v34, %v1852_v10  ;;  %v1890_v43 = vmul.f32 %v1882_v54, %v4428_v18  ;;  %v1892_v20 = vmul.f32 %v1884_v51, %v4410_v26  ;;  %v5018_v19 = vld [vmem:[#allocation31_spill] sm:$0xff]  ;;  %v5019_v1 = vld [vmem:[#allocation16_spill] sm:$0xff] }
 0x26a   : >> { %v2161_v62 = vadd.f32 %v2153_v35, %v2136_v2  ;;  %v2165_v29 = vadd.f32 %v2157_v32, %v2140_v33  ;;  %v1894_v16 = vmul.f32 %v1886_v55, %v4416_v46  ;;  %v1896_v37 = vadd.f32 %v1888_v11, %v1871_v24  ;;  %v1934_v35 = vld [vmem:[#allocation5 + $0xba0] sm:$0xff]  ;;  %v1936_v32 = vld [vmem:[#allocation5 + $0xbb0] sm:$0xff]  ;;  %v2009_v34 = vld [vmem:[#allocation5 + $0xbf8] sm:$0xff] }
 0x26b   : >> { %v1898_v5 = vadd.f32 %v1890_v43, %v1873_v23  ;;  %v1900_v41 = vadd.f32 %v1892_v20, %v1875_v58  ;;  %v1913_v9 = vmul.f32 %v1905_v56, %v4428_v18  ;;  %v1915_v22 = vmul.f32 %v1907_v8, %v4422_v21  ;;  %v5020_v23 = vld [vmem:[#allocation34_spill] sm:$0xff]  ;;  %v2026_v11 = vld [vmem:[#allocation5 + $0xc38] sm:$0xff] }
 0x26c   : >> { %v2186_v3 = vadd.f32 %v2178_v49, %v2161_v62  ;;  %v2190_v6 = vadd.f32 %v4504_v45, %v2165_v29  ;;  %v1902_v44 = vadd.f32 %v1894_v16, %v1877_v13  ;;  %v1917_v50 = vmul.f32 %v1909_v38, %v4416_v46  ;;  %v2002_v29 = vld [vmem:[#allocation5 + $0xbc0] sm:$0xff]  ;;  %v2047_v16 = vld [vmem:[#allocation5 + $0xc58] sm:$0xff] }
 0x26d   : >> { %v1919_v60 = vmul.f32 %v1911_v61, %v4410_v26  ;;  %v1921_v25 = vadd.f32 %v1913_v9, %v1896_v37  ;;  %v1923_v39 = vadd.f32 %v1915_v22, %v1898_v5  ;;  %v1938_v42 = vmul.f32 %v1930_v48, %v4422_v21  ;;  %v2684_v21 = vld [vmem:[#allocation7 + $0x6] ss:$8 sm:$0xf] }
 0x26e   : >> { %v2211_v52 = vadd.f32 %v4521_v31, %v2186_v3  ;;  %v2215_v57 = vadd.f32 %v4524_v28, %v2190_v6  ;;  %v1925_v15 = vadd.f32 %v1917_v50, %v1900_v41  ;;  %v1940_v49 = vmul.f32 %v1932_v17, %v4428_v18  ;;  %v2022_v28 = vld [vmem:[#allocation5 + $0xc18] sm:$0xff]  ;;  %v2006_v48 = vld [vmem:[#allocation5 + $0xbe0] sm:$0xff] }
 0x26f   : >> { %v1927_v45 = vadd.f32 %v1919_v60, %v1902_v44  ;;  %v1942_v63 = vmul.f32 %v1934_v35, %v4410_v26  ;;  %v1944_v40 = vmul.f32 %v1936_v32, %v4416_v46  ;;  %v1946_v36 = vadd.f32 %v1938_v42, %v1921_v25  ;;  %v2023_v5 = vld [vmem:[#allocation5 + $0xc20] sm:$0xff]  ;;  %v2051_v22 = vld [vmem:[#allocation5 + $0xc78] sm:$0xff] }
 0x270   : >> { %v2242_v54 = vadd.f32 %v5018_v19, %v2211_v52  ;;  %v2246_v51 = vadd.f32 %v5018_v19, %v2215_v57  ;;  %v1948_v10 = vadd.f32 %v1940_v49, %v1923_v39  ;;  %v1960_v31 = vrot.slane %v2684_v21, %v5019_v1  ;;  %v2019_v44 = vld [vmem:[#allocation5 + $0xc00] sm:$0xff] }
 0x271   : >> { %v1950_v24 = vadd.f32 %v1942_v63, %v1925_v15  ;;  %v1952_v55 = vadd.f32 %v1944_v40, %v1927_v45  ;;  %v2013_v18 = vmul.f32 %v2005_v4, %v4498_v0  ;;  %v2017_v58 = vmul.f32 %v2009_v34, %v4488_v7  ;;  %v2044_v50 = vld [vmem:[#allocation5 + $0xc40] sm:$0xff] }
 0x272   : >> { %v2250_v2 = vmax.f32 %v2242_v54, 0.0  ;;  %v2254_v33 = vmax.f32 %v2246_v51, 0.0  ;;  %v1977_v26 = vadd.f32 %v1960_v31, %v1946_v36  ;;  %v1979_v46 = vadd.f32 %v5020_v23, %v1948_v10  ;;  %v2048_v35 = vld [vmem:[#allocation5 + $0xc60] sm:$0xff] }
 0x273   : >> { %v1981_v56 = vadd.f32 %v1960_v31, %v1950_v24  ;;  %v1983_v8 = vadd.f32 %v5020_v23, %v1952_v55  ;;  %v2030_v13 = vmul.f32 %v2022_v28, %v4495_v53  ;;  %v2034_v41 = vmul.f32 %v2026_v11, %v4492_v14  ;;  %v4574_v32 = vld [vmem:[#allocation7 + $0x7] ss:$8 sm:$0xf] }
 0x274   : >> { %v4560_v43 = vadd.f32 %v2250_v2, %v4492_v14  ;;  %v4563_v20 = vadd.f32 %v2254_v33, %v4495_v53  ;;  %v1985_v38 = vmax.f32 %v1977_v26, 0.0  ;;  %v1987_v62 = vmax.f32 %v1979_v46, 0.0  ;;  %v2073_v42 = vld [vmem:[#allocation5 + $0xca0] sm:$0xff] }
 0x275   : >> { %v1989_v37 = vmax.f32 %v1981_v56, 0.0  ;;  %v1991_v61 = vmax.f32 %v1983_v8, 0.0  ;;  %v2038_v9 = vadd.f32 %v2030_v13, %v2013_v18  ;;  %v4578_v60 = vrot.slane %v4574_v32, %v5019_v1  ;;  %v2094_v4 = vld [vmem:[#allocation5 + $0xcc0] sm:$0xff]  ;;  %v2076_v13 = vld [vmem:[#allocation5 + $0xcb8] sm:$0xff] }
 0x276   : >> { %v2272_v17 = vadd.f32 %v4563_v20, %v4560_v43  ;;  %v4569_v3 = vadd.f32 %v1985_v38, %v4407_v59  ;;  %v4572_v6 = vadd.f32 %v1987_v62, %v4413_v47  ;;  %v2069_v59 = vld [vmem:[#allocation5 + $0xc80] sm:$0xff]  ;;  %v2042_v52 = vadd.f32 %v2034_v41, %v2017_v58  ;;  %v2072_v58 = vld [vmem:[#allocation5 + $0xc98] sm:$0xff] }
 0x277   : >> { %v4581_v25 = vadd.f32 %v1989_v37, %v4419_v27  ;;  %v4584_v39 = vadd.f32 %v1991_v61, %v4425_v30  ;;  %v2055_v47 = vmul.f32 %v2047_v16, %v4498_v0  ;;  %v2098_v45 = vld [vmem:[#allocation5 + $0xce0] sm:$0xff]  ;;  %v2059_v40 = vmul.f32 %v2051_v22, %v4488_v7  ;;  %v2097_v61 = vld [vmem:[#allocation5 + $0xcd8] sm:$0xff] }
 0x278   : >> { %v2273_v57 = vrot.slane %v2272_v17, 4  ;;  %v2014_v15 = vmul.f32 %v2006_v48, %v4569_v3  ;;  %v2031_v49 = vmul.f32 %v2023_v5, %v4572_v6  ;;  %v2119_v63 = vld [vmem:[#allocation5 + $0xd00] sm:$0xff]  ;;  %v2056_v19 = vmul.f32 %v2048_v35, %v4569_v3 }
 0x279   : >> { %v2010_v27 = vmul.f32 %v2002_v29, %v4581_v25  ;;  %v2027_v30 = vmul.f32 %v2019_v44, %v4584_v39  ;;  %v2052_v36 = vmul.f32 %v2044_v50, %v4581_v25  ;;  %v2123_v54 = vld [vmem:[#allocation5 + $0xd20] sm:$0xff]  ;;  %v2077_v31 = vmul.f32 %v2069_v59, %v4569_v3 }
 0x27a   : >> { %v2144_v51 = vld [vmem:[#allocation5 + $0xd40] sm:$0xff]  ;;  %v2274_v10 = vadd.f32 %v2273_v57, %v2272_v17  ;;  %v2039_v21 = vadd.f32 %v2031_v49, %v2014_v15  ;;  %v2081_v34 = vmul.f32 %v2073_v42, %v4581_v25  ;;  %v2102_v2 = vmul.f32 %v2094_v4, %v4572_v6  ;;  %v2101_v17 = vld [vmem:[#allocation5 + $0xcf8] sm:$0xff] }
 0x27b   : >> { %v2148_v28 = vld [vmem:[#allocation5 + $0xd60] sm:$0xff]  ;;  %v2035_v18 = vadd.f32 %v2027_v30, %v2010_v27  ;;  %v2106_v33 = vmul.f32 %v2098_v45, %v4584_v39  ;;  %v2127_v26 = vmul.f32 %v2119_v63, %v4569_v3  ;;  %v2131_v56 = vmul.f32 %v2123_v54, %v4581_v25  ;;  %v2122_v42 = vld [vmem:[#allocation5 + $0xd18] sm:$0xff] }
 0x27c   : >> { %v2169_v24 = vld [vmem:[#allocation5 + $0xd80] sm:$0xff]  ;;  %v2275_v46 = vrot.slane %v2274_v10, 2  ;;  %v2064_v11 = vadd.f32 %v2056_v19, %v2039_v21  ;;  %v2152_v8 = vmul.f32 %v2144_v51, %v4581_v25  ;;  %v2156_v62 = vmul.f32 %v2148_v28, %v4569_v3  ;;  %v2126_v57 = vld [vmem:[#allocation5 + $0xd38] sm:$0xff] }
 0x27d   : >> { %v2173_v55 = vld [vmem:[#allocation5 + $0xda0] sm:$0xff]  ;;  %v2060_v38 = vadd.f32 %v2052_v36, %v2035_v18  ;;  %v2177_v29 = vmul.f32 %v2169_v24, %v4584_v39  ;;  %v2063_v22 = vadd.f32 %v2055_v47, %v2038_v9  ;;  %v2067_v50 = vadd.f32 %v2059_v40, %v2042_v52  ;;  %v2147_v63 = vld [vmem:[#allocation5 + $0xd58] sm:$0xff]  ;;  %v2004_v18 = vld [vmem:[#allocation5 + $0xbd0] sm:$0xff] }
 0x27e   : >> { %v2194_v23 = vld [vmem:[#allocation5 + $0xdc0] sm:$0xff]  ;;  %v2181_v16 = vmul.f32 %v2173_v55, %v4572_v6  ;;  %v2276_v48 = vadd.f32 %v2275_v46, %v2274_v10  ;;  %v2089_v5 = vadd.f32 %v2081_v34, %v2064_v11  ;;  %v2080_v35 = vmul.f32 %v2072_v58, %v4488_v7  ;;  %v2151_v47 = vld [vmem:[#allocation5 + $0xd78] sm:$0xff] }
 0x27f   : >> { %v2198_v37 = vld [vmem:[#allocation5 + $0xde0] sm:$0xff]  ;;  %v2202_v41 = vmul.f32 %v2194_v23, %v4581_v25  ;;  %v2085_v44 = vadd.f32 %v2077_v31, %v2060_v38  ;;  %v2084_v59 = vmul.f32 %v2076_v13, %v4498_v0  ;;  %v2105_v45 = vmul.f32 %v2097_v61, %v4492_v14  ;;  %v2172_v52 = vld [vmem:[#allocation5 + $0xd98] sm:$0xff]  ;;  %v2046_v61 = vld [vmem:[#allocation5 + $0xc50] sm:$0xff] }
 0x280   : >> { %v2277_v15 = vrot.slane %v2276_v48, 1  ;;  %v2114_v49 = vadd.f32 %v2106_v33, %v2089_v5  ;;  %v2206_v4 = vmul.f32 %v2198_v37, %v4569_v3  ;;  %v2088_v30 = vadd.f32 %v2080_v35, %v2063_v22  ;;  %v2176_v40 = vld [vmem:[#allocation5 + $0xdb8] sm:$0xff]  ;;  %v2025_v37 = vld [vmem:[#allocation5 + $0xc30] sm:$0xff] }
 0x281   : >> { %v2110_v27 = vadd.f32 %v2102_v2, %v2085_v44  ;;  %v2092_v36 = vadd.f32 %v2084_v59, %v2067_v50  ;;  %v2109_v9 = vmul.f32 %v2101_v17, %v4495_v53  ;;  %v2130_v51 = vmul.f32 %v2122_v42, %v4488_v7  ;;  %v2197_v21 = vld [vmem:[#allocation5 + $0xdd8] sm:$0xff]  ;;  %v2008_v2 = vld [vmem:[#allocation5 + $0xbf0] sm:$0xff] }
 0x282   : >> { %v4610_v19 = vadd.f32 %v2277_v15, %v2276_v48  ;;  %v2139_v54 = vadd.f32 %v2131_v56, %v2114_v49  ;;  %v2134_v10 = vmul.f32 %v2126_v57, %v4498_v0  ;;  %v2113_v34 = vadd.f32 %v2105_v45, %v2088_v30  ;;  %v2201_v55 = vld [vmem:[#allocation5 + $0xdf8] sm:$0xff]  ;;  %v2021_v56 = vld [vmem:[#allocation5 + $0xc10] sm:$0xff] }
 0x283   : >> { %v2135_v31 = vadd.f32 %v2127_v26, %v2110_v27  ;;  %v2117_v28 = vadd.f32 %v2109_v9, %v2092_v36  ;;  %v2155_v24 = vmul.f32 %v2147_v63, %v4498_v0  ;;  %v2159_v23 = vmul.f32 %v2151_v47, %v4488_v7  ;;  %v2050_v50 = vld [vmem:[#allocation5 + $0xc70] sm:$0xff] }
 0x284   : >> { %2295 = vrot.lane.b32.xlu1 %v4610_v19, %s2890_s7  ;;  %v2164_v33 = vadd.f32 %v2156_v62, %v2139_v54  ;;  %v2180_v46 = vmul.f32 %v2172_v52, %v4495_v53  ;;  %v2184_v11 = vmul.f32 %v2176_v40, %v4492_v14  ;;  %v2138_v58 = vadd.f32 %v2130_v51, %v2113_v34  ;;  %v5021_v59 = vld [vmem:[#allocation19_spill] sm:$0xff] }
 0x285   : >> { %v2160_v26 = vadd.f32 %v2152_v8, %v2135_v31  ;;  %v2142_v13 = vadd.f32 %v2134_v10, %v2117_v28  ;;  %v2205_v38 = vmul.f32 %v2197_v21, %v4498_v0  ;;  %v2209_v5 = vmul.f32 %v2201_v55, %v4488_v7  ;;  %v2071_v8 = vld [vmem:[#allocation5 + $0xc90] sm:$0xff] }
 0x286   : >> { %v2189_v48 = vadd.f32 %v2181_v16, %v2164_v33  ;;  %v2012_v22 = vmul.f32 %v2004_v18, %v4584_v39  ;;  %v2016_v62 = vmul.f32 %v2008_v2, %v4572_v6  ;;  %v2163_v44 = vadd.f32 %v2155_v24, %v2138_v58  ;;  %v2075_v27 = vld [vmem:[#allocation5 + $0xcb0] sm:$0xff] }
 0x287   : >> { %v2185_v17 = vadd.f32 %v2177_v29, %v2160_v26  ;;  %v2167_v53 = vadd.f32 %v2159_v23, %v2142_v13  ;;  %v2029_v14 = vmul.f32 %v2021_v56, %v4581_v25  ;;  %v2236_v42 = vrot.slane %v4574_v32, %v5021_v59  ;;  %v2096_v29 = vld [vmem:[#allocation5 + $0xcd0] sm:$0xff] }
 0x288   : >> { %v2214_v35 = vadd.f32 %v2206_v4, %v2189_v48  ;;  %v2033_v57 = vmul.f32 %v2025_v37, %v4569_v3  ;;  %v2054_v16 = vmul.f32 %v2046_v61, %v4584_v39  ;;  %v2188_v49 = vadd.f32 %v2180_v46, %v2163_v44  ;;  %v2100_v51 = vld [vmem:[#allocation5 + $0xcf0] sm:$0xff] }
 0x289   : >> { %v2210_v15 = vadd.f32 %v2202_v41, %v2185_v17  ;;  %v2192_v45 = vadd.f32 %v2184_v11, %v2167_v53  ;;  %v2037_v63 = vadd.f32 %v2029_v14, %v2012_v22  ;;  %v2058_v9 = vmul.f32 %v2050_v50, %v4572_v6  ;;  %v2121_v10 = vld [vmem:[#allocation5 + $0xd10] sm:$0xff] }
 0x28a   : >> { %v2245_v30 = vadd.f32 %v4578_v60, %v2214_v35  ;;  %v2041_v36 = vadd.f32 %v2033_v57, %v2016_v62  ;;  %v2079_v4 = vmul.f32 %v2071_v8, %v4572_v6  ;;  %v2213_v52 = vadd.f32 %v2205_v38, %v2188_v49  ;;  %v2125_v2 = vld [vmem:[#allocation5 + $0xd30] sm:$0xff] }
 0x28b   : >> { %v2241_v47 = vadd.f32 %v4578_v60, %v2210_v15  ;;  %v2217_v40 = vadd.f32 %v2209_v5, %v2192_v45  ;;  %v2062_v54 = vadd.f32 %v2054_v16, %v2037_v63  ;;  %v2083_v31 = vmul.f32 %v2075_v27, %v4584_v39  ;;  %v2146_v33 = vld [vmem:[#allocation5 + $0xd50] sm:$0xff]  ;;  %v5022_v27 = vld [vmem:[#allocation18_spill] sm:$0xff] }
 0x28c   : >> { %v2253_v41 = vmax.f32 %v2245_v30, 0.0  ;;  %v2066_v21 = vadd.f32 %v2058_v9, %v2041_v36  ;;  %v2104_v34 = vmul.f32 %v2096_v29, %v4569_v3  ;;  %v2244_v24 = vadd.f32 %v2236_v42, %v2213_v52  ;;  %v2150_v38 = vld [vmem:[#allocation5 + $0xd70] sm:$0xff] }
 0x28d   : >> { %v2249_v28 = vmax.f32 %v2241_v47, 0.0  ;;  %v2248_v55 = vadd.f32 %v2236_v42, %v2217_v40  ;;  %v2087_v18 = vadd.f32 %v2079_v4, %v2062_v54  ;;  %v2108_v46 = vmul.f32 %v2100_v51, %v4581_v25  ;;  %v2171_v5 = vld [vmem:[#allocation5 + $0xd90] sm:$0xff] }
 0x28e   : >> { %v4636_v23 = vadd.f32 %v2253_v41, %v4581_v25  ;;  %v2091_v60 = vadd.f32 %v2083_v31, %v2066_v21  ;;  %v2129_v11 = vmul.f32 %v2121_v10, %v4572_v6  ;;  %v2252_v26 = vmax.f32 %v2244_v24, 0.0  ;;  %v2175_v53 = vld [vmem:[#allocation5 + $0xdb0] sm:$0xff] }
 0x28f   : >> { %v4641_v56 = vadd.f32 %v2249_v28, %v4569_v3  ;;  %v2256_v58 = vmax.f32 %v2248_v55, 0.0  ;;  %v2112_v13 = vadd.f32 %v2104_v34, %v2087_v18  ;;  %v2133_v61 = vmul.f32 %v2125_v2, %v4584_v39  ;;  %v2196_v14 = vld [vmem:[#allocation5 + $0xdd0] sm:$0xff] }
 0x290   : >> { %v2116_v37 = vadd.f32 %v2108_v46, %v2091_v60  ;;  %v2154_v48 = vmul.f32 %v2146_v33, %v4584_v39  ;;  %v4648_v62 = vadd.f32 %v2252_v26, %v4488_v7  ;;  %v2158_v8 = vmul.f32 %v2150_v38, %v4572_v6  ;;  %v2200_v16 = vld [vmem:[#allocation5 + $0xdf0] sm:$0xff] }
 0x291   : >> { %v2265_v22 = vadd.f32 %v4636_v23, %v4641_v56  ;;  %v4651_v17 = vadd.f32 %v2256_v58, %v4498_v0  ;;  %v2137_v44 = vadd.f32 %v2129_v11, %v2112_v13  ;;  %v2179_v57 = vmul.f32 %v2171_v5, %v4581_v25 }
 0x292   : >> { %v2141_v50 = vadd.f32 %v2133_v61, %v2116_v37  ;;  %v2183_v7 = vmul.f32 %v2175_v53, %v4569_v3  ;;  %v2204_v0 = vmul.f32 %v2196_v14, %v4584_v39  ;;  %v2232_v29 = vrot.slane %v4574_v32, %v5022_v27 }
 0x293   : >> { %v2266_v35 = vrot.slane %v2265_v22, 4  ;;  %v2286_v59 = vadd.f32 %v4651_v17, %v4648_v62  ;;  %v2162_v42 = vadd.f32 %v2154_v48, %v2137_v44  ;;  %v2208_v36 = vmul.f32 %v2200_v16, %v4572_v6 }
 0x294   : >> { %v2166_v15 = vadd.f32 %v2158_v8, %v2141_v50 }
 0x295   : >> { %v2267_v49 = vadd.f32 %v2266_v35, %v2265_v22  ;;  %v2287_v45 = vrot.slane %v2286_v59, 4  ;;  %v2187_v63 = vadd.f32 %v2179_v57, %v2162_v42 }
 0x296   : >> { %v2191_v30 = vadd.f32 %v2183_v7, %v2166_v15  ;;  %v2891_v7 = vmov 1966171168  }
 0x297   : >> { %v2268_v9 = vrot.slane %v2267_v49, 2  ;;  %v2288_v4 = vadd.f32 %v2287_v45, %v2286_v59  ;;  %v2212_v47 = vadd.f32 %v2204_v0, %v2187_v63  ;;  %v2364_v0 = vunpack.c.l.s4 %v2891_v7 }
 0x298   : >> { %v2216_v52 = vadd.f32 %v2208_v36, %v2191_v30 }
 0x299   : >> { %v2269_v25 = vadd.f32 %v2268_v9, %v2267_v49  ;;  %v2289_v40 = vrot.slane %v2288_v4, 2  ;;  %v2243_v54 = vadd.f32 %v2232_v29, %v2212_v47  ;;  %v2365_v36 = vunpack.c.0.s8 %v2364_v0 }
 0x29a   : >> { %v2247_v51 = vadd.f32 %v2232_v29, %v2216_v52 }
 0x29b   : >> { %v2270_v3 = vrot.slane %v2269_v25, 1  ;;  %v2290_v10 = vadd.f32 %v2289_v40, %v2288_v4  ;;  %v2251_v41 = vmax.f32 %v2243_v54, 0.0 }
 0x29c   : >> { %v2255_v21 = vmax.f32 %v2247_v51, 0.0 }
 0x29d   : >> { %v2271_v31 = vadd.f32 %v2270_v3, %v2269_v25  ;;  %v2291_v34 = vrot.slane %v2290_v10, 1  ;;  %v2259_v28 = vadd.f32 %v2251_v41, %v4572_v6  ;;  %v5023_v6 = vld [vmem:[#allocation28_spill] sm:$0xff]  ;;  %v2368_v25 = vsub.s32 %v2365_v36, %v5011_v12 }
 0x29e   : >> { %v4664_v32 = vadd.f32 %v2255_v21, %v4584_v39  ;;  %vm2301_vm4 = vcmp.lt.s32.totalorder %v5023_v6, 32 }
 0x29f   : >> { %2293 = vrot.lane.b32.xlu0 %v2271_v31, %s2890_s7  ;;  %v2292_v24 = vadd.f32 %v2291_v34, %v2290_v10 }
 0x2a0   : >> { %v2279_v55 = vadd.f32 %v4664_v32, %v2259_v28 }
 0x2a1   : >> { %2299 = vrot.lane.b32.xlu1 %v2292_v24, %s2890_s7 }
 0x2a2   : >> { %v2280_v18 = vrot.slane %v2279_v55, 4 }
 0x2a4   : >> { %v2281_v2 = vadd.f32 %v2280_v18, %v2279_v55 }
 0x2a6   : >> { %v2282_v33 = vrot.slane %v2281_v2, 2 }
 0x2a8   : >> { %v2283_v60 = vadd.f32 %v2282_v33, %v2281_v2 }
 0x2aa   : >> { %v2284_v46 = vrot.slane %v2283_v60, 1 }
 0x2ac   : >> { %v2285_v11 = vadd.f32 %v2284_v46, %v2283_v60 }
 0x2ae   : >> { %2297 = vrot.lane.b32.xlu0 %v2285_v11, %s2890_s7 }
 0x2f6   : >> { %v2296_v26 = vpop.permute.xlu1 %2295 }
 0x311   : >> { %v2294_v39 = vpop.permute.xlu0 %2293 }
 0x312   : >> { %v2304_v58 = vsel %vm2301_vm4, %v2294_v39, %v2296_v26 }
 0x313   : >> { %v2307_v13 = vadd.f32 %v2304_v58, %v4610_v19  ;;  %v2300_v38 = vpop.permute.xlu1 %2299 }
 0x314   : >> { %v2305_v37 = vsel %vm2301_vm4, %v2300_v38, %v2294_v39 }
 0x315   : >> { %v2306_v61 = vadd.f32 %v2305_v37, %v2271_v31  ;;  %2312 = vrot.lane.b32.xlu1 %v2307_v13, %s2889_s25 }
 0x317   : >> { %2310 = vrot.lane.b32.xlu0 %v2306_v61, %s2889_s25 }
 0x320   : >> { %v2298_v48 = vpop.permute.xlu0 %2297 }
 0x321   : >> { %v2302_v5 = vsel %vm2301_vm4, %v2298_v48, %v2300_v38  ;;  %v2303_v22 = vsel %vm2301_vm4, %v2296_v26, %v2298_v48 }
 0x322   : >> { %v2308_v44 = vadd.f32 %v2303_v22, %v2285_v11  ;;  %v2309_v53 = vadd.f32 %v2302_v5, %v2292_v24 }
 0x324   : >> { %2316 = vrot.lane.b32.xlu1 %v2309_v53, %s2889_s25  ;;  %2314 = vrot.lane.b32.xlu0 %v2308_v44, %s2889_s25  ;;  %s2778_s25 = scalar_lea.vmem (%p260_p11), %s2777_s30, 4096 }
 0x325   : > { %p2780_p12 = scmp.lt.s32.totalorder (%p260_p11), %s2778_s25, %s2772_s6 }
 0x327   : > { %p2781_p1 = por (%p260_p11), %p2780_p12, %p2779_p9 }
 0x329   : > { %p2782_p13 = pnand (%p260_p11), %p2781_p1, %p2775_p7 }
 0x387   : >> { %v2313_v14 = vpop.permute.xlu1 %2312 }
 0x389   : >> { %v2311_v50 = vpop.permute.xlu0 %2310 }
 0x38a   : >> { %v2320_v19 = vsel %vm471_vm3, %v2311_v50, %v2313_v14 }
 0x38b   : >> { %v2323_v35 = vadd.f32 %v2320_v19, %v2307_v13 }
 0x396   : >> { %v2317_v8 = vpop.permute.xlu1 %2316  ;;  %v2315_v59 = vpop.permute.xlu0 %2314 }
 0x397   : >> { %v2321_v42 = vsel %vm471_vm3, %v2317_v8, %v2311_v50  ;;  %v2318_v57 = vsel %vm471_vm3, %v2315_v59, %v2317_v8  ;;  %v2319_v16 = vsel %vm471_vm3, %v2313_v14, %v2315_v59 }
 0x398   : >> { %v2322_v15 = vadd.f32 %v2321_v42, %v2306_v61  ;;  %v2324_v49 = vadd.f32 %v2319_v16, %v2308_v44  ;;  %v2325_v45 = vadd.f32 %v2318_v57, %v2309_v53 }
 0x39a   : >> { %v2327_v63 = vadd.f32 %v2323_v35, %v2322_v15  ;;  %v2326_v27 = vadd.f32 %v2325_v45, %v2322_v15  ;;  %v2328_v29 = vadd.f32 %v2324_v49, %v2323_v35  ;;  %v2329_v30 = vadd.f32 %v2325_v45, %v2324_v49 }
 0x39c   : >> { %v2330_v9 = vadd.f32 %v2328_v29, %v2326_v27  ;;  %v2331_v4 = vadd.f32 %v2329_v30, %v2327_v63 }
 0x39e   : >> { %v2332_v47 = vmul.f32 0.00390625, %v2330_v9  ;;  %v2333_v52 = vmul.f32 0.00390625, %v2331_v4 }
 0x3a0   : >> { %v2337_v40 = vrot.slane %v2332_v47, %v5019_v1  ;;  %v2341_v54 = vrot.slane %v2333_v52, %v5019_v1  ;;  %v2362_v51 = vcombine.low %v2332_v47, %v2333_v52 }
 0x3a2   : >> { %v2342_v3 = vmul.f32 %v2337_v40, %v4641_v56  ;;  %v2343_v10 = vmul.f32 %v2341_v54, %v4560_v43  ;;  %v2344_v41 = vmul.f32 %v2337_v40, %v2259_v28  ;;  %v2345_v21 = vmul.f32 %v2341_v54, %v4648_v62 }
 0x3a3   : >> { %v2346_v31 = vmul.f32 %v2337_v40, %v4636_v23  ;;  %v2347_v34 = vmul.f32 %v2341_v54, %v4563_v20  ;;  %v2348_v12 = vmul.f32 %v2337_v40, %v4664_v32  ;;  %v2349_v24 = vmul.f32 %v2341_v54, %v4651_v17 }
 0x3a4   : >> { %2352 = vst [vmem:[%s2351_s27] sm:$0xff] %v2342_v3  ;;  %2353 = vst [vmem:[%s2351_s27 + $0x8] sm:$0xff] %v2343_v10  ;;  %v2369_v1 = vrot.slane %v2362_v51, %v2368_v25  ;;  %v5024_v56 = vlaneseq  ;;  %262 = sbr.rel (!%p260_p11) target bundleno = 109 (0x6d), region = 174 }
 0x3a5   : >> { %2354 = vst [vmem:[%s2351_s27 + $0x10] sm:$0xff] %v2344_v41  ;;  %2355 = vst [vmem:[%s2351_s27 + $0x18] sm:$0xff] %v2345_v21 }
 0x3a6   : >> { %2356 = vst [vmem:[%s2351_s27 + $0x20] sm:$0xff] %v2346_v31  ;;  %2357 = vst [vmem:[%s2351_s27 + $0x28] sm:$0xff] %v2347_v34  ;;  %v2370_v43 = vcombine.low %v2369_v1, %v2369_v1  ;;  %vm2383_vm5 = vcmp.lt.s32.totalorder %v5024_v56, 512 }
 0x3a7   : >> { %2358 = vst [vmem:[%s2351_s27 + $0x30] sm:$0xff] %v2348_v12  ;;  %2359 = vst [vmem:[%s2351_s27 + $0x38] sm:$0xff] %v2349_v24 }
 0x3a8   : >> { %v2377_v23 = vrot.slane %v2370_v43, %v2368_v25 }
 0x3aa   : >> { %2385 = vst.msk [vmem:[%s2380_s29] sm:$0xf] %vm2383_vm5, %v2377_v23 }
 0x3ab   : > { %2785 = shalt.err (!%p2782_p13)
}
 0x3ac   : > { %s2786_s11 = scalar_lea.hbm %s4707_s24, 2048  ;;  %s2790_s20 = scalar_lea.hbm %s4790_s3, 4096 }
 0x3ad   : > { %p2787_p6 = scmp.ne.s32.totalorder %s4707_s24, %s2786_s11  ;;  %p2791_p5 = scmp.lt.u32.totalorder %s4707_s24, %s4790_s3 }
 0x3ae   : > { %p2792_p8 = scmp.lt.u32.totalorder %s2790_s20, %s2786_s11  ;;  %p2794_p0 = scmp.lt.u32.totalorder %s2786_s11, %s4707_s24 }
 0x3af   : > { %p2788_p10 = pnand %p2787_p6, %p5025_p2 }
 0x3b0   : > { %p2793_p11 = por %p2792_p8, %p2791_p5 }
 0x3b1   : > { %p2789_p4 = pneg %p2788_p10 }
 0x3b2   : > { %p2795_p3 = por %p2794_p0, %p2793_p11 }
 0x3b4   : > { %p2796_p7 = pnand %p2795_p3, %p2789_p4 }
 0x3b6   : > { %2799 = shalt.err (!%p2796_p7)
}
 0x3b7   : > { %s2893_s26 = smov 512   ;;  %s2894_s10 = smov 32  }
 0x3b8   : > { %2605 = dma.vmem_to_hbm [thread:$0]  (%p5025_p2), %s4710_s23, 2048, %s4707_s24, %s2387_s21, %s2893_s26, %s2893_s26, %s2894_s10  }
 0x3b9   : > { %s2594_s6 = sshll.u32 %s2944_s19, 7  ;;  %s2423_s28 = sshll.u32 %s3118_s12, 4  ;;  %s4743_s28 = int_to_ptr.vmem [resolvable:$true] %s2423_s28 }
 0x3ba   : > { %s4741_s11 = scalar_lea.hbm %s4791_s4, %s2594_s6  ;;  %s2392_s7 = scalar_lea.sflag [#allocation10], %s3101_s8 }
 0x3bb   : > { %s2800_s27 = scalar_lea.vmem %s4743_s28, 128  ;;  %s2895_s20 = smov [#allocation9]  }
 0x3bc   : > { %p2801_p9 = scmp.ne.s32.totalorder %s4743_s28, %s2800_s27  ;;  %s2804_s24 = sshll.u32 %s2895_s20, 4  ;;  %s2805_s24 = int_to_ptr.vmem [resolvable:$false] %s2804_s24 }
 0x3bd   : > { %s2806_s19 = scalar_lea.vmem %s2805_s24, 256  ;;  %p2807_p13 = scmp.lt.s32.totalorder %s4743_s28, %s2805_s24 }
 0x3be   : > { %p2802_p12 = pnand %p2801_p9, %p5025_p2  ;;  %p2808_p6 = scmp.lt.s32.totalorder %s2806_s19, %s2800_s27 }
 0x3c0   : > { %p2803_p1 = pneg %p2802_p12  ;;  %p2809_p10 = por %p2808_p6, %p2807_p13 }
 0x3c2   : > { %p2810_p4 = pnand %p2809_p10, %p2803_p1 }
 0x3c4   : > { %2813 = shalt.err (!%p2810_p4)
}
 0x3c5   : > { %s2814_s12 = scalar_lea.hbm %s4741_s11, 128  ;;  %s2818_s29 = scalar_lea.hbm %s4791_s4, 256 }
 0x3c6   : > { %p2815_p5 = scmp.ne.s32.totalorder %s4741_s11, %s2814_s12  ;;  %p2819_p0 = scmp.lt.u32.totalorder %s4741_s11, %s4791_s4 }
 0x3c7   : > { %p2820_p3 = scmp.lt.u32.totalorder %s2818_s29, %s2814_s12  ;;  %p2822_p9 = scmp.lt.u32.totalorder %s2814_s12, %s4741_s11 }
 0x3c8   : > { %p2816_p8 = pnand %p2815_p5, %p5025_p2 }
 0x3c9   : > { %p2821_p7 = por %p2820_p3, %p2819_p0 }
 0x3ca   : > { %p2817_p11 = pneg %p2816_p8 }
 0x3cb   : > { %p2823_p12 = por %p2822_p9, %p2821_p7 }
 0x3cd   : > { %p2824_p1 = pnand %p2823_p12, %p2817_p11 }
 0x3cf   : > { %2827 = shalt.err (!%p2824_p1)
}
 0x3d0   : > { %s2896_s10 = smov 64   ;;  %s2897_s6 = smov 4  }
 0x3d1   : > { %2606 = dma.vmem_to_hbm [thread:$0]  (%p5025_p2), %s4743_s28, 128, %s4741_s11, %s2392_s7, %s2896_s10, %s2896_s10, %s2897_s6  }
 0x3d2 PF: > { %s2438_s30 = sand.u32 1, %s2866_s15   ;;  %p5026_p13 = scmp.ne.s32.totalorder %s4863_s22, 0 }
 0x3d3   : > { %p5027_p6 = scmp.ge.s32.totalorder %s2878_s18, 2  ;;  %s2439_s25 = scalar_lea.sflag [#allocation4], %s2438_s30 }
 0x3d5   : > { %p2621_p10 = pnand %p5027_p6, %p5026_p13 }
 0x3d7   : > { %2857 = dma.done.wait (!%p2621_p10), %s2439_s25, 2048  }
 0x3d8   : > { %2859 = vsyncadd (!%p2621_p10), %s2439_s25, 4294965248  ;;  %s2448_s27 = scalar_lea.sflag [#allocation10], %s2438_s30 }
 0x3d9   : > { %2861 = dma.done.wait (!%p2621_p10), %s2448_s27, 128  }
 0x3da   : > { %2863 = vsyncadd (!%p2621_p10), %s2448_s27, 4294967168  ;;  %p22_p2 = scmp.ge.s32.totalorder %s3036_s9, 4   ;;  %s5028_s15 = smov %s2870_s16 }
 0x3db   : > { %s5029_s16 = smov %s2874_s17  ;;  %s5030_s17 = smov %s3052_s14 }
 0x3dc   : > { %s5031_s18 = smov %s3036_s9  ;;  %24 = sbr.rel (!%p22_p2) target bundleno = 8 (0x8), region = 185 }
 0x3e3   :  { %2453 = vsyncpa [#allocation3], 1 }
 0x3e4   :  { %2455 = vsyncpa [#allocation3 + $0x1], 1 }
 0x3e5   :  { %2456 = vsyncpa [#allocation6], 1 }
 0x3e6   :  { %2457 = vsyncpa [#allocation4], 1 }
 0x3e7   :  { %2459 = vsyncpa [#allocation4 + $0x1], 1 }
 0x3e8   :  { %2460 = vsyncpa [#allocation10], 1 }
 0x3e9   :  { %2462 = vsyncpa [#allocation10 + $0x1], 1 }

</bundles_post_ra>
